<compile_context>
chip_gen: v6e
topology: v6e:2x2x1
jax: 0.10.0
libtpu: 0.0.40
codegen_flags: <defaults>
</compile_context>

<pallas_src>
import jax
import jax.numpy as jnp
from jax import lax
from jax.experimental import pallas as pl
from jax.experimental.pallas import tpu as pltpu

# Multi_Attn defaults
LAYER_NUM = 3
HIDDEN_DIM = 16
HEAD_NUM = 16
MLP_RATIO = 4
EPS = 1e-5  # nn.LayerNorm default

PARAM_ORDER = [
    "n1g", "n1b", "qw", "qb", "kw", "kb", "vw", "vb", "pw", "pb",
    "n2g", "n2b", "f1w", "f1b", "f2w", "f2b", "nfg", "nfb",
]


def _layernorm(x, gamma, beta):
    # PyTorch LayerNorm: biased variance, eps inside sqrt.
    mu = jnp.mean(x, axis=-1, keepdims=True)
    var = jnp.mean(jnp.square(x - mu), axis=-1, keepdims=True)
    return (x - mu) * lax.rsqrt(var + EPS) * gamma + beta


def _erf(x):
    # Abramowitz & Stegun 7.1.26 polynomial erf, |abs err| < 1.5e-7 (f32-exact).
    p = 0.3275911
    a1, a2, a3, a4, a5 = 0.254829592, -0.284496736, 1.421413741, -1.453152027, 1.061405429
    ax = jnp.abs(x)
    t = 1.0 / (1.0 + p * ax)          # kept exact for <1.5e-7 GELU match
    poly = ((((a5 * t + a4) * t + a3) * t + a2) * t + a1) * t
    y = 1.0 - poly * jnp.exp(-ax * ax)
    return jnp.where(x >= 0.0, y, -y)


def _gelu_exact(x):
    # nn.GELU() default = exact erf-based GELU
    return 0.5 * x * (1.0 + _erf(x * 0.7071067811865476))


def multi_attn_kernel(w_ref,
                      n1g_ref, n1b_ref, qw_ref, qb_ref, kw_ref, kb_ref,
                      vw_ref, vb_ref, pw_ref, pb_ref,
                      n2g_ref, n2b_ref, f1w_ref, f1b_ref, f2w_ref, f2b_ref,
                      nfg_ref, nfb_ref,
                      o_ref):
    TB, N, C = w_ref.shape
    H = HEAD_NUM
    Dh = C // H
    scale = float(Dh) ** -0.5
    M = TB * N

    # All (batch, token) rows share the same weights -> flatten so every dot
    # has an M-dimension of TB*N rows (N=8 keeps this sublane-aligned, free).
    x = w_ref[...].reshape(M, C)

    # Weights are a few KiB total; load once, slice per layer (static indices).
    n1g, n1b = n1g_ref[...], n1b_ref[...]
    qw, qb = qw_ref[...], qb_ref[...]
    kw, kb = kw_ref[...], kb_ref[...]
    vw, vb = vw_ref[...], vb_ref[...]
    pw, pb = pw_ref[...], pb_ref[...]
    n2g, n2b = n2g_ref[...], n2b_ref[...]
    f1w, f1b = f1w_ref[...], f1b_ref[...]
    f2w, f2b = f2w_ref[...], f2b_ref[...]

    for l in range(LAYER_NUM):          # static unroll over the 3 blocks
        # ------------------------- attention branch -------------------------
        h = _layernorm(x, n1g[l:l + 1], n1b[l:l + 1])
        # Three lane-aligned dots instead of slicing a fused (M, 3C) result.
        q = jnp.dot(h, qw[l], preferred_element_type=jnp.float32) + qb[l:l + 1]
        k = jnp.dot(h, kw[l], preferred_element_type=jnp.float32) + kb[l:l + 1]
        v = jnp.dot(h, vw[l], preferred_element_type=jnp.float32) + vb[l:l + 1]

        q3 = q.reshape(TB, N, C)
        k3 = k.reshape(TB, N, C)
        v3 = v.reshape(TB, N, C)

        if Dh == 1:
            # head_dim == 1 (dim=16, heads=16): per-head logits are rank-1
            # outer products -> compute all heads at once as VPU broadcasts,
            # softmax over the key axis (axis=2, sublane reduction).
            s = (q3[:, :, None, :] * k3[:, None, :, :]) * scale       # (TB,N,N,H)
            s = s - jnp.max(s, axis=2, keepdims=True)
            p = jnp.exp(s)
            denom = jnp.sum(p, axis=2, keepdims=True)
            p = p * pl.reciprocal(denom, approx=True)                 # EUP slot
            attn = jnp.sum(p * v3[:, None, :, :], axis=2)             # (TB,N,H)
        else:
            # Generic fallback (not traced for the default config).
            head_outs = []
            for hd in range(H):
                sl = slice(hd * Dh, (hd + 1) * Dh)
                qh, kh, vh = q3[..., sl], k3[..., sl], v3[..., sl]
                sh = jnp.einsum('bnd,bmd->bnm', qh, kh,
                                preferred_element_type=jnp.float32) * scale
                sh = sh - jnp.max(sh, axis=-1, keepdims=True)
                ph = jnp.exp(sh)
                ph = ph * pl.reciprocal(jnp.sum(ph, axis=-1, keepdims=True),
                                        approx=True)
                head_outs.append(jnp.einsum('bnm,bmd->bnd', ph, vh,
                                            preferred_element_type=jnp.float32))
            attn = jnp.concatenate(head_outs, axis=-1)

        attn = attn.reshape(M, C)
        attn = jnp.dot(attn, pw[l], preferred_element_type=jnp.float32) + pb[l:l + 1]
        x = x + attn

        # ---------------------------- MLP branch ----------------------------
        h = _layernorm(x, n2g[l:l + 1], n2b[l:l + 1])
        h = jnp.dot(h, f1w[l], preferred_element_type=jnp.float32) + f1b[l:l + 1]
        h = _gelu_exact(h)
        h = jnp.dot(h, f2w[l], preferred_element_type=jnp.float32) + f2b[l:l + 1]
        x = x + h

    # Final LayerNorm; store the whole (TB, N, C) block once.
    o_ref[...] = _layernorm(x, nfg_ref[...], nfb_ref[...]).reshape(TB, N, C)


def _pick_batch_tile(B, N):
    # Working set is KBs on every TPU generation, so VMEM never binds; pick the
    # tile purely to fill the matmul M-dim and amortize per-step overhead.
    target_rows = 2048
    if B * N <= target_rows:
        return B                      # tiny batch: single-step, whole slab
    best = 1
    for tb in range(1, B + 1):
        if B % tb == 0 and tb * N <= target_rows:
            best = tb
    return best


def multi_attn_forward(w, params, batch_tile=None):
    B, N, C = w.shape
    TB = batch_tile if batch_tile is not None else _pick_batch_tile(B, N)
    assert B % TB == 0

    # Split the fused qkv Linear (kept fused in the param dict, mirroring the
    # PyTorch module) into three lane-aligned weights in the wrapper so the
    # kernel never carves q/k/v out of a 3C-wide result.
    p = dict(params)
    qkvw, qkvb = p.pop("qkvw"), p.pop("qkvb")
    p["qw"], p["kw"], p["vw"] = (qkvw[:, :, 0:C], qkvw[:, :, C:2 * C],
                                 qkvw[:, :, 2 * C:3 * C])
    p["qb"], p["kb"], p["vb"] = (qkvb[:, 0:C], qkvb[:, C:2 * C],
                                 qkvb[:, 2 * C:3 * C])
    ordered = [p[k] for k in PARAM_ORDER]

    def full_spec(a):
        nd = a.ndim
        return pl.BlockSpec(a.shape, lambda b, _nd=nd: (0,) * _nd)

    in_specs = [pl.BlockSpec((TB, N, C), lambda b: (b, 0, 0))] + \
               [full_spec(a) for a in ordered]

    return pl.pallas_call(
        multi_attn_kernel,
        out_shape=jax.ShapeDtypeStruct((B, N, C), jnp.float32),
        grid=(B // TB,),
        in_specs=in_specs,
        out_specs=pl.BlockSpec((TB, N, C), lambda b: (b, 0, 0)),
        compiler_params=pltpu.CompilerParams(
            dimension_semantics=("parallel",)),   # batch tiles are independent
    )(w, *ordered)


def init_params(key, L=LAYER_NUM, C=HIDDEN_DIM, mlp_ratio=MLP_RATIO):
    """Deterministic synthetic parameters (shapes follow the PyTorch module).

    Linear weights are stored (in_features, out_features), i.e. y = x @ W + b,
    mathematically equivalent to nn.Linear's (out, in) + transpose.
    """
    hid = int(C * mlp_ratio)
    ks = jax.random.split(key, 8)
    std = 0.02
    f32 = jnp.float32
    return {
        "n1g": jnp.ones((L, C), f32),
        "n1b": jnp.zeros((L, C), f32),
        "qkvw": std * jax.random.normal(ks[0], (L, C, 3 * C), f32),
        "qkvb": 0.01 * jax.random.normal(ks[1], (L, 3 * C), f32),   # qkv_bias=True
        "pw": std * jax.random.normal(ks[2], (L, C, C), f32),
        "pb": 0.01 * jax.random.normal(ks[3], (L, C), f32),
        "n2g": jnp.ones((L, C), f32),
        "n2b": jnp.zeros((L, C), f32),
        "f1w": std * jax.random.normal(ks[4], (L, C, hid), f32),
        "f1b": 0.01 * jax.random.normal(ks[5], (L, hid), f32),
        "f2w": std * jax.random.normal(ks[6], (L, hid, C), f32),
        "f2b": 0.01 * jax.random.normal(ks[7], (L, C), f32),
        "nfg": jnp.ones((1, C), f32),
        "nfb": jnp.zeros((1, C), f32),
    }


if __name__ == "__main__":
    B, N, C = 2, 8, HIDDEN_DIM          # small shapes consistent with Multi_Attn(dim=16)
    key = jax.random.PRNGKey(0)
    k_x, k_p = jax.random.split(key)
    w = jax.random.normal(k_x, (B, N, C), jnp.float32)
    params = init_params(k_p)

    out = multi_attn_forward(w, params)
    jax.block_until_ready(out)
    assert out.shape == (B, N, C)
    assert bool(jnp.all(jnp.isfinite(out)))
    print("KERNEL_OK")
</pallas_src>

<mosaic_0001>
module attributes {stable_mosaic.version = 11 : i64} {
  func.func @multi_attn_kernel(%arg0: i32, %arg1: memref<2x8x16xf32, #tpu.memory_space<vmem>>, %arg2: memref<3x16xf32, #tpu.memory_space<vmem>>, %arg3: memref<3x16xf32, #tpu.memory_space<vmem>>, %arg4: memref<3x16x16xf32, #tpu.memory_space<vmem>>, %arg5: memref<3x16xf32, #tpu.memory_space<vmem>>, %arg6: memref<3x16x16xf32, #tpu.memory_space<vmem>>, %arg7: memref<3x16xf32, #tpu.memory_space<vmem>>, %arg8: memref<3x16x16xf32, #tpu.memory_space<vmem>>, %arg9: memref<3x16xf32, #tpu.memory_space<vmem>>, %arg10: memref<3x16x16xf32, #tpu.memory_space<vmem>>, %arg11: memref<3x16xf32, #tpu.memory_space<vmem>>, %arg12: memref<3x16xf32, #tpu.memory_space<vmem>>, %arg13: memref<3x16xf32, #tpu.memory_space<vmem>>, %arg14: memref<3x16x64xf32, #tpu.memory_space<vmem>>, %arg15: memref<3x64xf32, #tpu.memory_space<vmem>>, %arg16: memref<3x64x16xf32, #tpu.memory_space<vmem>>, %arg17: memref<3x16xf32, #tpu.memory_space<vmem>>, %arg18: memref<1x16xf32, #tpu.memory_space<vmem>>, %arg19: memref<1x16xf32, #tpu.memory_space<vmem>>, %arg20: memref<2x8x16xf32, #tpu.memory_space<vmem>>) attributes {dimension_semantics = [#tpu.dimension_semantics<parallel>], iteration_bounds = array<i64: 1>, scalar_prefetch = 0 : i64, scratch_operands = 0 : i64, tpu.core_type = #tpu.core_type<tc>, window_params = [{transform_indices = @transform_0, window_bounds = array<i64: 2, 8, 16>}, {pipeline_mode = #tpu.pipeline_mode<synchronous>, transform_indices = @transform_1, window_bounds = array<i64: 3, 16>}, {pipeline_mode = #tpu.pipeline_mode<synchronous>, transform_indices = @transform_2, window_bounds = array<i64: 3, 16>}, {pipeline_mode = #tpu.pipeline_mode<synchronous>, transform_indices = @transform_3, window_bounds = array<i64: 3, 16, 16>}, {pipeline_mode = #tpu.pipeline_mode<synchronous>, transform_indices = @transform_4, window_bounds = array<i64: 3, 16>}, {pipeline_mode = #tpu.pipeline_mode<synchronous>, transform_indices = @transform_5, window_bounds = array<i64: 3, 16, 16>}, {pipeline_mode = #tpu.pipeline_mode<synchronous>, transform_indices = @transform_6, window_bounds = array<i64: 3, 16>}, {pipeline_mode = #tpu.pipeline_mode<synchronous>, transform_indices = @transform_7, window_bounds = array<i64: 3, 16, 16>}, {pipeline_mode = #tpu.pipeline_mode<synchronous>, transform_indices = @transform_8, window_bounds = array<i64: 3, 16>}, {pipeline_mode = #tpu.pipeline_mode<synchronous>, transform_indices = @transform_9, window_bounds = array<i64: 3, 16, 16>}, {pipeline_mode = #tpu.pipeline_mode<synchronous>, transform_indices = @transform_10, window_bounds = array<i64: 3, 16>}, {pipeline_mode = #tpu.pipeline_mode<synchronous>, transform_indices = @transform_11, window_bounds = array<i64: 3, 16>}, {pipeline_mode = #tpu.pipeline_mode<synchronous>, transform_indices = @transform_12, window_bounds = array<i64: 3, 16>}, {pipeline_mode = #tpu.pipeline_mode<synchronous>, transform_indices = @transform_13, window_bounds = array<i64: 3, 16, 64>}, {pipeline_mode = #tpu.pipeline_mode<synchronous>, transform_indices = @transform_14, window_bounds = array<i64: 3, 64>}, {pipeline_mode = #tpu.pipeline_mode<synchronous>, transform_indices = @transform_15, window_bounds = array<i64: 3, 64, 16>}, {pipeline_mode = #tpu.pipeline_mode<synchronous>, transform_indices = @transform_16, window_bounds = array<i64: 3, 16>}, {pipeline_mode = #tpu.pipeline_mode<synchronous>, transform_indices = @transform_17, window_bounds = array<i64: 1, 16>}, {pipeline_mode = #tpu.pipeline_mode<synchronous>, transform_indices = @transform_18, window_bounds = array<i64: 1, 16>}, {transform_indices = @transform_19, window_bounds = array<i64: 2, 8, 16>}]} {
    %c0 = arith.constant 0 : index
    %c0_0 = arith.constant 0 : index
    %c0_1 = arith.constant 0 : index
    %0 = vector.load %arg1[%c0, %c0_0, %c0_1] : memref<2x8x16xf32, #tpu.memory_space<vmem>>, vector<2x8x16xf32>
    %1 = vector.shape_cast %0 : vector<2x8x16xf32> to vector<16x16xf32>
    %c0_2 = arith.constant 0 : index
    %c0_3 = arith.constant 0 : index
    %2 = vector.load %arg2[%c0_2, %c0_3] : memref<3x16xf32, #tpu.memory_space<vmem>>, vector<3x16xf32>
    %c0_4 = arith.constant 0 : index
    %c0_5 = arith.constant 0 : index
    %3 = vector.load %arg3[%c0_4, %c0_5] : memref<3x16xf32, #tpu.memory_space<vmem>>, vector<3x16xf32>
    %c0_6 = arith.constant 0 : index
    %c0_7 = arith.constant 0 : index
    %c0_8 = arith.constant 0 : index
    %4 = vector.load %arg4[%c0_6, %c0_7, %c0_8] : memref<3x16x16xf32, #tpu.memory_space<vmem>>, vector<3x16x16xf32>
    %c0_9 = arith.constant 0 : index
    %c0_10 = arith.constant 0 : index
    %5 = vector.load %arg5[%c0_9, %c0_10] : memref<3x16xf32, #tpu.memory_space<vmem>>, vector<3x16xf32>
    %c0_11 = arith.constant 0 : index
    %c0_12 = arith.constant 0 : index
    %c0_13 = arith.constant 0 : index
    %6 = vector.load %arg6[%c0_11, %c0_12, %c0_13] : memref<3x16x16xf32, #tpu.memory_space<vmem>>, vector<3x16x16xf32>
    %c0_14 = arith.constant 0 : index
    %c0_15 = arith.constant 0 : index
    %7 = vector.load %arg7[%c0_14, %c0_15] : memref<3x16xf32, #tpu.memory_space<vmem>>, vector<3x16xf32>
    %c0_16 = arith.constant 0 : index
    %c0_17 = arith.constant 0 : index
    %c0_18 = arith.constant 0 : index
    %8 = vector.load %arg8[%c0_16, %c0_17, %c0_18] : memref<3x16x16xf32, #tpu.memory_space<vmem>>, vector<3x16x16xf32>
    %c0_19 = arith.constant 0 : index
    %c0_20 = arith.constant 0 : index
    %9 = vector.load %arg9[%c0_19, %c0_20] : memref<3x16xf32, #tpu.memory_space<vmem>>, vector<3x16xf32>
    %c0_21 = arith.constant 0 : index
    %c0_22 = arith.constant 0 : index
    %c0_23 = arith.constant 0 : index
    %10 = vector.load %arg10[%c0_21, %c0_22, %c0_23] : memref<3x16x16xf32, #tpu.memory_space<vmem>>, vector<3x16x16xf32>
    %c0_24 = arith.constant 0 : index
    %c0_25 = arith.constant 0 : index
    %11 = vector.load %arg11[%c0_24, %c0_25] : memref<3x16xf32, #tpu.memory_space<vmem>>, vector<3x16xf32>
    %c0_26 = arith.constant 0 : index
    %c0_27 = arith.constant 0 : index
    %12 = vector.load %arg12[%c0_26, %c0_27] : memref<3x16xf32, #tpu.memory_space<vmem>>, vector<3x16xf32>
    %c0_28 = arith.constant 0 : index
    %c0_29 = arith.constant 0 : index
    %13 = vector.load %arg13[%c0_28, %c0_29] : memref<3x16xf32, #tpu.memory_space<vmem>>, vector<3x16xf32>
    %c0_30 = arith.constant 0 : index
    %c0_31 = arith.constant 0 : index
    %c0_32 = arith.constant 0 : index
    %14 = vector.load %arg14[%c0_30, %c0_31, %c0_32] : memref<3x16x64xf32, #tpu.memory_space<vmem>>, vector<3x16x64xf32>
    %c0_33 = arith.constant 0 : index
    %c0_34 = arith.constant 0 : index
    %15 = vector.load %arg15[%c0_33, %c0_34] : memref<3x64xf32, #tpu.memory_space<vmem>>, vector<3x64xf32>
    %c0_35 = arith.constant 0 : index
    %c0_36 = arith.constant 0 : index
    %c0_37 = arith.constant 0 : index
    %16 = vector.load %arg16[%c0_35, %c0_36, %c0_37] : memref<3x64x16xf32, #tpu.memory_space<vmem>>, vector<3x64x16xf32>
    %c0_38 = arith.constant 0 : index
    %c0_39 = arith.constant 0 : index
    %17 = vector.load %arg17[%c0_38, %c0_39] : memref<3x16xf32, #tpu.memory_space<vmem>>, vector<3x16xf32>
    %18 = vector.extract_strided_slice %2 {offsets = [0, 0], sizes = [1, 16], strides = [1, 1]} : vector<3x16xf32> to vector<1x16xf32>
    %19 = vector.extract_strided_slice %3 {offsets = [0, 0], sizes = [1, 16], strides = [1, 1]} : vector<3x16xf32> to vector<1x16xf32>
    %cst = arith.constant dense<0.000000e+00> : vector<16xf32>
    %20 = vector.multi_reduction <add>, %1, %cst [1] : vector<16x16xf32> to vector<16xf32>
    %21 = vector.shape_cast %20 : vector<16xf32> to vector<16x1xf32>
    %cst_40 = arith.constant 1.600000e+01 : f32
    %22 = vector.broadcast %cst_40 : f32 to vector<16x1xf32>
    %23 = arith.divf %21, %22 : vector<16x1xf32>
    %24 = vector.broadcast %23 : vector<16x1xf32> to vector<16x16xf32>
    %25 = arith.subf %1, %24 : vector<16x16xf32>
    %26 = arith.mulf %25, %25 : vector<16x16xf32>
    %cst_41 = arith.constant dense<0.000000e+00> : vector<16xf32>
    %27 = vector.multi_reduction <add>, %26, %cst_41 [1] : vector<16x16xf32> to vector<16xf32>
    %28 = vector.shape_cast %27 : vector<16xf32> to vector<16x1xf32>
    %cst_42 = arith.constant 1.600000e+01 : f32
    %29 = vector.broadcast %cst_42 : f32 to vector<16x1xf32>
    %30 = arith.divf %28, %29 : vector<16x1xf32>
    %31 = vector.broadcast %23 : vector<16x1xf32> to vector<16x16xf32>
    %32 = arith.subf %1, %31 : vector<16x16xf32>
    %cst_43 = arith.constant 9.99999974E-6 : f32
    %33 = vector.broadcast %cst_43 : f32 to vector<16x1xf32>
    %34 = arith.addf %30, %33 : vector<16x1xf32>
    %35 = math.rsqrt %34 : vector<16x1xf32>
    %36 = vector.broadcast %35 : vector<16x1xf32> to vector<16x16xf32>
    %37 = arith.mulf %32, %36 : vector<16x16xf32>
    %38 = vector.broadcast %18 : vector<1x16xf32> to vector<16x16xf32>
    %39 = arith.mulf %37, %38 : vector<16x16xf32>
    %40 = vector.broadcast %19 : vector<1x16xf32> to vector<16x16xf32>
    %41 = arith.addf %39, %40 : vector<16x16xf32>
    %42 = vector.extract_strided_slice %4 {offsets = [0, 0, 0], sizes = [1, 16, 16], strides = [1, 1, 1]} : vector<3x16x16xf32> to vector<1x16x16xf32>
    %43 = vector.shape_cast %42 : vector<1x16x16xf32> to vector<16x16xf32>
    %cst_44 = arith.constant dense<0.000000e+00> : vector<16x16xf32>
    %44 = tpu.matmul %41, %43, %cst_44 {dimension_numbers = #tpu.dot_dimension_numbers<[1], [0], [0], [1], [0, 0, 1, 1], [], []>} : vector<16x16xf32>, vector<16x16xf32>, vector<16x16xf32> -> vector<16x16xf32>
    %45 = vector.extract_strided_slice %5 {offsets = [0, 0], sizes = [1, 16], strides = [1, 1]} : vector<3x16xf32> to vector<1x16xf32>
    %46 = vector.broadcast %45 : vector<1x16xf32> to vector<16x16xf32>
    %47 = arith.addf %44, %46 : vector<16x16xf32>
    %48 = vector.extract_strided_slice %6 {offsets = [0, 0, 0], sizes = [1, 16, 16], strides = [1, 1, 1]} : vector<3x16x16xf32> to vector<1x16x16xf32>
    %49 = vector.shape_cast %48 : vector<1x16x16xf32> to vector<16x16xf32>
    %cst_45 = arith.constant dense<0.000000e+00> : vector<16x16xf32>
    %50 = tpu.matmul %41, %49, %cst_45 {dimension_numbers = #tpu.dot_dimension_numbers<[1], [0], [0], [1], [0, 0, 1, 1], [], []>} : vector<16x16xf32>, vector<16x16xf32>, vector<16x16xf32> -> vector<16x16xf32>
    %51 = vector.extract_strided_slice %7 {offsets = [0, 0], sizes = [1, 16], strides = [1, 1]} : vector<3x16xf32> to vector<1x16xf32>
    %52 = vector.broadcast %51 : vector<1x16xf32> to vector<16x16xf32>
    %53 = arith.addf %50, %52 : vector<16x16xf32>
    %54 = vector.extract_strided_slice %8 {offsets = [0, 0, 0], sizes = [1, 16, 16], strides = [1, 1, 1]} : vector<3x16x16xf32> to vector<1x16x16xf32>
    %55 = vector.shape_cast %54 : vector<1x16x16xf32> to vector<16x16xf32>
    %cst_46 = arith.constant dense<0.000000e+00> : vector<16x16xf32>
    %56 = tpu.matmul %41, %55, %cst_46 {dimension_numbers = #tpu.dot_dimension_numbers<[1], [0], [0], [1], [0, 0, 1, 1], [], []>} : vector<16x16xf32>, vector<16x16xf32>, vector<16x16xf32> -> vector<16x16xf32>
    %57 = vector.extract_strided_slice %9 {offsets = [0, 0], sizes = [1, 16], strides = [1, 1]} : vector<3x16xf32> to vector<1x16xf32>
    %58 = vector.broadcast %57 : vector<1x16xf32> to vector<16x16xf32>
    %59 = arith.addf %56, %58 : vector<16x16xf32>
    %60 = vector.shape_cast %47 : vector<16x16xf32> to vector<2x8x16xf32>
    %61 = vector.shape_cast %53 : vector<16x16xf32> to vector<2x8x16xf32>
    %62 = vector.shape_cast %59 : vector<16x16xf32> to vector<2x8x16xf32>
    %63 = vector.shape_cast %60 : vector<2x8x16xf32> to vector<2x8x1x16xf32>
    %64 = vector.shape_cast %61 : vector<2x8x16xf32> to vector<2x1x8x16xf32>
    %65 = vector.broadcast %63 : vector<2x8x1x16xf32> to vector<2x8x8x16xf32>
    %66 = vector.broadcast %64 : vector<2x1x8x16xf32> to vector<2x8x8x16xf32>
    %67 = arith.mulf %65, %66 : vector<2x8x8x16xf32>
    %cst_47 = arith.constant 1.000000e+00 : f32
    %68 = vector.broadcast %cst_47 : f32 to vector<2x8x8x16xf32>
    %69 = arith.mulf %67, %68 : vector<2x8x8x16xf32>
    %cst_48 = arith.constant dense<0xFF800000> : vector<2x8x16xf32>
    %70 = vector.multi_reduction <maximumf>, %69, %cst_48 [2] : vector<2x8x8x16xf32> to vector<2x8x16xf32>
    %71 = vector.shape_cast %70 : vector<2x8x16xf32> to vector<2x8x1x16xf32>
    %72 = vector.broadcast %71 : vector<2x8x1x16xf32> to vector<2x8x8x16xf32>
    %73 = arith.subf %69, %72 : vector<2x8x8x16xf32>
    %74 = math.exp %73 : vector<2x8x8x16xf32>
    %cst_49 = arith.constant dense<0.000000e+00> : vector<2x8x16xf32>
    %75 = vector.multi_reduction <add>, %74, %cst_49 [2] : vector<2x8x8x16xf32> to vector<2x8x16xf32>
    %76 = vector.shape_cast %75 : vector<2x8x16xf32> to vector<2x8x1x16xf32>
    %77 = tpu.reciprocal %76 {approx = true} : vector<2x8x1x16xf32> -> vector<2x8x1x16xf32>
    %78 = vector.broadcast %77 : vector<2x8x1x16xf32> to vector<2x8x8x16xf32>
    %79 = arith.mulf %74, %78 : vector<2x8x8x16xf32>
    %80 = vector.shape_cast %62 : vector<2x8x16xf32> to vector<2x1x8x16xf32>
    %81 = vector.broadcast %80 : vector<2x1x8x16xf32> to vector<2x8x8x16xf32>
    %82 = arith.mulf %79, %81 : vector<2x8x8x16xf32>
    %cst_50 = arith.constant dense<0.000000e+00> : vector<2x8x16xf32>
    %83 = vector.multi_reduction <add>, %82, %cst_50 [2] : vector<2x8x8x16xf32> to vector<2x8x16xf32>
    %84 = vector.shape_cast %83 : vector<2x8x16xf32> to vector<16x16xf32>
    %85 = vector.extract_strided_slice %10 {offsets = [0, 0, 0], sizes = [1, 16, 16], strides = [1, 1, 1]} : vector<3x16x16xf32> to vector<1x16x16xf32>
    %86 = vector.shape_cast %85 : vector<1x16x16xf32> to vector<16x16xf32>
    %cst_51 = arith.constant dense<0.000000e+00> : vector<16x16xf32>
    %87 = tpu.matmul %84, %86, %cst_51 {dimension_numbers = #tpu.dot_dimension_numbers<[1], [0], [0], [1], [0, 0, 1, 1], [], []>} : vector<16x16xf32>, vector<16x16xf32>, vector<16x16xf32> -> vector<16x16xf32>
    %88 = vector.extract_strided_slice %11 {offsets = [0, 0], sizes = [1, 16], strides = [1, 1]} : vector<3x16xf32> to vector<1x16xf32>
    %89 = vector.broadcast %88 : vector<1x16xf32> to vector<16x16xf32>
    %90 = arith.addf %87, %89 : vector<16x16xf32>
    %91 = arith.addf %1, %90 : vector<16x16xf32>
    %92 = vector.extract_strided_slice %12 {offsets = [0, 0], sizes = [1, 16], strides = [1, 1]} : vector<3x16xf32> to vector<1x16xf32>
    %93 = vector.extract_strided_slice %13 {offsets = [0, 0], sizes = [1, 16], strides = [1, 1]} : vector<3x16xf32> to vector<1x16xf32>
    %cst_52 = arith.constant dense<0.000000e+00> : vector<16xf32>
    %94 = vector.multi_reduction <add>, %91, %cst_52 [1] : vector<16x16xf32> to vector<16xf32>
    %95 = vector.shape_cast %94 : vector<16xf32> to vector<16x1xf32>
    %cst_53 = arith.constant 1.600000e+01 : f32
    %96 = vector.broadcast %cst_53 : f32 to vector<16x1xf32>
    %97 = arith.divf %95, %96 : vector<16x1xf32>
    %98 = vector.broadcast %97 : vector<16x1xf32> to vector<16x16xf32>
    %99 = arith.subf %91, %98 : vector<16x16xf32>
    %100 = arith.mulf %99, %99 : vector<16x16xf32>
    %cst_54 = arith.constant dense<0.000000e+00> : vector<16xf32>
    %101 = vector.multi_reduction <add>, %100, %cst_54 [1] : vector<16x16xf32> to vector<16xf32>
    %102 = vector.shape_cast %101 : vector<16xf32> to vector<16x1xf32>
    %cst_55 = arith.constant 1.600000e+01 : f32
    %103 = vector.broadcast %cst_55 : f32 to vector<16x1xf32>
    %104 = arith.divf %102, %103 : vector<16x1xf32>
    %105 = vector.broadcast %97 : vector<16x1xf32> to vector<16x16xf32>
    %106 = arith.subf %91, %105 : vector<16x16xf32>
    %cst_56 = arith.constant 9.99999974E-6 : f32
    %107 = vector.broadcast %cst_56 : f32 to vector<16x1xf32>
    %108 = arith.addf %104, %107 : vector<16x1xf32>
    %109 = math.rsqrt %108 : vector<16x1xf32>
    %110 = vector.broadcast %109 : vector<16x1xf32> to vector<16x16xf32>
    %111 = arith.mulf %106, %110 : vector<16x16xf32>
    %112 = vector.broadcast %92 : vector<1x16xf32> to vector<16x16xf32>
    %113 = arith.mulf %111, %112 : vector<16x16xf32>
    %114 = vector.broadcast %93 : vector<1x16xf32> to vector<16x16xf32>
    %115 = arith.addf %113, %114 : vector<16x16xf32>
    %116 = vector.extract_strided_slice %14 {offsets = [0, 0, 0], sizes = [1, 16, 64], strides = [1, 1, 1]} : vector<3x16x64xf32> to vector<1x16x64xf32>
    %117 = vector.shape_cast %116 : vector<1x16x64xf32> to vector<16x64xf32>
    %cst_57 = arith.constant dense<0.000000e+00> : vector<16x64xf32>
    %118 = tpu.matmul %115, %117, %cst_57 {dimension_numbers = #tpu.dot_dimension_numbers<[1], [0], [0], [1], [0, 0, 1, 1], [], []>} : vector<16x16xf32>, vector<16x64xf32>, vector<16x64xf32> -> vector<16x64xf32>
    %119 = vector.extract_strided_slice %15 {offsets = [0, 0], sizes = [1, 64], strides = [1, 1]} : vector<3x64xf32> to vector<1x64xf32>
    %120 = vector.broadcast %119 : vector<1x64xf32> to vector<16x64xf32>
    %121 = arith.addf %118, %120 : vector<16x64xf32>
    %cst_58 = arith.constant 5.000000e-01 : f32
    %122 = vector.broadcast %cst_58 : f32 to vector<16x64xf32>
    %123 = arith.mulf %122, %121 : vector<16x64xf32>
    %cst_59 = arith.constant 0.707106769 : f32
    %124 = vector.broadcast %cst_59 : f32 to vector<16x64xf32>
    %125 = arith.mulf %121, %124 : vector<16x64xf32>
    %126 = math.absf %125 : vector<16x64xf32>
    %cst_60 = arith.constant 0.327591091 : f32
    %127 = vector.broadcast %cst_60 : f32 to vector<16x64xf32>
    %128 = arith.mulf %127, %126 : vector<16x64xf32>
    %cst_61 = arith.constant 1.000000e+00 : f32
    %129 = vector.broadcast %cst_61 : f32 to vector<16x64xf32>
    %130 = arith.addf %129, %128 : vector<16x64xf32>
    %cst_62 = arith.constant 1.000000e+00 : f32
    %131 = vector.broadcast %cst_62 : f32 to vector<16x64xf32>
    %132 = arith.divf %131, %130 : vector<16x64xf32>
    %cst_63 = arith.constant 1.06140542 : f32
    %133 = vector.broadcast %cst_63 : f32 to vector<16x64xf32>
    %134 = arith.mulf %133, %132 : vector<16x64xf32>
    %cst_64 = arith.constant -1.45315206 : f32
    %135 = vector.broadcast %cst_64 : f32 to vector<16x64xf32>
    %136 = arith.addf %134, %135 : vector<16x64xf32>
    %137 = arith.mulf %136, %132 : vector<16x64xf32>
    %cst_65 = arith.constant 1.42141378 : f32
    %138 = vector.broadcast %cst_65 : f32 to vector<16x64xf32>
    %139 = arith.addf %137, %138 : vector<16x64xf32>
    %140 = arith.mulf %139, %132 : vector<16x64xf32>
    %cst_66 = arith.constant -0.284496725 : f32
    %141 = vector.broadcast %cst_66 : f32 to vector<16x64xf32>
    %142 = arith.addf %140, %141 : vector<16x64xf32>
    %143 = arith.mulf %142, %132 : vector<16x64xf32>
    %cst_67 = arith.constant 0.254829586 : f32
    %144 = vector.broadcast %cst_67 : f32 to vector<16x64xf32>
    %145 = arith.addf %143, %144 : vector<16x64xf32>
    %146 = arith.mulf %145, %132 : vector<16x64xf32>
    %cst_68 = arith.constant 0.000000e+00 : f32
    %147 = vector.broadcast %cst_68 : f32 to vector<16x64xf32>
    %148 = arith.subf %147, %126 : vector<16x64xf32>
    %149 = arith.mulf %148, %126 : vector<16x64xf32>
    %150 = math.exp %149 : vector<16x64xf32>
    %151 = arith.mulf %146, %150 : vector<16x64xf32>
    %cst_69 = arith.constant 1.000000e+00 : f32
    %152 = vector.broadcast %cst_69 : f32 to vector<16x64xf32>
    %153 = arith.subf %152, %151 : vector<16x64xf32>
    %cst_70 = arith.constant 0.000000e+00 : f32
    %154 = vector.broadcast %cst_70 : f32 to vector<16x64xf32>
    %155 = arith.cmpf oge, %125, %154 : vector<16x64xf32>
    %cst_71 = arith.constant 0.000000e+00 : f32
    %156 = vector.broadcast %cst_71 : f32 to vector<16x64xf32>
    %157 = arith.subf %156, %153 : vector<16x64xf32>
    %158 = arith.select %155, %153, %157 : vector<16x64xi1>, vector<16x64xf32>
    %cst_72 = arith.constant 1.000000e+00 : f32
    %159 = vector.broadcast %cst_72 : f32 to vector<16x64xf32>
    %160 = arith.addf %159, %158 : vector<16x64xf32>
    %161 = arith.mulf %123, %160 : vector<16x64xf32>
    %162 = vector.extract_strided_slice %16 {offsets = [0, 0, 0], sizes = [1, 64, 16], strides = [1, 1, 1]} : vector<3x64x16xf32> to vector<1x64x16xf32>
    %163 = vector.shape_cast %162 : vector<1x64x16xf32> to vector<64x16xf32>
    %cst_73 = arith.constant dense<0.000000e+00> : vector<16x16xf32>
    %164 = tpu.matmul %161, %163, %cst_73 {dimension_numbers = #tpu.dot_dimension_numbers<[1], [0], [0], [1], [0, 0, 1, 1], [], []>} : vector<16x64xf32>, vector<64x16xf32>, vector<16x16xf32> -> vector<16x16xf32>
    %165 = vector.extract_strided_slice %17 {offsets = [0, 0], sizes = [1, 16], strides = [1, 1]} : vector<3x16xf32> to vector<1x16xf32>
    %166 = vector.broadcast %165 : vector<1x16xf32> to vector<16x16xf32>
    %167 = arith.addf %164, %166 : vector<16x16xf32>
    %168 = arith.addf %91, %167 : vector<16x16xf32>
    %169 = vector.extract_strided_slice %2 {offsets = [1, 0], sizes = [1, 16], strides = [1, 1]} : vector<3x16xf32> to vector<1x16xf32>
    %170 = vector.extract_strided_slice %3 {offsets = [1, 0], sizes = [1, 16], strides = [1, 1]} : vector<3x16xf32> to vector<1x16xf32>
    %cst_74 = arith.constant dense<0.000000e+00> : vector<16xf32>
    %171 = vector.multi_reduction <add>, %168, %cst_74 [1] : vector<16x16xf32> to vector<16xf32>
    %172 = vector.shape_cast %171 : vector<16xf32> to vector<16x1xf32>
    %cst_75 = arith.constant 1.600000e+01 : f32
    %173 = vector.broadcast %cst_75 : f32 to vector<16x1xf32>
    %174 = arith.divf %172, %173 : vector<16x1xf32>
    %175 = vector.broadcast %174 : vector<16x1xf32> to vector<16x16xf32>
    %176 = arith.subf %168, %175 : vector<16x16xf32>
    %177 = arith.mulf %176, %176 : vector<16x16xf32>
    %cst_76 = arith.constant dense<0.000000e+00> : vector<16xf32>
    %178 = vector.multi_reduction <add>, %177, %cst_76 [1] : vector<16x16xf32> to vector<16xf32>
    %179 = vector.shape_cast %178 : vector<16xf32> to vector<16x1xf32>
    %cst_77 = arith.constant 1.600000e+01 : f32
    %180 = vector.broadcast %cst_77 : f32 to vector<16x1xf32>
    %181 = arith.divf %179, %180 : vector<16x1xf32>
    %182 = vector.broadcast %174 : vector<16x1xf32> to vector<16x16xf32>
    %183 = arith.subf %168, %182 : vector<16x16xf32>
    %cst_78 = arith.constant 9.99999974E-6 : f32
    %184 = vector.broadcast %cst_78 : f32 to vector<16x1xf32>
    %185 = arith.addf %181, %184 : vector<16x1xf32>
    %186 = math.rsqrt %185 : vector<16x1xf32>
    %187 = vector.broadcast %186 : vector<16x1xf32> to vector<16x16xf32>
    %188 = arith.mulf %183, %187 : vector<16x16xf32>
    %189 = vector.broadcast %169 : vector<1x16xf32> to vector<16x16xf32>
    %190 = arith.mulf %188, %189 : vector<16x16xf32>
    %191 = vector.broadcast %170 : vector<1x16xf32> to vector<16x16xf32>
    %192 = arith.addf %190, %191 : vector<16x16xf32>
    %193 = vector.extract_strided_slice %4 {offsets = [1, 0, 0], sizes = [1, 16, 16], strides = [1, 1, 1]} : vector<3x16x16xf32> to vector<1x16x16xf32>
    %194 = vector.shape_cast %193 : vector<1x16x16xf32> to vector<16x16xf32>
    %cst_79 = arith.constant dense<0.000000e+00> : vector<16x16xf32>
    %195 = tpu.matmul %192, %194, %cst_79 {dimension_numbers = #tpu.dot_dimension_numbers<[1], [0], [0], [1], [0, 0, 1, 1], [], []>} : vector<16x16xf32>, vector<16x16xf32>, vector<16x16xf32> -> vector<16x16xf32>
    %196 = vector.extract_strided_slice %5 {offsets = [1, 0], sizes = [1, 16], strides = [1, 1]} : vector<3x16xf32> to vector<1x16xf32>
    %197 = vector.broadcast %196 : vector<1x16xf32> to vector<16x16xf32>
    %198 = arith.addf %195, %197 : vector<16x16xf32>
    %199 = vector.extract_strided_slice %6 {offsets = [1, 0, 0], sizes = [1, 16, 16], strides = [1, 1, 1]} : vector<3x16x16xf32> to vector<1x16x16xf32>
    %200 = vector.shape_cast %199 : vector<1x16x16xf32> to vector<16x16xf32>
    %cst_80 = arith.constant dense<0.000000e+00> : vector<16x16xf32>
    %201 = tpu.matmul %192, %200, %cst_80 {dimension_numbers = #tpu.dot_dimension_numbers<[1], [0], [0], [1], [0, 0, 1, 1], [], []>} : vector<16x16xf32>, vector<16x16xf32>, vector<16x16xf32> -> vector<16x16xf32>
    %202 = vector.extract_strided_slice %7 {offsets = [1, 0], sizes = [1, 16], strides = [1, 1]} : vector<3x16xf32> to vector<1x16xf32>
    %203 = vector.broadcast %202 : vector<1x16xf32> to vector<16x16xf32>
    %204 = arith.addf %201, %203 : vector<16x16xf32>
    %205 = vector.extract_strided_slice %8 {offsets = [1, 0, 0], sizes = [1, 16, 16], strides = [1, 1, 1]} : vector<3x16x16xf32> to vector<1x16x16xf32>
    %206 = vector.shape_cast %205 : vector<1x16x16xf32> to vector<16x16xf32>
    %cst_81 = arith.constant dense<0.000000e+00> : vector<16x16xf32>
    %207 = tpu.matmul %192, %206, %cst_81 {dimension_numbers = #tpu.dot_dimension_numbers<[1], [0], [0], [1], [0, 0, 1, 1], [], []>} : vector<16x16xf32>, vector<16x16xf32>, vector<16x16xf32> -> vector<16x16xf32>
    %208 = vector.extract_strided_slice %9 {offsets = [1, 0], sizes = [1, 16], strides = [1, 1]} : vector<3x16xf32> to vector<1x16xf32>
    %209 = vector.broadcast %208 : vector<1x16xf32> to vector<16x16xf32>
    %210 = arith.addf %207, %209 : vector<16x16xf32>
    %211 = vector.shape_cast %198 : vector<16x16xf32> to vector<2x8x16xf32>
    %212 = vector.shape_cast %204 : vector<16x16xf32> to vector<2x8x16xf32>
    %213 = vector.shape_cast %210 : vector<16x16xf32> to vector<2x8x16xf32>
    %214 = vector.shape_cast %211 : vector<2x8x16xf32> to vector<2x8x1x16xf32>
    %215 = vector.shape_cast %212 : vector<2x8x16xf32> to vector<2x1x8x16xf32>
    %216 = vector.broadcast %214 : vector<2x8x1x16xf32> to vector<2x8x8x16xf32>
    %217 = vector.broadcast %215 : vector<2x1x8x16xf32> to vector<2x8x8x16xf32>
    %218 = arith.mulf %216, %217 : vector<2x8x8x16xf32>
    %cst_82 = arith.constant 1.000000e+00 : f32
    %219 = vector.broadcast %cst_82 : f32 to vector<2x8x8x16xf32>
    %220 = arith.mulf %218, %219 : vector<2x8x8x16xf32>
    %cst_83 = arith.constant dense<0xFF800000> : vector<2x8x16xf32>
    %221 = vector.multi_reduction <maximumf>, %220, %cst_83 [2] : vector<2x8x8x16xf32> to vector<2x8x16xf32>
    %222 = vector.shape_cast %221 : vector<2x8x16xf32> to vector<2x8x1x16xf32>
    %223 = vector.broadcast %222 : vector<2x8x1x16xf32> to vector<2x8x8x16xf32>
    %224 = arith.subf %220, %223 : vector<2x8x8x16xf32>
    %225 = math.exp %224 : vector<2x8x8x16xf32>
    %cst_84 = arith.constant dense<0.000000e+00> : vector<2x8x16xf32>
    %226 = vector.multi_reduction <add>, %225, %cst_84 [2] : vector<2x8x8x16xf32> to vector<2x8x16xf32>
    %227 = vector.shape_cast %226 : vector<2x8x16xf32> to vector<2x8x1x16xf32>
    %228 = tpu.reciprocal %227 {approx = true} : vector<2x8x1x16xf32> -> vector<2x8x1x16xf32>
    %229 = vector.broadcast %228 : vector<2x8x1x16xf32> to vector<2x8x8x16xf32>
    %230 = arith.mulf %225, %229 : vector<2x8x8x16xf32>
    %231 = vector.shape_cast %213 : vector<2x8x16xf32> to vector<2x1x8x16xf32>
    %232 = vector.broadcast %231 : vector<2x1x8x16xf32> to vector<2x8x8x16xf32>
    %233 = arith.mulf %230, %232 : vector<2x8x8x16xf32>
    %cst_85 = arith.constant dense<0.000000e+00> : vector<2x8x16xf32>
    %234 = vector.multi_reduction <add>, %233, %cst_85 [2] : vector<2x8x8x16xf32> to vector<2x8x16xf32>
    %235 = vector.shape_cast %234 : vector<2x8x16xf32> to vector<16x16xf32>
    %236 = vector.extract_strided_slice %10 {offsets = [1, 0, 0], sizes = [1, 16, 16], strides = [1, 1, 1]} : vector<3x16x16xf32> to vector<1x16x16xf32>
    %237 = vector.shape_cast %236 : vector<1x16x16xf32> to vector<16x16xf32>
    %cst_86 = arith.constant dense<0.000000e+00> : vector<16x16xf32>
    %238 = tpu.matmul %235, %237, %cst_86 {dimension_numbers = #tpu.dot_dimension_numbers<[1], [0], [0], [1], [0, 0, 1, 1], [], []>} : vector<16x16xf32>, vector<16x16xf32>, vector<16x16xf32> -> vector<16x16xf32>
    %239 = vector.extract_strided_slice %11 {offsets = [1, 0], sizes = [1, 16], strides = [1, 1]} : vector<3x16xf32> to vector<1x16xf32>
    %240 = vector.broadcast %239 : vector<1x16xf32> to vector<16x16xf32>
    %241 = arith.addf %238, %240 : vector<16x16xf32>
    %242 = arith.addf %168, %241 : vector<16x16xf32>
    %243 = vector.extract_strided_slice %12 {offsets = [1, 0], sizes = [1, 16], strides = [1, 1]} : vector<3x16xf32> to vector<1x16xf32>
    %244 = vector.extract_strided_slice %13 {offsets = [1, 0], sizes = [1, 16], strides = [1, 1]} : vector<3x16xf32> to vector<1x16xf32>
    %cst_87 = arith.constant dense<0.000000e+00> : vector<16xf32>
    %245 = vector.multi_reduction <add>, %242, %cst_87 [1] : vector<16x16xf32> to vector<16xf32>
    %246 = vector.shape_cast %245 : vector<16xf32> to vector<16x1xf32>
    %cst_88 = arith.constant 1.600000e+01 : f32
    %247 = vector.broadcast %cst_88 : f32 to vector<16x1xf32>
    %248 = arith.divf %246, %247 : vector<16x1xf32>
    %249 = vector.broadcast %248 : vector<16x1xf32> to vector<16x16xf32>
    %250 = arith.subf %242, %249 : vector<16x16xf32>
    %251 = arith.mulf %250, %250 : vector<16x16xf32>
    %cst_89 = arith.constant dense<0.000000e+00> : vector<16xf32>
    %252 = vector.multi_reduction <add>, %251, %cst_89 [1] : vector<16x16xf32> to vector<16xf32>
    %253 = vector.shape_cast %252 : vector<16xf32> to vector<16x1xf32>
    %cst_90 = arith.constant 1.600000e+01 : f32
    %254 = vector.broadcast %cst_90 : f32 to vector<16x1xf32>
    %255 = arith.divf %253, %254 : vector<16x1xf32>
    %256 = vector.broadcast %248 : vector<16x1xf32> to vector<16x16xf32>
    %257 = arith.subf %242, %256 : vector<16x16xf32>
    %cst_91 = arith.constant 9.99999974E-6 : f32
    %258 = vector.broadcast %cst_91 : f32 to vector<16x1xf32>
    %259 = arith.addf %255, %258 : vector<16x1xf32>
    %260 = math.rsqrt %259 : vector<16x1xf32>
    %261 = vector.broadcast %260 : vector<16x1xf32> to vector<16x16xf32>
    %262 = arith.mulf %257, %261 : vector<16x16xf32>
    %263 = vector.broadcast %243 : vector<1x16xf32> to vector<16x16xf32>
    %264 = arith.mulf %262, %263 : vector<16x16xf32>
    %265 = vector.broadcast %244 : vector<1x16xf32> to vector<16x16xf32>
    %266 = arith.addf %264, %265 : vector<16x16xf32>
    %267 = vector.extract_strided_slice %14 {offsets = [1, 0, 0], sizes = [1, 16, 64], strides = [1, 1, 1]} : vector<3x16x64xf32> to vector<1x16x64xf32>
    %268 = vector.shape_cast %267 : vector<1x16x64xf32> to vector<16x64xf32>
    %cst_92 = arith.constant dense<0.000000e+00> : vector<16x64xf32>
    %269 = tpu.matmul %266, %268, %cst_92 {dimension_numbers = #tpu.dot_dimension_numbers<[1], [0], [0], [1], [0, 0, 1, 1], [], []>} : vector<16x16xf32>, vector<16x64xf32>, vector<16x64xf32> -> vector<16x64xf32>
    %270 = vector.extract_strided_slice %15 {offsets = [1, 0], sizes = [1, 64], strides = [1, 1]} : vector<3x64xf32> to vector<1x64xf32>
    %271 = vector.broadcast %270 : vector<1x64xf32> to vector<16x64xf32>
    %272 = arith.addf %269, %271 : vector<16x64xf32>
    %cst_93 = arith.constant 5.000000e-01 : f32
    %273 = vector.broadcast %cst_93 : f32 to vector<16x64xf32>
    %274 = arith.mulf %273, %272 : vector<16x64xf32>
    %cst_94 = arith.constant 0.707106769 : f32
    %275 = vector.broadcast %cst_94 : f32 to vector<16x64xf32>
    %276 = arith.mulf %272, %275 : vector<16x64xf32>
    %277 = math.absf %276 : vector<16x64xf32>
    %cst_95 = arith.constant 0.327591091 : f32
    %278 = vector.broadcast %cst_95 : f32 to vector<16x64xf32>
    %279 = arith.mulf %278, %277 : vector<16x64xf32>
    %cst_96 = arith.constant 1.000000e+00 : f32
    %280 = vector.broadcast %cst_96 : f32 to vector<16x64xf32>
    %281 = arith.addf %280, %279 : vector<16x64xf32>
    %cst_97 = arith.constant 1.000000e+00 : f32
    %282 = vector.broadcast %cst_97 : f32 to vector<16x64xf32>
    %283 = arith.divf %282, %281 : vector<16x64xf32>
    %cst_98 = arith.constant 1.06140542 : f32
    %284 = vector.broadcast %cst_98 : f32 to vector<16x64xf32>
    %285 = arith.mulf %284, %283 : vector<16x64xf32>
    %cst_99 = arith.constant -1.45315206 : f32
    %286 = vector.broadcast %cst_99 : f32 to vector<16x64xf32>
    %287 = arith.addf %285, %286 : vector<16x64xf32>
    %288 = arith.mulf %287, %283 : vector<16x64xf32>
    %cst_100 = arith.constant 1.42141378 : f32
    %289 = vector.broadcast %cst_100 : f32 to vector<16x64xf32>
    %290 = arith.addf %288, %289 : vector<16x64xf32>
    %291 = arith.mulf %290, %283 : vector<16x64xf32>
    %cst_101 = arith.constant -0.284496725 : f32
    %292 = vector.broadcast %cst_101 : f32 to vector<16x64xf32>
    %293 = arith.addf %291, %292 : vector<16x64xf32>
    %294 = arith.mulf %293, %283 : vector<16x64xf32>
    %cst_102 = arith.constant 0.254829586 : f32
    %295 = vector.broadcast %cst_102 : f32 to vector<16x64xf32>
    %296 = arith.addf %294, %295 : vector<16x64xf32>
    %297 = arith.mulf %296, %283 : vector<16x64xf32>
    %cst_103 = arith.constant 0.000000e+00 : f32
    %298 = vector.broadcast %cst_103 : f32 to vector<16x64xf32>
    %299 = arith.subf %298, %277 : vector<16x64xf32>
    %300 = arith.mulf %299, %277 : vector<16x64xf32>
    %301 = math.exp %300 : vector<16x64xf32>
    %302 = arith.mulf %297, %301 : vector<16x64xf32>
    %cst_104 = arith.constant 1.000000e+00 : f32
    %303 = vector.broadcast %cst_104 : f32 to vector<16x64xf32>
    %304 = arith.subf %303, %302 : vector<16x64xf32>
    %cst_105 = arith.constant 0.000000e+00 : f32
    %305 = vector.broadcast %cst_105 : f32 to vector<16x64xf32>
    %306 = arith.cmpf oge, %276, %305 : vector<16x64xf32>
    %cst_106 = arith.constant 0.000000e+00 : f32
    %307 = vector.broadcast %cst_106 : f32 to vector<16x64xf32>
    %308 = arith.subf %307, %304 : vector<16x64xf32>
    %309 = arith.select %306, %304, %308 : vector<16x64xi1>, vector<16x64xf32>
    %cst_107 = arith.constant 1.000000e+00 : f32
    %310 = vector.broadcast %cst_107 : f32 to vector<16x64xf32>
    %311 = arith.addf %310, %309 : vector<16x64xf32>
    %312 = arith.mulf %274, %311 : vector<16x64xf32>
    %313 = vector.extract_strided_slice %16 {offsets = [1, 0, 0], sizes = [1, 64, 16], strides = [1, 1, 1]} : vector<3x64x16xf32> to vector<1x64x16xf32>
    %314 = vector.shape_cast %313 : vector<1x64x16xf32> to vector<64x16xf32>
    %cst_108 = arith.constant dense<0.000000e+00> : vector<16x16xf32>
    %315 = tpu.matmul %312, %314, %cst_108 {dimension_numbers = #tpu.dot_dimension_numbers<[1], [0], [0], [1], [0, 0, 1, 1], [], []>} : vector<16x64xf32>, vector<64x16xf32>, vector<16x16xf32> -> vector<16x16xf32>
    %316 = vector.extract_strided_slice %17 {offsets = [1, 0], sizes = [1, 16], strides = [1, 1]} : vector<3x16xf32> to vector<1x16xf32>
    %317 = vector.broadcast %316 : vector<1x16xf32> to vector<16x16xf32>
    %318 = arith.addf %315, %317 : vector<16x16xf32>
    %319 = arith.addf %242, %318 : vector<16x16xf32>
    %320 = vector.extract_strided_slice %2 {offsets = [2, 0], sizes = [1, 16], strides = [1, 1]} : vector<3x16xf32> to vector<1x16xf32>
    %321 = vector.extract_strided_slice %3 {offsets = [2, 0], sizes = [1, 16], strides = [1, 1]} : vector<3x16xf32> to vector<1x16xf32>
    %cst_109 = arith.constant dense<0.000000e+00> : vector<16xf32>
    %322 = vector.multi_reduction <add>, %319, %cst_109 [1] : vector<16x16xf32> to vector<16xf32>
    %323 = vector.shape_cast %322 : vector<16xf32> to vector<16x1xf32>
    %cst_110 = arith.constant 1.600000e+01 : f32
    %324 = vector.broadcast %cst_110 : f32 to vector<16x1xf32>
    %325 = arith.divf %323, %324 : vector<16x1xf32>
    %326 = vector.broadcast %325 : vector<16x1xf32> to vector<16x16xf32>
    %327 = arith.subf %319, %326 : vector<16x16xf32>
    %328 = arith.mulf %327, %327 : vector<16x16xf32>
    %cst_111 = arith.constant dense<0.000000e+00> : vector<16xf32>
    %329 = vector.multi_reduction <add>, %328, %cst_111 [1] : vector<16x16xf32> to vector<16xf32>
    %330 = vector.shape_cast %329 : vector<16xf32> to vector<16x1xf32>
    %cst_112 = arith.constant 1.600000e+01 : f32
    %331 = vector.broadcast %cst_112 : f32 to vector<16x1xf32>
    %332 = arith.divf %330, %331 : vector<16x1xf32>
    %333 = vector.broadcast %325 : vector<16x1xf32> to vector<16x16xf32>
    %334 = arith.subf %319, %333 : vector<16x16xf32>
    %cst_113 = arith.constant 9.99999974E-6 : f32
    %335 = vector.broadcast %cst_113 : f32 to vector<16x1xf32>
    %336 = arith.addf %332, %335 : vector<16x1xf32>
    %337 = math.rsqrt %336 : vector<16x1xf32>
    %338 = vector.broadcast %337 : vector<16x1xf32> to vector<16x16xf32>
    %339 = arith.mulf %334, %338 : vector<16x16xf32>
    %340 = vector.broadcast %320 : vector<1x16xf32> to vector<16x16xf32>
    %341 = arith.mulf %339, %340 : vector<16x16xf32>
    %342 = vector.broadcast %321 : vector<1x16xf32> to vector<16x16xf32>
    %343 = arith.addf %341, %342 : vector<16x16xf32>
    %344 = vector.extract_strided_slice %4 {offsets = [2, 0, 0], sizes = [1, 16, 16], strides = [1, 1, 1]} : vector<3x16x16xf32> to vector<1x16x16xf32>
    %345 = vector.shape_cast %344 : vector<1x16x16xf32> to vector<16x16xf32>
    %cst_114 = arith.constant dense<0.000000e+00> : vector<16x16xf32>
    %346 = tpu.matmul %343, %345, %cst_114 {dimension_numbers = #tpu.dot_dimension_numbers<[1], [0], [0], [1], [0, 0, 1, 1], [], []>} : vector<16x16xf32>, vector<16x16xf32>, vector<16x16xf32> -> vector<16x16xf32>
    %347 = vector.extract_strided_slice %5 {offsets = [2, 0], sizes = [1, 16], strides = [1, 1]} : vector<3x16xf32> to vector<1x16xf32>
    %348 = vector.broadcast %347 : vector<1x16xf32> to vector<16x16xf32>
    %349 = arith.addf %346, %348 : vector<16x16xf32>
    %350 = vector.extract_strided_slice %6 {offsets = [2, 0, 0], sizes = [1, 16, 16], strides = [1, 1, 1]} : vector<3x16x16xf32> to vector<1x16x16xf32>
    %351 = vector.shape_cast %350 : vector<1x16x16xf32> to vector<16x16xf32>
    %cst_115 = arith.constant dense<0.000000e+00> : vector<16x16xf32>
    %352 = tpu.matmul %343, %351, %cst_115 {dimension_numbers = #tpu.dot_dimension_numbers<[1], [0], [0], [1], [0, 0, 1, 1], [], []>} : vector<16x16xf32>, vector<16x16xf32>, vector<16x16xf32> -> vector<16x16xf32>
    %353 = vector.extract_strided_slice %7 {offsets = [2, 0], sizes = [1, 16], strides = [1, 1]} : vector<3x16xf32> to vector<1x16xf32>
    %354 = vector.broadcast %353 : vector<1x16xf32> to vector<16x16xf32>
    %355 = arith.addf %352, %354 : vector<16x16xf32>
    %356 = vector.extract_strided_slice %8 {offsets = [2, 0, 0], sizes = [1, 16, 16], strides = [1, 1, 1]} : vector<3x16x16xf32> to vector<1x16x16xf32>
    %357 = vector.shape_cast %356 : vector<1x16x16xf32> to vector<16x16xf32>
    %cst_116 = arith.constant dense<0.000000e+00> : vector<16x16xf32>
    %358 = tpu.matmul %343, %357, %cst_116 {dimension_numbers = #tpu.dot_dimension_numbers<[1], [0], [0], [1], [0, 0, 1, 1], [], []>} : vector<16x16xf32>, vector<16x16xf32>, vector<16x16xf32> -> vector<16x16xf32>
    %359 = vector.extract_strided_slice %9 {offsets = [2, 0], sizes = [1, 16], strides = [1, 1]} : vector<3x16xf32> to vector<1x16xf32>
    %360 = vector.broadcast %359 : vector<1x16xf32> to vector<16x16xf32>
    %361 = arith.addf %358, %360 : vector<16x16xf32>
    %362 = vector.shape_cast %349 : vector<16x16xf32> to vector<2x8x16xf32>
    %363 = vector.shape_cast %355 : vector<16x16xf32> to vector<2x8x16xf32>
    %364 = vector.shape_cast %361 : vector<16x16xf32> to vector<2x8x16xf32>
    %365 = vector.shape_cast %362 : vector<2x8x16xf32> to vector<2x8x1x16xf32>
    %366 = vector.shape_cast %363 : vector<2x8x16xf32> to vector<2x1x8x16xf32>
    %367 = vector.broadcast %365 : vector<2x8x1x16xf32> to vector<2x8x8x16xf32>
    %368 = vector.broadcast %366 : vector<2x1x8x16xf32> to vector<2x8x8x16xf32>
    %369 = arith.mulf %367, %368 : vector<2x8x8x16xf32>
    %cst_117 = arith.constant 1.000000e+00 : f32
    %370 = vector.broadcast %cst_117 : f32 to vector<2x8x8x16xf32>
    %371 = arith.mulf %369, %370 : vector<2x8x8x16xf32>
    %cst_118 = arith.constant dense<0xFF800000> : vector<2x8x16xf32>
    %372 = vector.multi_reduction <maximumf>, %371, %cst_118 [2] : vector<2x8x8x16xf32> to vector<2x8x16xf32>
    %373 = vector.shape_cast %372 : vector<2x8x16xf32> to vector<2x8x1x16xf32>
    %374 = vector.broadcast %373 : vector<2x8x1x16xf32> to vector<2x8x8x16xf32>
    %375 = arith.subf %371, %374 : vector<2x8x8x16xf32>
    %376 = math.exp %375 : vector<2x8x8x16xf32>
    %cst_119 = arith.constant dense<0.000000e+00> : vector<2x8x16xf32>
    %377 = vector.multi_reduction <add>, %376, %cst_119 [2] : vector<2x8x8x16xf32> to vector<2x8x16xf32>
    %378 = vector.shape_cast %377 : vector<2x8x16xf32> to vector<2x8x1x16xf32>
    %379 = tpu.reciprocal %378 {approx = true} : vector<2x8x1x16xf32> -> vector<2x8x1x16xf32>
    %380 = vector.broadcast %379 : vector<2x8x1x16xf32> to vector<2x8x8x16xf32>
    %381 = arith.mulf %376, %380 : vector<2x8x8x16xf32>
    %382 = vector.shape_cast %364 : vector<2x8x16xf32> to vector<2x1x8x16xf32>
    %383 = vector.broadcast %382 : vector<2x1x8x16xf32> to vector<2x8x8x16xf32>
    %384 = arith.mulf %381, %383 : vector<2x8x8x16xf32>
    %cst_120 = arith.constant dense<0.000000e+00> : vector<2x8x16xf32>
    %385 = vector.multi_reduction <add>, %384, %cst_120 [2] : vector<2x8x8x16xf32> to vector<2x8x16xf32>
    %386 = vector.shape_cast %385 : vector<2x8x16xf32> to vector<16x16xf32>
    %387 = vector.extract_strided_slice %10 {offsets = [2, 0, 0], sizes = [1, 16, 16], strides = [1, 1, 1]} : vector<3x16x16xf32> to vector<1x16x16xf32>
    %388 = vector.shape_cast %387 : vector<1x16x16xf32> to vector<16x16xf32>
    %cst_121 = arith.constant dense<0.000000e+00> : vector<16x16xf32>
    %389 = tpu.matmul %386, %388, %cst_121 {dimension_numbers = #tpu.dot_dimension_numbers<[1], [0], [0], [1], [0, 0, 1, 1], [], []>} : vector<16x16xf32>, vector<16x16xf32>, vector<16x16xf32> -> vector<16x16xf32>
    %390 = vector.extract_strided_slice %11 {offsets = [2, 0], sizes = [1, 16], strides = [1, 1]} : vector<3x16xf32> to vector<1x16xf32>
    %391 = vector.broadcast %390 : vector<1x16xf32> to vector<16x16xf32>
    %392 = arith.addf %389, %391 : vector<16x16xf32>
    %393 = arith.addf %319, %392 : vector<16x16xf32>
    %394 = vector.extract_strided_slice %12 {offsets = [2, 0], sizes = [1, 16], strides = [1, 1]} : vector<3x16xf32> to vector<1x16xf32>
    %395 = vector.extract_strided_slice %13 {offsets = [2, 0], sizes = [1, 16], strides = [1, 1]} : vector<3x16xf32> to vector<1x16xf32>
    %cst_122 = arith.constant dense<0.000000e+00> : vector<16xf32>
    %396 = vector.multi_reduction <add>, %393, %cst_122 [1] : vector<16x16xf32> to vector<16xf32>
    %397 = vector.shape_cast %396 : vector<16xf32> to vector<16x1xf32>
    %cst_123 = arith.constant 1.600000e+01 : f32
    %398 = vector.broadcast %cst_123 : f32 to vector<16x1xf32>
    %399 = arith.divf %397, %398 : vector<16x1xf32>
    %400 = vector.broadcast %399 : vector<16x1xf32> to vector<16x16xf32>
    %401 = arith.subf %393, %400 : vector<16x16xf32>
    %402 = arith.mulf %401, %401 : vector<16x16xf32>
    %cst_124 = arith.constant dense<0.000000e+00> : vector<16xf32>
    %403 = vector.multi_reduction <add>, %402, %cst_124 [1] : vector<16x16xf32> to vector<16xf32>
    %404 = vector.shape_cast %403 : vector<16xf32> to vector<16x1xf32>
    %cst_125 = arith.constant 1.600000e+01 : f32
    %405 = vector.broadcast %cst_125 : f32 to vector<16x1xf32>
    %406 = arith.divf %404, %405 : vector<16x1xf32>
    %407 = vector.broadcast %399 : vector<16x1xf32> to vector<16x16xf32>
    %408 = arith.subf %393, %407 : vector<16x16xf32>
    %cst_126 = arith.constant 9.99999974E-6 : f32
    %409 = vector.broadcast %cst_126 : f32 to vector<16x1xf32>
    %410 = arith.addf %406, %409 : vector<16x1xf32>
    %411 = math.rsqrt %410 : vector<16x1xf32>
    %412 = vector.broadcast %411 : vector<16x1xf32> to vector<16x16xf32>
    %413 = arith.mulf %408, %412 : vector<16x16xf32>
    %414 = vector.broadcast %394 : vector<1x16xf32> to vector<16x16xf32>
    %415 = arith.mulf %413, %414 : vector<16x16xf32>
    %416 = vector.broadcast %395 : vector<1x16xf32> to vector<16x16xf32>
    %417 = arith.addf %415, %416 : vector<16x16xf32>
    %418 = vector.extract_strided_slice %14 {offsets = [2, 0, 0], sizes = [1, 16, 64], strides = [1, 1, 1]} : vector<3x16x64xf32> to vector<1x16x64xf32>
    %419 = vector.shape_cast %418 : vector<1x16x64xf32> to vector<16x64xf32>
    %cst_127 = arith.constant dense<0.000000e+00> : vector<16x64xf32>
    %420 = tpu.matmul %417, %419, %cst_127 {dimension_numbers = #tpu.dot_dimension_numbers<[1], [0], [0], [1], [0, 0, 1, 1], [], []>} : vector<16x16xf32>, vector<16x64xf32>, vector<16x64xf32> -> vector<16x64xf32>
    %421 = vector.extract_strided_slice %15 {offsets = [2, 0], sizes = [1, 64], strides = [1, 1]} : vector<3x64xf32> to vector<1x64xf32>
    %422 = vector.broadcast %421 : vector<1x64xf32> to vector<16x64xf32>
    %423 = arith.addf %420, %422 : vector<16x64xf32>
    %cst_128 = arith.constant 5.000000e-01 : f32
    %424 = vector.broadcast %cst_128 : f32 to vector<16x64xf32>
    %425 = arith.mulf %424, %423 : vector<16x64xf32>
    %cst_129 = arith.constant 0.707106769 : f32
    %426 = vector.broadcast %cst_129 : f32 to vector<16x64xf32>
    %427 = arith.mulf %423, %426 : vector<16x64xf32>
    %428 = math.absf %427 : vector<16x64xf32>
    %cst_130 = arith.constant 0.327591091 : f32
    %429 = vector.broadcast %cst_130 : f32 to vector<16x64xf32>
    %430 = arith.mulf %429, %428 : vector<16x64xf32>
    %cst_131 = arith.constant 1.000000e+00 : f32
    %431 = vector.broadcast %cst_131 : f32 to vector<16x64xf32>
    %432 = arith.addf %431, %430 : vector<16x64xf32>
    %cst_132 = arith.constant 1.000000e+00 : f32
    %433 = vector.broadcast %cst_132 : f32 to vector<16x64xf32>
    %434 = arith.divf %433, %432 : vector<16x64xf32>
    %cst_133 = arith.constant 1.06140542 : f32
    %435 = vector.broadcast %cst_133 : f32 to vector<16x64xf32>
    %436 = arith.mulf %435, %434 : vector<16x64xf32>
    %cst_134 = arith.constant -1.45315206 : f32
    %437 = vector.broadcast %cst_134 : f32 to vector<16x64xf32>
    %438 = arith.addf %436, %437 : vector<16x64xf32>
    %439 = arith.mulf %438, %434 : vector<16x64xf32>
    %cst_135 = arith.constant 1.42141378 : f32
    %440 = vector.broadcast %cst_135 : f32 to vector<16x64xf32>
    %441 = arith.addf %439, %440 : vector<16x64xf32>
    %442 = arith.mulf %441, %434 : vector<16x64xf32>
    %cst_136 = arith.constant -0.284496725 : f32
    %443 = vector.broadcast %cst_136 : f32 to vector<16x64xf32>
    %444 = arith.addf %442, %443 : vector<16x64xf32>
    %445 = arith.mulf %444, %434 : vector<16x64xf32>
    %cst_137 = arith.constant 0.254829586 : f32
    %446 = vector.broadcast %cst_137 : f32 to vector<16x64xf32>
    %447 = arith.addf %445, %446 : vector<16x64xf32>
    %448 = arith.mulf %447, %434 : vector<16x64xf32>
    %cst_138 = arith.constant 0.000000e+00 : f32
    %449 = vector.broadcast %cst_138 : f32 to vector<16x64xf32>
    %450 = arith.subf %449, %428 : vector<16x64xf32>
    %451 = arith.mulf %450, %428 : vector<16x64xf32>
    %452 = math.exp %451 : vector<16x64xf32>
    %453 = arith.mulf %448, %452 : vector<16x64xf32>
    %cst_139 = arith.constant 1.000000e+00 : f32
    %454 = vector.broadcast %cst_139 : f32 to vector<16x64xf32>
    %455 = arith.subf %454, %453 : vector<16x64xf32>
    %cst_140 = arith.constant 0.000000e+00 : f32
    %456 = vector.broadcast %cst_140 : f32 to vector<16x64xf32>
    %457 = arith.cmpf oge, %427, %456 : vector<16x64xf32>
    %cst_141 = arith.constant 0.000000e+00 : f32
    %458 = vector.broadcast %cst_141 : f32 to vector<16x64xf32>
    %459 = arith.subf %458, %455 : vector<16x64xf32>
    %460 = arith.select %457, %455, %459 : vector<16x64xi1>, vector<16x64xf32>
    %cst_142 = arith.constant 1.000000e+00 : f32
    %461 = vector.broadcast %cst_142 : f32 to vector<16x64xf32>
    %462 = arith.addf %461, %460 : vector<16x64xf32>
    %463 = arith.mulf %425, %462 : vector<16x64xf32>
    %464 = vector.extract_strided_slice %16 {offsets = [2, 0, 0], sizes = [1, 64, 16], strides = [1, 1, 1]} : vector<3x64x16xf32> to vector<1x64x16xf32>
    %465 = vector.shape_cast %464 : vector<1x64x16xf32> to vector<64x16xf32>
    %cst_143 = arith.constant dense<0.000000e+00> : vector<16x16xf32>
    %466 = tpu.matmul %463, %465, %cst_143 {dimension_numbers = #tpu.dot_dimension_numbers<[1], [0], [0], [1], [0, 0, 1, 1], [], []>} : vector<16x64xf32>, vector<64x16xf32>, vector<16x16xf32> -> vector<16x16xf32>
    %467 = vector.extract_strided_slice %17 {offsets = [2, 0], sizes = [1, 16], strides = [1, 1]} : vector<3x16xf32> to vector<1x16xf32>
    %468 = vector.broadcast %467 : vector<1x16xf32> to vector<16x16xf32>
    %469 = arith.addf %466, %468 : vector<16x16xf32>
    %470 = arith.addf %393, %469 : vector<16x16xf32>
    %c0_144 = arith.constant 0 : index
    %c0_145 = arith.constant 0 : index
    %471 = vector.load %arg18[%c0_144, %c0_145] : memref<1x16xf32, #tpu.memory_space<vmem>>, vector<1x16xf32>
    %c0_146 = arith.constant 0 : index
    %c0_147 = arith.constant 0 : index
    %472 = vector.load %arg19[%c0_146, %c0_147] : memref<1x16xf32, #tpu.memory_space<vmem>>, vector<1x16xf32>
    %cst_148 = arith.constant dense<0.000000e+00> : vector<16xf32>
    %473 = vector.multi_reduction <add>, %470, %cst_148 [1] : vector<16x16xf32> to vector<16xf32>
    %474 = vector.shape_cast %473 : vector<16xf32> to vector<16x1xf32>
    %cst_149 = arith.constant 1.600000e+01 : f32
    %475 = vector.broadcast %cst_149 : f32 to vector<16x1xf32>
    %476 = arith.divf %474, %475 : vector<16x1xf32>
    %477 = vector.broadcast %476 : vector<16x1xf32> to vector<16x16xf32>
    %478 = arith.subf %470, %477 : vector<16x16xf32>
    %479 = arith.mulf %478, %478 : vector<16x16xf32>
    %cst_150 = arith.constant dense<0.000000e+00> : vector<16xf32>
    %480 = vector.multi_reduction <add>, %479, %cst_150 [1] : vector<16x16xf32> to vector<16xf32>
    %481 = vector.shape_cast %480 : vector<16xf32> to vector<16x1xf32>
    %cst_151 = arith.constant 1.600000e+01 : f32
    %482 = vector.broadcast %cst_151 : f32 to vector<16x1xf32>
    %483 = arith.divf %481, %482 : vector<16x1xf32>
    %484 = vector.broadcast %476 : vector<16x1xf32> to vector<16x16xf32>
    %485 = arith.subf %470, %484 : vector<16x16xf32>
    %cst_152 = arith.constant 9.99999974E-6 : f32
    %486 = vector.broadcast %cst_152 : f32 to vector<16x1xf32>
    %487 = arith.addf %483, %486 : vector<16x1xf32>
    %488 = math.rsqrt %487 : vector<16x1xf32>
    %489 = vector.broadcast %488 : vector<16x1xf32> to vector<16x16xf32>
    %490 = arith.mulf %485, %489 : vector<16x16xf32>
    %491 = vector.broadcast %471 : vector<1x16xf32> to vector<16x16xf32>
    %492 = arith.mulf %490, %491 : vector<16x16xf32>
    %493 = vector.broadcast %472 : vector<1x16xf32> to vector<16x16xf32>
    %494 = arith.addf %492, %493 : vector<16x16xf32>
    %495 = vector.shape_cast %494 : vector<16x16xf32> to vector<2x8x16xf32>
    %c0_153 = arith.constant 0 : index
    %c0_154 = arith.constant 0 : index
    %c0_155 = arith.constant 0 : index
    %496 = vector.load %arg20[%c0_153, %c0_154, %c0_155] : memref<2x8x16xf32, #tpu.memory_space<vmem>>, vector<2x8x16xf32>
    tpu.vector_store %arg20[%c0_153, %c0_154, %c0_155], %495 {strides = array<i32>} : memref<2x8x16xf32, #tpu.memory_space<vmem>>, vector<2x8x16xf32>,
    return
  }
  func.func @transform_0(%arg0: i32) -> (i32, i32, i32) {
    %c0_i32 = arith.constant 0 : i32
    %c0_i32_0 = arith.constant 0 : i32
    %c0_i32_1 = arith.constant 0 : i32
    return %arg0, %c0_i32, %c0_i32_0 : i32, i32, i32
  }
  func.func @transform_1(%arg0: i32) -> (i32, i32) {
    %c0_i32 = arith.constant 0 : i32
    %c0_i32_0 = arith.constant 0 : i32
    %c0_i32_1 = arith.constant 0 : i32
    return %c0_i32, %c0_i32_0 : i32, i32
  }
  func.func @transform_2(%arg0: i32) -> (i32, i32) {
    %c0_i32 = arith.constant 0 : i32
    %c0_i32_0 = arith.constant 0 : i32
    %c0_i32_1 = arith.constant 0 : i32
    return %c0_i32, %c0_i32_0 : i32, i32
  }
  func.func @transform_3(%arg0: i32) -> (i32, i32, i32) {
    %c0_i32 = arith.constant 0 : i32
    %c0_i32_0 = arith.constant 0 : i32
    %c0_i32_1 = arith.constant 0 : i32
    %c0_i32_2 = arith.constant 0 : i32
    return %c0_i32, %c0_i32_0, %c0_i32_1 : i32, i32, i32
  }
  func.func @transform_4(%arg0: i32) -> (i32, i32) {
    %c0_i32 = arith.constant 0 : i32
    %c0_i32_0 = arith.constant 0 : i32
    %c0_i32_1 = arith.constant 0 : i32
    return %c0_i32, %c0_i32_0 : i32, i32
  }
  func.func @transform_5(%arg0: i32) -> (i32, i32, i32) {
    %c0_i32 = arith.constant 0 : i32
    %c0_i32_0 = arith.constant 0 : i32
    %c0_i32_1 = arith.constant 0 : i32
    %c0_i32_2 = arith.constant 0 : i32
    return %c0_i32, %c0_i32_0, %c0_i32_1 : i32, i32, i32
  }
  func.func @transform_6(%arg0: i32) -> (i32, i32) {
    %c0_i32 = arith.constant 0 : i32
    %c0_i32_0 = arith.constant 0 : i32
    %c0_i32_1 = arith.constant 0 : i32
    return %c0_i32, %c0_i32_0 : i32, i32
  }
  func.func @transform_7(%arg0: i32) -> (i32, i32, i32) {
    %c0_i32 = arith.constant 0 : i32
    %c0_i32_0 = arith.constant 0 : i32
    %c0_i32_1 = arith.constant 0 : i32
    %c0_i32_2 = arith.constant 0 : i32
    return %c0_i32, %c0_i32_0, %c0_i32_1 : i32, i32, i32
  }
  func.func @transform_8(%arg0: i32) -> (i32, i32) {
    %c0_i32 = arith.constant 0 : i32
    %c0_i32_0 = arith.constant 0 : i32
    %c0_i32_1 = arith.constant 0 : i32
    return %c0_i32, %c0_i32_0 : i32, i32
  }
  func.func @transform_9(%arg0: i32) -> (i32, i32, i32) {
    %c0_i32 = arith.constant 0 : i32
    %c0_i32_0 = arith.constant 0 : i32
    %c0_i32_1 = arith.constant 0 : i32
    %c0_i32_2 = arith.constant 0 : i32
    return %c0_i32, %c0_i32_0, %c0_i32_1 : i32, i32, i32
  }
  func.func @transform_10(%arg0: i32) -> (i32, i32) {
    %c0_i32 = arith.constant 0 : i32
    %c0_i32_0 = arith.constant 0 : i32
    %c0_i32_1 = arith.constant 0 : i32
    return %c0_i32, %c0_i32_0 : i32, i32
  }
  func.func @transform_11(%arg0: i32) -> (i32, i32) {
    %c0_i32 = arith.constant 0 : i32
    %c0_i32_0 = arith.constant 0 : i32
    %c0_i32_1 = arith.constant 0 : i32
    return %c0_i32, %c0_i32_0 : i32, i32
  }
  func.func @transform_12(%arg0: i32) -> (i32, i32) {
    %c0_i32 = arith.constant 0 : i32
    %c0_i32_0 = arith.constant 0 : i32
    %c0_i32_1 = arith.constant 0 : i32
    return %c0_i32, %c0_i32_0 : i32, i32
  }
  func.func @transform_13(%arg0: i32) -> (i32, i32, i32) {
    %c0_i32 = arith.constant 0 : i32
    %c0_i32_0 = arith.constant 0 : i32
    %c0_i32_1 = arith.constant 0 : i32
    %c0_i32_2 = arith.constant 0 : i32
    return %c0_i32, %c0_i32_0, %c0_i32_1 : i32, i32, i32
  }
  func.func @transform_14(%arg0: i32) -> (i32, i32) {
    %c0_i32 = arith.constant 0 : i32
    %c0_i32_0 = arith.constant 0 : i32
    %c0_i32_1 = arith.constant 0 : i32
    return %c0_i32, %c0_i32_0 : i32, i32
  }
  func.func @transform_15(%arg0: i32) -> (i32, i32, i32) {
    %c0_i32 = arith.constant 0 : i32
    %c0_i32_0 = arith.constant 0 : i32
    %c0_i32_1 = arith.constant 0 : i32
    %c0_i32_2 = arith.constant 0 : i32
    return %c0_i32, %c0_i32_0, %c0_i32_1 : i32, i32, i32
  }
  func.func @transform_16(%arg0: i32) -> (i32, i32) {
    %c0_i32 = arith.constant 0 : i32
    %c0_i32_0 = arith.constant 0 : i32
    %c0_i32_1 = arith.constant 0 : i32
    return %c0_i32, %c0_i32_0 : i32, i32
  }
  func.func @transform_17(%arg0: i32) -> (i32, i32) {
    %c0_i32 = arith.constant 0 : i32
    %c0_i32_0 = arith.constant 0 : i32
    %c0_i32_1 = arith.constant 0 : i32
    return %c0_i32, %c0_i32_0 : i32, i32
  }
  func.func @transform_18(%arg0: i32) -> (i32, i32) {
    %c0_i32 = arith.constant 0 : i32
    %c0_i32_0 = arith.constant 0 : i32
    %c0_i32_1 = arith.constant 0 : i32
    return %c0_i32, %c0_i32_0 : i32, i32
  }
  func.func @transform_19(%arg0: i32) -> (i32, i32, i32) {
    %c0_i32 = arith.constant 0 : i32
    %c0_i32_0 = arith.constant 0 : i32
    %c0_i32_1 = arith.constant 0 : i32
    return %arg0, %c0_i32, %c0_i32_0 : i32, i32, i32
  }
}

</mosaic_0001>

<bundles_post_ra>
// kernel: tpu_custom_call.1
= control target key start
LH: loop header
LB: loop body
LE: loop exit
PB: predicated region body
PF: predicated region fallthrough
CT: control target
= control target key end

     0   :  { %s6248_s0 = inlined_call_operand.hbm [shape: f32[2,8,16], index: 0, kind: input, shape index: {}]   ;;  %s6249_s1 = inlined_call_operand.hbm [shape: f32[3,16], index: 1, kind: input, shape index: {}]   ;;  %s6250_s2 = inlined_call_operand.hbm [shape: f32[3,16], index: 2, kind: input, shape index: {}]   ;;  %s6251_s3 = inlined_call_operand.vmem [shape: f32[3,16,16], index: 3, kind: input, shape index: {}]   ;;  %s6252_s4 = inlined_call_operand.vmem [shape: f32[3,16], index: 4, kind: input, shape index: {}]   ;;  %s6253_s5 = inlined_call_operand.vmem [shape: f32[3,16,16], index: 5, kind: input, shape index: {}]   ;;  %s6254_s6 = inlined_call_operand.vmem [shape: f32[3,16], index: 6, kind: input, shape index: {}]   ;;  %s6255_s7 = inlined_call_operand.vmem [shape: f32[3,16,16], index: 7, kind: input, shape index: {}]   ;;  %s6256_s8 = inlined_call_operand.vmem [shape: f32[3,16], index: 8, kind: input, shape index: {}]   ;;  %s6257_s9 = inlined_call_operand.vmem [shape: f32[3,16,16], index: 9, kind: input, shape index: {}]   ;;  %s6258_s10 = inlined_call_operand.vmem [shape: f32[3,16], index: 10, kind: input, shape index: {}]   ;;  %s6259_s11 = inlined_call_operand.hbm [shape: f32[3,16], index: 11, kind: input, shape index: {}]   ;;  %s6260_s12 = inlined_call_operand.vmem [shape: f32[3,16], index: 12, kind: input, shape index: {}]   ;;  %s6261_s13 = inlined_call_operand.vmem [shape: f32[3,16,64], index: 13, kind: input, shape index: {}]   ;;  %s6262_s14 = inlined_call_operand.vmem [shape: f32[3,64], index: 14, kind: input, shape index: {}]   ;;  %s6263_s15 = inlined_call_operand.vmem [shape: f32[3,64,16], index: 15, kind: input, shape index: {}]   ;;  %s6264_s16 = inlined_call_operand.vmem [shape: f32[3,16], index: 16, kind: input, shape index: {}]   ;;  %s6265_s17 = inlined_call_operand.vmem [shape: f32[1,16], index: 17, kind: input, shape index: {}]   ;;  %s6266_s18 = inlined_call_operand.vmem [shape: f32[1,16], index: 18, kind: input, shape index: {}]   ;;  %s6267_s19 = inlined_call_operand.hbm [shape: f32[2,8,16], index: 19, kind: output, shape index: {}]  }
   0x1   :  { %6269 = sst [smem:[#allocation15_spill]] %s6248_s0 }
   0x2   :  { %6270 = sst [smem:[#allocation16_spill]] %s6249_s1 }
   0x3   :  { %6271 = sst [smem:[#allocation17_spill]] %s6250_s2 }
   0x4   :  { %6272 = sst [smem:[#allocation18_spill]] %s6251_s3 }
   0x5   :  { %24 = vsyncpa [#allocation3], 0 }
   0x6   :  { %25 = vsyncpa [#allocation6], 0 }
   0x7   :  { %26 = vsyncpa [#allocation9], 0 }
   0x8   :  { %27 = vsyncpa [#allocation4], 0  ;;  %s4789_s0 = smov [#allocation5]   ;;  %s4790_s20 = smov [#allocation2]  }
   0x9   :  { %s46_s30 = sshll.u32 %s4789_s0, 4  ;;  %s33_s21 = sshll.u32 %s4790_s20, 4  ;;  %s47_s30 = int_to_ptr.vmem [resolvable:$true] %s46_s30  ;;  %s34_s21 = int_to_ptr.vmem [resolvable:$true] %s33_s21 }
   0xa   :  { %s4689_s1 = scalar_lea.vmem %s47_s30, 64  ;;  %p4694_p1 = scmp.lt.s32.totalorder %s47_s30, %s47_s30 }
   0xb   :  { %p4690_p0 = scmp.ne.s32.totalorder %s47_s30, %s4689_s1  ;;  %p4695_p2 = scmp.lt.s32.totalorder %s4689_s1, %s4689_s1 }
   0xd   :  { %p4696_p3 = por %p4695_p2, %p4694_p1 }
   0xf   :  { %p4697_p4 = pnand %p4696_p3, %p4690_p0 }
  0x11   :  { %4700 = shalt.err (!%p4697_p4)
}
  0x12   :  { %s6273_s23 = sld [smem:[#allocation16_spill]]  ;;  %s4709_s24 = scalar_lea.vmem %s34_s21, 256 }
  0x13   :  { %p4710_p5 = scmp.ne.s32.totalorder %s34_s21, %s4709_s24  ;;  %p4714_p6 = scmp.lt.s32.totalorder %s34_s21, %s34_s21 }
  0x14   :  { %p4715_p7 = scmp.lt.s32.totalorder %s4709_s24, %s4709_s24 }
  0x16   :  { %p4716_p8 = por %p4715_p7, %p4714_p6 }
  0x18   :  { %49 = dma.hbm_to_vmem [thread:$0]  %s6273_s23, 64, %s47_s30, [#allocation6]  }
  0x19   :  { %p4717_p9 = pnand %p4716_p8, %p4710_p5 }
  0x1b   :  { %4720 = shalt.err (!%p4717_p9)
}
  0x1c   :  { %s4791_s25 = smov 128   ;;  %s4792_s3 = smov 8  }
  0x1d   :  { %s6274_s28 = sld [smem:[#allocation15_spill]]  ;;  %s4793_s29 = smov [#allocation7]  }
  0x1e   :  { %s56_s0 = sshll.u32 %s4793_s29, 4  ;;  %s4794_s20 = smov [#allocation8]   ;;  %s57_s0 = int_to_ptr.vmem [resolvable:$true] %s56_s0 }
  0x1f   :  { %s82_s30 = sshll.u32 %s4794_s20, 4  ;;  %s4729_s1 = scalar_lea.vmem %s57_s0, 64  ;;  %s83_s30 = int_to_ptr.vmem [resolvable:$true] %s82_s30 }
  0x20   :  { %p4730_p10 = scmp.ne.s32.totalorder %s57_s0, %s4729_s1  ;;  %p4734_p11 = scmp.lt.s32.totalorder %s57_s0, %s57_s0 }
  0x21   :  { %p4735_p12 = scmp.lt.s32.totalorder %s4729_s1, %s4729_s1 }
  0x23   :  { %39 = dma.hbm_to_vmem [thread:$0]  %s6274_s28, 256, %s34_s21, [#allocation3], %s4791_s25, %s4791_s25, %s4792_s3  }
  0x24   :  { %p4736_p13 = por %p4735_p12, %p4734_p11 }
  0x26   :  { %p4737_p0 = pnand %p4736_p13, %p4730_p10 }
  0x28   :  { %4740 = shalt.err (!%p4737_p0)
}
  0x29   :  { %s6275_s23 = sld [smem:[#allocation17_spill]]  ;;  %s4749_s24 = scalar_lea.vmem %s83_s30, 64 }
  0x2a   :  { %p4750_p1 = scmp.ne.s32.totalorder %s83_s30, %s4749_s24  ;;  %p4754_p2 = scmp.lt.s32.totalorder %s83_s30, %s83_s30 }
  0x2b   :  { %p4755_p3 = scmp.lt.s32.totalorder %s4749_s24, %s4749_s24 }
  0x2d   :  { %p4756_p4 = por %p4755_p3, %p4754_p2 }
  0x2f   :  { %59 = dma.hbm_to_vmem [thread:$0]  %s6275_s23, 64, %s57_s0, [#allocation6]  }
  0x30   :  { %p4757_p5 = pnand %p4756_p4, %p4750_p1 }
  0x32   :  { %4760 = shalt.err (!%p4757_p5)
}
  0x33   :  { %85 = dma.hbm_to_vmem [thread:$0]  %s6259_s11, 64, %s83_s30, [#allocation9]  }
  0x34   :  { %4781 = dma.done.wait [#allocation3], 256  }
  0x35   :  { %4782 = vsyncadd [#allocation3], 4294967040 }
  0x36   :  { %4783 = dma.done.wait [#allocation6], 128  }
  0x37   :  { %4784 = vsyncadd [#allocation6], 4294967168 }
  0x38   :  { %4785 = dma.done.wait [#allocation9], 64  }
  0x39   :  { %4786 = vsyncadd [#allocation9], 4294967232  ;;  %vm178_vm0 = vcmask 130048   ;;  %v112_v0 = vld [vmem:[#allocation2] sm:$0xff]  ;;  %v113_v1 = vld [vmem:[#allocation2 + $0x8] sm:$0xff]  ;;  %s6276_s28 = sld [smem:[#allocation18_spill]]  ;;  %v206_v22 = vlaneseq }
  0x3a   :  { %v179_v2 = vsel %vm178_vm0, %v112_v0, 0.0  ;;  %v182_v3 = vsel %vm178_vm0, %v113_v1, 0.0  ;;  %v124_v16 = vld [vmem:[%s6253_s5 + $0x8] sm:$0xff]  ;;  %v114_v26 = vld [vmem:[#allocation5] sm:$0x7]  ;;  %v123_v38 = vld [vmem:[%s6253_s5] sm:$0xff] }
  0x3b   :  { %180 = vadd.xlane.f32.xlu0 %v179_v2  ;;  %v4925_v24 = vshrl.u32 %v206_v22, 7  ;;  %v115_v27 = vld [vmem:[#allocation7] sm:$0x7]  ;;  %v131_v39 = vld [vmem:[%s6255_s7 + $0x8] sm:$0xff]  ;;  %v130_v40 = vld [vmem:[%s6255_s7] sm:$0xff]  ;;  %vm1109_vm1 = vcmask 1041409  }
  0x3c   :  { %v138_v41 = vld [vmem:[%s6257_s9 + $0x8] sm:$0xff]  ;;  %v137_v42 = vld [vmem:[%s6257_s9] sm:$0xff]  ;;  %v4795_v43 = vmov 1966171168   ;;  %vm1111_vm2 = vcmask 1042434   ;;  %vm1113_vm3 = vcmask 1043459  }
  0x3d   :  { %v4928_v25 = vsub.s32 0, %v4925_v24  ;;  %4266 = vmatprep.subr.mxu1 %v138_v41  ;;  %v465_v44 = vunpack.c.l.s4 %v4795_v43  ;;  %v122_v45 = vld [vmem:[%s6252_s4] sm:$0x7]  ;;  %vm1115_vm4 = vcmask 1044484   ;;  %vm1117_vm5 = vcmask 1045509  }
  0x3e   :  { %4267 = vmatpush3.msra.mxu1 %v138_v41  ;;  %v129_v55 = vld [vmem:[%s6254_s6] sm:$0x7]  ;;  %vm1119_vm6 = vcmask 1046534   ;;  %vm1121_vm7 = vcmask 1047559   ;;  %vm1392_vm10 = vcmask 523264  }
  0x3f   :  { %183 = vadd.xlane.f32.xlu0 %v182_v3  ;;  %v117_v14 = vld [vmem:[%s6276_s28 + $0x8] sm:$0xff]  ;;  %v116_v15 = vld [vmem:[%s6276_s28] sm:$0xff]  ;;  %v209_v28 = vrot.slane %v114_v26, %v4928_v25  ;;  %v215_v31 = vrot.slane %v115_v27, %v4928_v25  ;;  %4268 = vmatprep.subr.mxu1 %v137_v42  ;;  %v466_v46 = vunpack.c.0.s8 %v465_v44  ;;  %v221_v47 = vrot.slane %v122_v45, %v4928_v25 }
  0x40   :  { %4245 = vmatprep.subr.mxu0 %v117_v14  ;;  %4269 = vmatpush3.msra.mxu1 %v137_v42  ;;  %v4968_v61 = vrot.slane %v129_v55, %v4928_v25 }
  0x41   :  { %4246 = vmatpush3.msra.mxu0 %v117_v14  ;;  %v4958_v48 = vsub.s32 %v466_v46, %v4925_v24 }
  0x42   :  { %4247 = vmatprep.subr.mxu0 %v116_v15 }
  0x43   :  { %4248 = vmatpush3.msra.mxu0 %v116_v15 }
  0x44   :  { %4252 = vmatprep.subr.mxu0 %v124_v16 }
  0xc4   :  { %v181_v4 = vpop.xlane.xlu0 %180 }
  0xc5   :  { %v186_v5 = vmul.f32 0.0625, %v181_v4 }
  0xc7   :  { %v188_v6 = vsub.f32 %v112_v0, %v186_v5 }
  0xc8   :  { %v184_v7 = vpop.xlane.xlu0 %183 }
  0xc9   :  { %v187_v8 = vmul.f32 0.0625, %v184_v7  ;;  %v190_v9 = vmul.f32 %v188_v6, %v188_v6 }
  0xcb   :  { %v189_v10 = vsub.f32 %v113_v1, %v187_v8  ;;  %v192_v11 = vsel %vm178_vm0, %v190_v9, 0.0 }
  0xcc   :  { %193 = vadd.xlane.f32.xlu1 %v192_v11 }
  0xcd   :  { %v191_v12 = vmul.f32 %v189_v10, %v189_v10 }
  0xcf   :  { %v195_v13 = vsel %vm178_vm0, %v191_v12, 0.0 }
  0xd0   :  { %196 = vadd.xlane.f32.xlu1 %v195_v13 }
 0x155   :  { %v194_v17 = vpop.xlane.xlu1 %193 }
 0x156   :  { %v198_v18 = vmul.f32 0.0625, %v194_v17 }
 0x158   :  { %v200_v19 = vadd.f32 1e-05, %v198_v18 }
 0x159   :  { %v197_v20 = vpop.xlane.xlu1 %196 }
 0x15a   :  { %4415 = vrsqrt.f32 %v200_v19  ;;  %v199_v21 = vmul.f32 0.0625, %v197_v20 }
 0x15c   :  { %v201_v23 = vadd.f32 1e-05, %v199_v21 }
 0x15e   :  { %4417 = vrsqrt.f32 %v201_v23 }
 0x167   :  { %v4416_v29 = vpop.eup %4415 }
 0x168   :  { %v204_v30 = vmul.f32 %v4416_v29, %v188_v6 }
 0x16a   :  { %v210_v32 = vmul.f32 %v209_v28, %v204_v30 }
 0x16b   :  { %v4418_v33 = vpop.eup %4417 }
 0x16c   :  { %v216_v34 = vadd.f32 %v215_v31, %v210_v32  ;;  %v205_v35 = vmul.f32 %v4418_v33, %v189_v10 }
 0x16e   :  { %4249 = vmatprep.mubr.msk.f32.mxu0 %vm178_vm0, %v216_v34  ;;  %v211_v36 = vmul.f32 %v209_v28, %v205_v35 }
 0x170   :  { %v217_v37 = vadd.f32 %v215_v31, %v211_v36 }
 0x172   :  { %4250 = vmatmul.mubr.msk.f32.vlgmr.msra.gmra.mxu0 %vm178_vm0, %v217_v37 }
 0x173   :  { %4253 = vmatpush3.msra.mxu0 %v124_v16  ;;  %4256 = vmatprep.mubr.msk.f32.mxu0 %vm178_vm0, %v216_v34 }
 0x174   :  { %4254 = vmatprep.subr.mxu0 %v123_v38 }
 0x175   :  { %4255 = vmatpush3.msra.mxu0 %v123_v38 }
 0x176   :  { %4257 = vmatmul.mubr.msk.f32.vlgmr.msra.gmra.mxu0 %vm178_vm0, %v217_v37  ;;  %4259 = vmatprep.subr.mxu0 %v131_v39 }
 0x177   :  { %4260 = vmatpush3.msra.mxu0 %v131_v39  ;;  %4263 = vmatprep.mubr.msk.f32.mxu0 %vm178_vm0, %v216_v34 }
 0x178   :  { %4261 = vmatprep.subr.mxu0 %v130_v40 }
 0x179   :  { %4262 = vmatpush3.msra.mxu0 %v130_v40 }
 0x17a   :  { %4264 = vmatmul.mubr.msk.f32.vlgmr.msra.gmra.mxu0 %vm178_vm0, %v217_v37 }
 0x232   :  { %v4251_v49 = vpop.f32.mrf.mxu0 }
 0x233   :  { %v300_v50 = vadd.f32 %v4251_v49, %v221_v47 }
 0x234   :  { %v294_v51 = vpop.f32.mrf.mxu0 }
 0x235   :  { %v512_v52 = vcombine.high %v300_v50, %v300_v50  ;;  %v519_v53 = vrot.slane %v300_v50, %v4958_v48  ;;  %v295_v54 = vadd.f32 %v294_v51, %v221_v47 }
 0x236   :  { %v4258_v2 = vpop.f32.mrf.mxu0 }
 0x237   :  { %v526_v56 = vrot.slane %v512_v52, %v4958_v48  ;;  %v527_v57 = vcombine.high %v519_v53, %v519_v53  ;;  %v535_v58 = vrot.slane %v519_v53, %v4958_v48  ;;  %v463_v59 = vcombine.high %v295_v54, %v295_v54 }
 0x238   :  { %v470_v60 = vrot.slane %v295_v54, %v4958_v48  ;;  %v379_v12 = vadd.f32 %v4258_v2, %v4968_v61 }
 0x239   :  { %v528_v62 = vcombine.high %v526_v56, %v526_v56  ;;  %v542_v63 = vrot.slane %v526_v56, %v4958_v48  ;;  %v549_v0 = vrot.slane %v527_v57, %v4958_v48  ;;  %v557_v1 = vcombine.high %v535_v58, %v535_v58 }
 0x23a   :  { %v477_v3 = vrot.slane %v463_v59, %v4958_v48  ;;  %v478_v4 = vcombine.high %v470_v60, %v470_v60  ;;  %v4974_v5 = vrot.slane %v470_v60, %v4958_v48  ;;  %v596_v9 = vrot.slane %v535_v58, %v4928_v25 }
 0x23b   :  { %v556_v6 = vrot.slane %v528_v62, %v4958_v48  ;;  %v558_v7 = vcombine.high %v542_v63, %v542_v63  ;;  %v559_v8 = vcombine.high %v549_v0, %v549_v0  ;;  %v600_v14 = vrot.slane %v549_v0, %v4928_v25 }
 0x23c   :  { %v479_v10 = vcombine.high %v477_v3, %v477_v3  ;;  %v4979_v11 = vrot.slane %v477_v3, %v4958_v48  ;;  %v604_v15 = vrot.slane %v557_v1, %v4928_v25  ;;  %v612_v16 = vrot.slane %v542_v63, %v4928_v25 }
 0x23d   :  { %v560_v13 = vcombine.high %v556_v6, %v556_v6  ;;  %v608_v17 = vrot.slane %v559_v8, %v4928_v25  ;;  %v4987_v18 = vrot.slane %v478_v4, %v4958_v48  ;;  %v508_v20 = vcombine.high %v4974_v5, %v4974_v5 }
 0x23e   :  { %v4990_v19 = vrot.slane %v479_v10, %v4958_v48  ;;  %v616_v21 = vrot.slane %v556_v6, %v4928_v25  ;;  %v620_v22 = vrot.slane %v558_v7, %v4928_v25  ;;  %v4997_v26 = vmul.f32 %v596_v9, %v379_v12 }
 0x23f   :  { %v624_v23 = vrot.slane %v560_v13, %v4928_v25  ;;  %v509_v27 = vcombine.high %v4979_v11, %v4979_v11  ;;  %v510_v28 = vcombine.high %v4987_v18, %v4987_v18  ;;  %v564_v29 = vrot.slane %v4974_v5, %v4928_v25 }
 0x240   :  { %v580_v30 = vrot.slane %v4979_v11, %v4928_v25  ;;  %v511_v31 = vcombine.high %v4990_v19, %v4990_v19  ;;  %v568_v32 = vrot.slane %v4987_v18, %v4928_v25  ;;  %v5011_v33 = vmul.f32 %v600_v14, %v379_v12 }
 0x241   :  { %v5013_v34 = vmul.f32 %v604_v15, %v379_v12  ;;  %v5016_v35 = vrot.slane %v508_v20, %v4928_v25  ;;  %v584_v36 = vrot.slane %v4990_v19, %v4928_v25  ;;  %v5020_v37 = vmul.f32 %v608_v17, %v379_v12 }
 0x242   :  { %v5022_v38 = vmul.f32 %v612_v16, %v379_v12  ;;  %v5024_v39 = vmul.f32 %v616_v21, %v379_v12  ;;  %v5026_v40 = vmul.f32 %v620_v22, %v379_v12  ;;  %v5028_v41 = vmul.f32 %v624_v23, %v379_v12 }
 0x243   :  { %v713_v42 = vsel %vm178_vm0, %v4997_v26, -inf  ;;  %v720_v44 = vsel %vm178_vm0, %v5011_v33, -inf  ;;  %v727_v45 = vsel %vm178_vm0, %v5013_v34, -inf  ;;  %v734_v46 = vsel %vm178_vm0, %v5020_v37, -inf }
 0x244   :  { %v714_v43 = vrot.slane %v713_v42, 4  ;;  %v721_v47 = vrot.slane %v720_v44, 4  ;;  %v728_v49 = vrot.slane %v727_v45, 4  ;;  %v735_v50 = vrot.slane %v734_v46, 4 }
 0x245   :  { %v741_v51 = vsel %vm178_vm0, %v5022_v38, -inf  ;;  %v748_v54 = vsel %vm178_vm0, %v5024_v39, -inf  ;;  %v755_v55 = vsel %vm178_vm0, %v5026_v40, -inf  ;;  %v762_v0 = vsel %vm178_vm0, %v5028_v41, -inf }
 0x246   :  { %v715_v52 = vmax.f32 %v713_v42, %v714_v43  ;;  %v742_v53 = vrot.slane %v741_v51, 4  ;;  %v722_v56 = vmax.f32 %v720_v44, %v721_v47  ;;  %v729_v57 = vmax.f32 %v727_v45, %v728_v49  ;;  %v373_v43 = vpop.f32.mrf.mxu0 }
 0x247   :  { %v736_v58 = vmax.f32 %v734_v46, %v735_v50  ;;  %v749_v59 = vrot.slane %v748_v54, 4  ;;  %v756_v63 = vrot.slane %v755_v55, 4  ;;  %v763_v9 = vrot.slane %v762_v0, 4 }
 0x248   :  { %v716_v60 = vrot.slane %v715_v52, 2  ;;  %v743_v62 = vmax.f32 %v741_v51, %v742_v53  ;;  %v723_v1 = vrot.slane %v722_v56, 2  ;;  %v730_v2 = vrot.slane %v729_v57, 2 }
 0x249   :  { %v737_v3 = vrot.slane %v736_v58, 2  ;;  %v750_v4 = vmax.f32 %v748_v54, %v749_v59  ;;  %v757_v8 = vmax.f32 %v755_v55, %v756_v63  ;;  %v576_v15 = vrot.slane %v510_v28, %v4928_v25 }
 0x24a   :  { %v717_v6 = vmax.f32 %v715_v52, %v716_v60  ;;  %v744_v7 = vrot.slane %v743_v62, 2  ;;  %v724_v10 = vmax.f32 %v722_v56, %v723_v1  ;;  %v731_v12 = vmax.f32 %v729_v57, %v730_v2 }
 0x24b   :  { %v738_v13 = vmax.f32 %v736_v58, %v737_v3  ;;  %v751_v14 = vrot.slane %v750_v4, 2  ;;  %v588_v16 = vrot.slane %v509_v27, %v4928_v25  ;;  %v758_v46 = vrot.slane %v757_v8, 2 }
 0x24c   :  { %v718_v17 = vrot.slane %v717_v6, 1  ;;  %v745_v20 = vmax.f32 %v743_v62, %v744_v7  ;;  %v725_v21 = vrot.slane %v724_v10, 1  ;;  %v732_v22 = vrot.slane %v731_v12, 1 }
 0x24d   :  { %v739_v23 = vrot.slane %v738_v13, 1  ;;  %v752_v42 = vmax.f32 %v750_v4, %v751_v14  ;;  %v5048_v47 = vmax.f32 %v762_v0, %v763_v9  ;;  %v592_v28 = vrot.slane %v511_v31, %v4928_v25 }
 0x24e   :  { %v719_v44 = vmax.f32 %v717_v6, %v718_v17  ;;  %v746_v45 = vrot.slane %v745_v20, 1  ;;  %v726_v49 = vmax.f32 %v724_v10, %v725_v21  ;;  %v733_v50 = vmax.f32 %v731_v12, %v732_v22 }
 0x24f   :  { %v740_v51 = vmax.f32 %v738_v13, %v739_v23  ;;  %v753_v52 = vrot.slane %v752_v42, 1  ;;  %v374_v54 = vadd.f32 %v373_v43, %v4968_v61 }
 0x250   :  { %v747_v53 = vmax.f32 %v745_v20, %v746_v45  ;;  %v777_v27 = vsub.f32 %v4997_v26, %v719_v44  ;;  %v778_v56 = vsub.f32 %v5011_v33, %v726_v49  ;;  %v779_v57 = vsub.f32 %v5013_v34, %v733_v50 }
 0x251   :  { %v5053_v55 = vmax.f32 %v752_v42, %v753_v52  ;;  %v780_v58 = vsub.f32 %v5020_v37, %v740_v51  ;;  %v5062_v31 = vmul.f32 %v564_v29, %v374_v54  ;;  %v5067_v61 = vmul.f32 %v568_v32, %v374_v54 }
 0x252   :  { %v781_v59 = vsub.f32 %v5022_v38, %v747_v53  ;;  %v801_v60 = vmul.f32 1.442695, %v777_v27  ;;  %v5069_v26 = vmax.f32 %v757_v8, %v758_v46  ;;  %v765_v33 = vrot.slane %v5048_v47, 2 }
 0x253   :  { %v803_v34 = vmul.f32 1.442695, %v778_v56  ;;  %v805_v62 = vmul.f32 1.442695, %v779_v57  ;;  %v807_v37 = vmul.f32 1.442695, %v780_v58  ;;  %v5073_v38 = vmul.f32 %v5016_v35, %v374_v54 }
 0x254   :  { %4419 = vpow2.f32 %v801_v60  ;;  %v5075_v63 = vmul.f32 %v576_v15, %v374_v54  ;;  %v782_v5 = vsub.f32 %v5024_v39, %v5053_v55  ;;  %v809_v18 = vmul.f32 1.442695, %v781_v59  ;;  %v4265_v39 = vpop.f32.mrf.mxu0 }
 0x255   :  { %4421 = vpow2.f32 %v803_v34  ;;  %v5082_v29 = vmul.f32 %v580_v30, %v374_v54  ;;  %v5087_v32 = vmul.f32 %v584_v36, %v374_v54  ;;  %v5089_v0 = vmul.f32 %v588_v16, %v374_v54 }
 0x256   :  { %v657_v35 = vsel %vm178_vm0, %v5062_v31, -inf  ;;  %v664_v1 = vsel %vm178_vm0, %v5067_v61, -inf  ;;  %4423 = vpow2.f32 %v805_v62  ;;  %v671_v11 = vsel %vm178_vm0, %v5073_v38, -inf }
 0x257   :  { %v658_v2 = vrot.slane %v657_v35, 4  ;;  %v665_v3 = vrot.slane %v664_v1, 4  ;;  %4425 = vpow2.f32 %v807_v37  ;;  %v672_v30 = vrot.slane %v671_v11, 4 }
 0x258   :  { %v678_v19 = vsel %vm178_vm0, %v5075_v63, -inf  ;;  %v685_v36 = vsel %vm178_vm0, %v5082_v29, -inf  ;;  %4427 = vpow2.f32 %v809_v18  ;;  %v692_v10 = vsel %vm178_vm0, %v5087_v32, -inf }
 0x259   :  { %v659_v4 = vmax.f32 %v657_v35, %v658_v2  ;;  %v666_v6 = vmax.f32 %v664_v1, %v665_v3  ;;  %v679_v7 = vrot.slane %v678_v19, 4  ;;  %v686_v8 = vrot.slane %v685_v36, 4 }
 0x25a   :  { %v673_v9 = vmax.f32 %v671_v11, %v672_v30  ;;  %v699_v12 = vsel %vm178_vm0, %v5089_v0, -inf  ;;  %v693_v20 = vrot.slane %v692_v10, 4  ;;  %v5105_v22 = vmul.f32 %v592_v28, %v374_v54 }
 0x25b   :  { %v660_v13 = vrot.slane %v659_v4, 2  ;;  %v667_v14 = vrot.slane %v666_v6, 2  ;;  %v680_v15 = vmax.f32 %v678_v19, %v679_v7  ;;  %v687_v16 = vmax.f32 %v685_v36, %v686_v8 }
 0x25c   :  { %v674_v17 = vrot.slane %v673_v9, 2  ;;  %v700_v21 = vrot.slane %v699_v12, 4  ;;  %v694_v46 = vmax.f32 %v692_v10, %v693_v20  ;;  %v706_v50 = vsel %vm178_vm0, %v5105_v22, -inf }
 0x25d   :  { %v661_v23 = vmax.f32 %v659_v4, %v660_v13  ;;  %v668_v42 = vmax.f32 %v666_v6, %v667_v14  ;;  %v681_v43 = vrot.slane %v680_v15, 2  ;;  %v688_v44 = vrot.slane %v687_v16, 2 }
 0x25e   :  { %v675_v45 = vmax.f32 %v673_v9, %v674_v17  ;;  %v701_v49 = vmax.f32 %v699_v12, %v700_v21  ;;  %v695_v57 = vrot.slane %v694_v46, 2  ;;  %v707_v59 = vrot.slane %v706_v50, 4 }
 0x25f   :  { %v662_v51 = vrot.slane %v661_v23, 1  ;;  %v669_v52 = vrot.slane %v668_v42, 1  ;;  %v682_v53 = vmax.f32 %v680_v15, %v681_v43  ;;  %v689_v27 = vmax.f32 %v687_v16, %v688_v44 }
 0x260   :  { %v676_v56 = vrot.slane %v675_v45, 1  ;;  %v702_v58 = vrot.slane %v701_v49, 2  ;;  %v696_v1 = vmax.f32 %v694_v46, %v695_v57  ;;  %v708_v20 = vmax.f32 %v706_v50, %v707_v59 }
 0x261   :  { %v5109_v28 = vpop.eup %4419  ;;  %v663_v54 = vmax.f32 %v661_v23, %v662_v51  ;;  %v670_v60 = vmax.f32 %v668_v42, %v669_v52  ;;  %v683_v34 = vrot.slane %v682_v53, 1  ;;  %v690_v62 = vrot.slane %v689_v27, 1 }
 0x262   :  { %v5111_v37 = vpop.eup %4421  ;;  %v873_v18 = vsel %vm178_vm0, %v5109_v28, 0.0  ;;  %v677_v35 = vmax.f32 %v675_v45, %v676_v56  ;;  %v703_v2 = vmax.f32 %v701_v49, %v702_v58  ;;  %v697_v13 = vrot.slane %v696_v1, 1  ;;  %v136_v58 = vld [vmem:[%s6256_s8] sm:$0x7] }
 0x263   :  { %v874_v3 = vrot.slane %v873_v18, 4  ;;  %v880_v11 = vsel %vm178_vm0, %v5111_v37, 0.0  ;;  %v684_v30 = vmax.f32 %v682_v53, %v683_v34  ;;  %v691_v19 = vmax.f32 %v689_v27, %v690_v62  ;;  %v5117_v36 = vpop.eup %4423 }
 0x264   :  { %v881_v4 = vrot.slane %v880_v11, 4  ;;  %v769_v6 = vsub.f32 %v5062_v31, %v663_v54  ;;  %v770_v7 = vsub.f32 %v5067_v61, %v670_v60  ;;  %v771_v8 = vsub.f32 %v5073_v38, %v677_v35  ;;  %v5122_v9 = vpop.eup %4425 }
 0x265   :  { %v772_v10 = vsub.f32 %v5075_v63, %v684_v30  ;;  %v773_v12 = vsub.f32 %v5082_v29, %v691_v19  ;;  %v704_v14 = vrot.slane %v703_v2, 1  ;;  %v5126_v21 = vpop.eup %4427  ;;  %v698_v42 = vmax.f32 %v696_v1, %v697_v13 }
 0x266   :  { %v785_v15 = vmul.f32 1.442695, %v769_v6  ;;  %v787_v16 = vmul.f32 1.442695, %v770_v7  ;;  %v789_v17 = vmul.f32 1.442695, %v771_v8  ;;  %v766_v63 = vmax.f32 %v5048_v47, %v765_v33 }
 0x267   :  { %v791_v23 = vmul.f32 1.442695, %v772_v10  ;;  %v793_v31 = vmul.f32 1.442695, %v773_v12  ;;  %v705_v61 = vmax.f32 %v703_v2, %v704_v14  ;;  %v709_v38 = vrot.slane %v708_v20, 2 }
 0x268   :  { %4429 = vpow2.f32 %v785_v15  ;;  %v760_v43 = vrot.slane %v5069_v26, 1  ;;  %v774_v29 = vsub.f32 %v5087_v32, %v698_v42  ;;  %v875_v45 = vadd.f32 %v874_v3, %v873_v18 }
 0x269   :  { %4431 = vpow2.f32 %v787_v16  ;;  %v775_v44 = vsub.f32 %v5089_v0, %v705_v61  ;;  %v710_v46 = vmax.f32 %v708_v20, %v709_v38  ;;  %v767_v50 = vrot.slane %v766_v63, 1 }
 0x26a   :  { %4433 = vpow2.f32 %v789_v17  ;;  %v761_v49 = vmax.f32 %v5069_v26, %v760_v43  ;;  %v795_v51 = vmul.f32 1.442695, %v774_v29  ;;  %v876_v53 = vrot.slane %v875_v45, 2 }
 0x26b   :  { %4435 = vpow2.f32 %v791_v23  ;;  %v797_v52 = vmul.f32 1.442695, %v775_v44  ;;  %v711_v27 = vrot.slane %v710_v46, 1  ;;  %v768_v56 = vmax.f32 %v766_v63, %v767_v50 }
 0x26c   :  { %4437 = vpow2.f32 %v793_v31  ;;  %v783_v47 = vsub.f32 %v5026_v40, %v761_v49  ;;  %v877_v33 = vadd.f32 %v876_v53, %v875_v45  ;;  %v882_v32 = vadd.f32 %v881_v4, %v880_v11 }
 0x26d   :  { %4439 = vpow2.f32 %v795_v51  ;;  %v887_v0 = vsel %vm178_vm0, %v5117_v36, 0.0  ;;  %v712_v57 = vmax.f32 %v710_v46, %v711_v27  ;;  %v784_v26 = vsub.f32 %v5028_v41, %v768_v56 }
 0x26e   :  { %4441 = vpow2.f32 %v797_v52  ;;  %v883_v59 = vrot.slane %v882_v32, 2  ;;  %v888_v54 = vrot.slane %v887_v0, 4  ;;  %v811_v40 = vmul.f32 1.442695, %v782_v5 }
 0x26f   :  { %v776_v60 = vsub.f32 %v5105_v22, %v712_v57  ;;  %v878_v34 = vrot.slane %v877_v33, 1  ;;  %v894_v62 = vsel %vm178_vm0, %v5122_v9, 0.0  ;;  %v813_v18 = vmul.f32 1.442695, %v783_v47 }
 0x270   :  { %v884_v35 = vadd.f32 %v883_v59, %v882_v32  ;;  %v889_v1 = vadd.f32 %v888_v54, %v887_v0  ;;  %v895_v41 = vrot.slane %v894_v62, 4  ;;  %v5149_v2 = vrot.slane %v136_v58, %v4928_v25 }
 0x271   :  { %v799_v3 = vmul.f32 1.442695, %v776_v60  ;;  %v815_v11 = vmul.f32 1.442695, %v784_v26  ;;  %v901_v30 = vsel %vm178_vm0, %v5126_v21, 0.0  ;;  %v879_v4 = vadd.f32 %v878_v34, %v877_v33 }
 0x272   :  { %v885_v55 = vrot.slane %v884_v35, 1  ;;  %v890_v5 = vrot.slane %v889_v1, 2  ;;  %v896_v22 = vadd.f32 %v895_v41, %v894_v62  ;;  %v902_v19 = vrot.slane %v901_v30, 4 }
 0x273   :  { %4443 = vpow2.f32 %v799_v3  ;;  %v5160_v12 = vadd.f32 %v4265_v39, %v5149_v2 }
 0x274   :  { %4445 = vpow2.f32 %v811_v40  ;;  %v5155_v7 = vadd.f32 %v890_v5, %v889_v1  ;;  %v903_v8 = vadd.f32 %v902_v19, %v901_v30  ;;  %v886_v14 = vadd.f32 %v885_v55, %v884_v35 }
 0x275   :  { %v5153_v6 = vpop.eup %4429  ;;  %4447 = vpow2.f32 %v813_v18  ;;  %v897_v20 = vrot.slane %v896_v22, 2 }
 0x276   :  { %v5157_v10 = vpop.eup %4431  ;;  %v817_v13 = vsel %vm178_vm0, %v5153_v6, 0.0  ;;  %4449 = vpow2.f32 %v815_v11  ;;  %v892_v61 = vrot.slane %v5155_v7, 1  ;;  %v904_v44 = vrot.slane %v903_v8, 2 }
 0x277   :  { %v5164_v15 = vpop.eup %4433  ;;  %v818_v16 = vrot.slane %v817_v13, 4  ;;  %v824_v17 = vsel %vm178_vm0, %v5157_v10, 0.0  ;;  %4451 = vrcp.f32 %v879_v4  ;;  %v5187_v34 = vadd.f32 %v897_v20, %v896_v22 }
 0x278   :  { %v5168_v23 = vpop.eup %4435  ;;  %v825_v31 = vrot.slane %v824_v17, 4  ;;  %v831_v42 = vsel %vm178_vm0, %v5164_v15, 0.0  ;;  %4453 = vrcp.f32 %v886_v14  ;;  %v905_v30 = vadd.f32 %v904_v44, %v903_v8 }
 0x279   :  { %v5173_v38 = vpop.eup %4437  ;;  %v819_v43 = vadd.f32 %v818_v16, %v817_v13  ;;  %v832_v63 = vrot.slane %v831_v42, 4  ;;  %v838_v29 = vsel %vm178_vm0, %v5168_v23, 0.0 }
 0x27a   :  { %v5177_v45 = vpop.eup %4439  ;;  %v826_v46 = vadd.f32 %v825_v31, %v824_v17  ;;  %v839_v49 = vrot.slane %v838_v29, 4  ;;  %v845_v50 = vsel %vm178_vm0, %v5173_v38, 0.0 }
 0x27b   :  { %v5181_v51 = vpop.eup %4441  ;;  %v820_v52 = vrot.slane %v819_v43, 2  ;;  %v833_v53 = vadd.f32 %v832_v63, %v831_v42  ;;  %v846_v27 = vrot.slane %v845_v50, 4  ;;  %v852_v56 = vsel %vm178_vm0, %v5177_v45, 0.0 }
 0x27c   :  { %v827_v47 = vrot.slane %v826_v46, 2  ;;  %v840_v33 = vadd.f32 %v839_v49, %v838_v29  ;;  %v853_v32 = vrot.slane %v852_v56, 4  ;;  %v859_v0 = vsel %vm178_vm0, %v5181_v51, 0.0 }
 0x27d   :  { %v821_v57 = vadd.f32 %v820_v52, %v819_v43  ;;  %v834_v26 = vrot.slane %v833_v53, 2  ;;  %v847_v58 = vadd.f32 %v846_v27, %v845_v50  ;;  %v860_v59 = vrot.slane %v859_v0, 4 }
 0x27e   :  { %v828_v54 = vadd.f32 %v827_v47, %v826_v46  ;;  %v841_v40 = vrot.slane %v840_v33, 2  ;;  %v854_v60 = vadd.f32 %v853_v32, %v852_v56  ;;  %v899_v46 = vrot.slane %v5187_v34, 1 }
 0x27f   :  { %v822_v62 = vrot.slane %v821_v57, 1  ;;  %v835_v18 = vadd.f32 %v834_v26, %v833_v53  ;;  %v848_v35 = vrot.slane %v847_v58, 2  ;;  %v861_v1 = vadd.f32 %v860_v59, %v859_v0 }
 0x280   :  { %v829_v41 = vrot.slane %v828_v54, 1  ;;  %v842_v3 = vadd.f32 %v841_v40, %v840_v33  ;;  %v855_v11 = vrot.slane %v854_v60, 2  ;;  %v5189_v39 = vpop.eup %4443  ;;  %v906_v56 = vrot.slane %v905_v30, 1 }
 0x281   :  { %v823_v55 = vadd.f32 %v822_v62, %v821_v57  ;;  %v836_v5 = vrot.slane %v835_v18, 1  ;;  %v849_v19 = vadd.f32 %v848_v35, %v847_v58  ;;  %v862_v4 = vrot.slane %v861_v1, 2  ;;  %v5191_v13 = vpop.eup %4445 }
 0x282   :  { %v830_v14 = vadd.f32 %v829_v41, %v828_v54  ;;  %v843_v16 = vrot.slane %v842_v3, 1  ;;  %v856_v22 = vadd.f32 %v855_v11, %v854_v60  ;;  %v866_v17 = vsel %vm178_vm0, %v5189_v39, 0.0  ;;  %v5195_v20 = vpop.eup %4447 }
 0x283   :  { %v837_v31 = vadd.f32 %v836_v5, %v835_v18  ;;  %v850_v42 = vrot.slane %v849_v19, 1  ;;  %v863_v43 = vadd.f32 %v862_v4, %v861_v1  ;;  %v867_v8 = vrot.slane %v866_v17, 4  ;;  %v5197_v63 = vpop.eup %4449 }
 0x284   :  { %v844_v29 = vadd.f32 %v843_v16, %v842_v3  ;;  %v857_v44 = vrot.slane %v856_v22, 1  ;;  %4455 = vrcp.f32 %v823_v55  ;;  %v4452_v49 = vpop.eup %4451  ;;  %v908_v47 = vsel %vm178_vm0, %v5191_v13, 0.0 }
 0x285   :  { %v851_v50 = vadd.f32 %v850_v42, %v849_v19  ;;  %v864_v52 = vrot.slane %v863_v43, 1  ;;  %v868_v53 = vadd.f32 %v867_v8, %v866_v17  ;;  %4457 = vrcp.f32 %v830_v14  ;;  %v4454_v33 = vpop.eup %4453  ;;  %v452_v19 = vpop.f32.mrf.mxu0 }
 0x286   :  { %v858_v27 = vadd.f32 %v857_v44, %v856_v22  ;;  %4459 = vrcp.f32 %v837_v31  ;;  %v909_v57 = vrot.slane %v908_v47, 4  ;;  %v915_v26 = vsel %vm178_vm0, %v5195_v20, 0.0 }
 0x287   :  { %v865_v32 = vadd.f32 %v864_v52, %v863_v43  ;;  %v869_v0 = vrot.slane %v868_v53, 2  ;;  %4461 = vrcp.f32 %v844_v29  ;;  %v922_v58 = vsel %vm178_vm0, %v5197_v63, 0.0 }
 0x288   :  { %4463 = vrcp.f32 %v851_v50  ;;  %v953_v59 = vmul.f32 %v4452_v49, %v5109_v28  ;;  %v910_v40 = vadd.f32 %v909_v57, %v908_v47  ;;  %v916_v60 = vrot.slane %v915_v26, 4 }
 0x289   :  { %v870_v54 = vadd.f32 %v869_v0, %v868_v53  ;;  %4465 = vrcp.f32 %v858_v27  ;;  %v923_v62 = vrot.slane %v922_v58, 4  ;;  %v954_v18 = vmul.f32 %v4454_v33, %v5111_v37 }
 0x28a   :  { %4467 = vrcp.f32 %v865_v32  ;;  %v969_v35 = vmul.f32 %v953_v59, %v5160_v12  ;;  %v911_v41 = vrot.slane %v910_v40, 2  ;;  %v917_v3 = vadd.f32 %v916_v60, %v915_v26 }
 0x28b   :  { %v871_v1 = vrot.slane %v870_v54, 1  ;;  %v893_v11 = vadd.f32 %v892_v61, %v5155_v7  ;;  %v924_v55 = vadd.f32 %v923_v62, %v922_v58  ;;  %v970_v28 = vmul.f32 %v954_v18, %v5160_v12 }
 0x28c   :  { %v1033_v5 = vsel %vm178_vm0, %v969_v35, 0.0  ;;  %v900_v14 = vadd.f32 %v899_v46, %v5187_v34  ;;  %v912_v16 = vadd.f32 %v911_v41, %v910_v40  ;;  %v918_v37 = vrot.slane %v917_v3, 2 }
 0x28d   :  { %v872_v4 = vadd.f32 %v871_v1, %v870_v54  ;;  %v907_v22 = vadd.f32 %v906_v56, %v905_v30  ;;  %v925_v17 = vrot.slane %v924_v55, 2  ;;  %v1034_v31 = vrot.slane %v1033_v5, 4 }
 0x28e   :  { %v1040_v42 = vsel %vm178_vm0, %v970_v28, 0.0  ;;  %v913_v43 = vrot.slane %v912_v16, 1  ;;  %v919_v8 = vadd.f32 %v918_v37, %v917_v3  ;;  %v5217_v61 = vadd.f32 %v452_v19, %v5149_v2 }
 0x28f   :  { %4469 = vrcp.f32 %v872_v4  ;;  %v1041_v7 = vrot.slane %v1040_v42, 4  ;;  %v926_v29 = vadd.f32 %v925_v17, %v924_v55  ;;  %v1035_v44 = vadd.f32 %v1034_v31, %v1033_v5 }
 0x290   :  { %4471 = vrcp.f32 %v893_v11  ;;  %v914_v50 = vadd.f32 %v913_v43, %v912_v16  ;;  %v920_v34 = vrot.slane %v919_v8, 1 }
 0x291   :  { %v4456_v49 = vpop.eup %4455  ;;  %4473 = vrcp.f32 %v900_v14  ;;  %v1042_v46 = vadd.f32 %v1041_v7, %v1040_v42  ;;  %v927_v53 = vrot.slane %v926_v29, 1  ;;  %v1036_v27 = vrot.slane %v1035_v44, 2 }
 0x292   :  { %v4458_v30 = vpop.eup %4457  ;;  %v945_v52 = vmul.f32 %v4456_v49, %v5153_v6  ;;  %4475 = vrcp.f32 %v907_v22  ;;  %v921_v33 = vadd.f32 %v920_v34, %v919_v8 }
 0x293   :  { %v4460_v56 = vpop.eup %4459  ;;  %v946_v47 = vmul.f32 %v4458_v30, %v5157_v10  ;;  %4477 = vrcp.f32 %v914_v50  ;;  %v1043_v2 = vrot.slane %v1042_v46, 2  ;;  %v928_v26 = vadd.f32 %v927_v53, %v926_v29 }
 0x294   :  { %v4462_v32 = vpop.eup %4461  ;;  %v947_v0 = vmul.f32 %v4460_v56, %v5164_v15  ;;  %v961_v57 = vmul.f32 %v945_v52, %v5217_v61  ;;  %v5223_v58 = vadd.f32 %v1036_v27, %v1035_v44  ;;  %4479 = vrcp.f32 %v921_v33 }
 0x295   :  { %v4464_v59 = vpop.eup %4463  ;;  %v948_v6 = vmul.f32 %v4462_v32, %v5168_v23  ;;  %v962_v54 = vmul.f32 %v946_v47, %v5217_v61  ;;  %v5227_v40 = vadd.f32 %v1043_v2, %v1042_v46  ;;  %4481 = vrcp.f32 %v928_v26 }
 0x296   :  { %v4466_v10 = vpop.eup %4465  ;;  %v949_v60 = vmul.f32 %v4464_v59, %v5173_v38  ;;  %v963_v62 = vmul.f32 %v947_v0, %v5217_v61  ;;  %v977_v15 = vsel %vm178_vm0, %v961_v57, 0.0 }
 0x297   :  { %v4468_v18 = vpop.eup %4467  ;;  %v950_v35 = vmul.f32 %v4466_v10, %v5177_v45  ;;  %v964_v1 = vmul.f32 %v948_v6, %v5217_v61  ;;  %v978_v41 = vrot.slane %v977_v15, 4  ;;  %v984_v23 = vsel %vm178_vm0, %v962_v54, 0.0 }
 0x298   :  { %v951_v3 = vmul.f32 %v4468_v18, %v5181_v51  ;;  %v965_v11 = vmul.f32 %v949_v60, %v5217_v61  ;;  %v985_v55 = vrot.slane %v984_v23, 4  ;;  %v991_v38 = vsel %vm178_vm0, %v963_v62, 0.0 }
 0x299   :  { %v966_v28 = vmul.f32 %v950_v35, %v5217_v61  ;;  %v979_v5 = vadd.f32 %v978_v41, %v977_v15  ;;  %v992_v19 = vrot.slane %v991_v38, 4  ;;  %v998_v4 = vsel %vm178_vm0, %v964_v1, 0.0 }
 0x29a   :  { %v967_v45 = vmul.f32 %v951_v3, %v5217_v61  ;;  %v986_v14 = vadd.f32 %v985_v55, %v984_v23  ;;  %v999_v16 = vrot.slane %v998_v4, 4  ;;  %v1005_v37 = vsel %vm178_vm0, %v965_v11, 0.0 }
 0x29b   :  { %v980_v22 = vrot.slane %v979_v5, 2  ;;  %v993_v17 = vadd.f32 %v992_v19, %v991_v38  ;;  %v1006_v51 = vrot.slane %v1005_v37, 4  ;;  %v1012_v31 = vsel %vm178_vm0, %v966_v28, 0.0 }
 0x29c   :  { %v4470_v42 = vpop.eup %4469  ;;  %v987_v43 = vrot.slane %v986_v14, 2  ;;  %v1000_v8 = vadd.f32 %v999_v16, %v998_v4  ;;  %v1013_v7 = vrot.slane %v1012_v31, 4  ;;  %v1019_v29 = vsel %vm178_vm0, %v967_v45, 0.0 }
 0x29d   :  { %v4472_v44 = vpop.eup %4471  ;;  %v952_v49 = vmul.f32 %v4470_v42, %v5189_v39  ;;  %v981_v50 = vadd.f32 %v980_v22, %v979_v5  ;;  %v994_v34 = vrot.slane %v993_v17, 2  ;;  %v1007_v46 = vadd.f32 %v1006_v51, %v1005_v37 }
 0x29e   :  { %v4474_v30 = vpop.eup %4473  ;;  %v988_v52 = vadd.f32 %v987_v43, %v986_v14  ;;  %v1001_v53 = vrot.slane %v1000_v8, 2  ;;  %v1014_v27 = vadd.f32 %v1013_v7, %v1012_v31  ;;  %v1020_v56 = vrot.slane %v1019_v29, 4 }
 0x29f   :  { %v4476_v47 = vpop.eup %4475  ;;  %v968_v33 = vmul.f32 %v952_v49, %v5217_v61  ;;  %v982_v2 = vrot.slane %v981_v50, 1  ;;  %v995_v32 = vadd.f32 %v994_v34, %v993_v17  ;;  %v1008_v0 = vrot.slane %v1007_v46, 2 }
 0x2a0   :  { %v4478_v57 = vpop.eup %4477  ;;  %v989_v26 = vrot.slane %v988_v52, 1  ;;  %v1002_v39 = vadd.f32 %v1001_v53, %v1000_v8  ;;  %v1015_v59 = vrot.slane %v1014_v27, 2  ;;  %v1021_v6 = vadd.f32 %v1020_v56, %v1019_v29 }
 0x2a1   :  { %v983_v54 = vadd.f32 %v982_v2, %v981_v50  ;;  %v996_v10 = vrot.slane %v995_v32, 1  ;;  %v1009_v60 = vadd.f32 %v1008_v0, %v1007_v46  ;;  %v1026_v62 = vsel %vm178_vm0, %v968_v33, 0.0  ;;  %v4480_v15 = vpop.eup %4479 }
 0x2a2   :  { %v990_v18 = vadd.f32 %v989_v26, %v988_v52  ;;  %v1003_v35 = vrot.slane %v1002_v39, 1  ;;  %v1016_v1 = vadd.f32 %v1015_v59, %v1014_v27  ;;  %v1022_v61 = vrot.slane %v1021_v6, 2  ;;  %v4482_v41 = vpop.eup %4481 }
 0x2a3   :  { %v997_v23 = vadd.f32 %v996_v10, %v995_v32  ;;  %v1010_v3 = vrot.slane %v1009_v60, 1  ;;  %v1027_v11 = vrot.slane %v1026_v62, 4  ;;  %v955_v55 = vmul.f32 %v4472_v44, %v5117_v36 }
 0x2a4   :  { %v1004_v38 = vadd.f32 %v1003_v35, %v1002_v39  ;;  %v1017_v28 = vrot.slane %v1016_v1, 1  ;;  %v1023_v5 = vadd.f32 %v1022_v61, %v1021_v6  ;;  %v1110_v19 = vsel %vm1109_vm1, %v990_v18, %v983_v54 }
 0x2a5   :  { %v1011_v4 = vadd.f32 %v1010_v3, %v1009_v60  ;;  %v1028_v45 = vadd.f32 %v1027_v11, %v1026_v62  ;;  %v1112_v14 = vsel %vm1111_vm2, %v997_v23, %v1110_v19  ;;  %v956_v16 = vmul.f32 %v4474_v30, %v5122_v9 }
 0x2a6   :  { %v1018_v37 = vadd.f32 %v1017_v28, %v1016_v1  ;;  %v1024_v22 = vrot.slane %v1023_v5, 1  ;;  %v1114_v17 = vsel %vm1113_vm3, %v1004_v38, %v1112_v14  ;;  %v957_v51 = vmul.f32 %v4476_v47, %v5126_v21 }
 0x2a7   :  { %v1029_v31 = vrot.slane %v1028_v45, 2  ;;  %v1116_v36 = vsel %vm1115_vm4, %v1011_v4, %v1114_v17  ;;  %v958_v42 = vmul.f32 %v4478_v57, %v5191_v13  ;;  %v959_v43 = vmul.f32 %v4480_v15, %v5195_v20 }
 0x2a8   :  { %v1025_v8 = vadd.f32 %v1024_v22, %v1023_v5  ;;  %v1118_v7 = vsel %vm1117_vm5, %v1018_v37, %v1116_v36  ;;  %v960_v29 = vmul.f32 %v4482_v41, %v5197_v63  ;;  %v971_v9 = vmul.f32 %v955_v55, %v5160_v12 }
 0x2a9   :  { %v1030_v44 = vadd.f32 %v1029_v31, %v1028_v45  ;;  %v972_v49 = vmul.f32 %v956_v16, %v5160_v12  ;;  %v973_v50 = vmul.f32 %v957_v51, %v5160_v12  ;;  %v974_v21 = vmul.f32 %v958_v42, %v5160_v12 }
 0x2aa   :  { %v1120_v34 = vsel %vm1119_vm6, %v1025_v8, %v1118_v7  ;;  %v975_v13 = vmul.f32 %v959_v43, %v5160_v12  ;;  %v976_v46 = vmul.f32 %v960_v29, %v5160_v12  ;;  %v1047_v30 = vsel %vm178_vm0, %v971_v9, 0.0 }
 0x2ab   :  { %v1031_v20 = vrot.slane %v1030_v44, 1  ;;  %v1054_v63 = vsel %vm178_vm0, %v972_v49, 0.0  ;;  %v1038_v52 = vrot.slane %v5223_v58, 1  ;;  %v1048_v53 = vrot.slane %v1047_v30, 4 }
 0x2ac   :  { %v1055_v27 = vrot.slane %v1054_v63, 4  ;;  %v1061_v56 = vsel %vm178_vm0, %v973_v50, 0.0  ;;  %v1045_v33 = vrot.slane %v5227_v40, 1  ;;  %v1068_v32 = vsel %vm178_vm0, %v974_v21, 0.0  ;;  %v143_v50 = vld [vmem:[%s6258_s10] sm:$0x7] }
 0x2ad   :  { %v1032_v47 = vadd.f32 %v1031_v20, %v1030_v44  ;;  %v1062_v2 = vrot.slane %v1061_v56, 4  ;;  %v1049_v0 = vadd.f32 %v1048_v53, %v1047_v30  ;;  %v1069_v26 = vrot.slane %v1068_v32, 4 }
 0x2ae   :  { %v1056_v57 = vadd.f32 %v1055_v27, %v1054_v63  ;;  %v1075_v12 = vsel %vm178_vm0, %v975_v13, 0.0  ;;  %v1082_v54 = vsel %vm178_vm0, %v976_v46, 0.0  ;;  %v1046_v18 = vadd.f32 %v1045_v33, %v5227_v40  ;;  %v4659_v46 = vld [vmem:[#allocation2 + $0x8] sm:$0xff] }
 0x2af   :  { %v1122_v39 = vsel %vm1121_vm7, %v1032_v47, %v1120_v34  ;;  %v1063_v59 = vadd.f32 %v1062_v2, %v1061_v56  ;;  %v1076_v6 = vrot.slane %v1075_v12, 4  ;;  %v1050_v10 = vrot.slane %v1049_v0, 2 }
 0x2b0   :  { %4270 = vmatprep.mubr.msk.f32.mxu1 %vm178_vm0, %v1122_v39  ;;  %v1057_v60 = vrot.slane %v1056_v57, 2  ;;  %v1070_v62 = vadd.f32 %v1069_v26, %v1068_v32  ;;  %v1083_v15 = vrot.slane %v1082_v54, 4  ;;  %v1039_v11 = vadd.f32 %v1038_v52, %v5223_v58  ;;  %v4660_v52 = vld [vmem:[#allocation2] sm:$0xff] }
 0x2b1   :  { %v1064_v35 = vrot.slane %v1063_v59, 2  ;;  %v1077_v1 = vadd.f32 %v1076_v6, %v1075_v12  ;;  %v1051_v61 = vadd.f32 %v1050_v10, %v1049_v0  ;;  %v1092_v21 = vrot.slane %v143_v50, %v4928_v25  ;;  %v147_v6 = vld [vmem:[%s6261_s13 + $0x8] sm:$0xff] }
 0x2b2   :  { %v1058_v41 = vadd.f32 %v1057_v60, %v1056_v57  ;;  %v1071_v23 = vrot.slane %v1070_v62, 2  ;;  %v1084_v3 = vadd.f32 %v1083_v15, %v1082_v54  ;;  %v1123_v16 = vsel %vm1109_vm1, %v1046_v18, %v1039_v11  ;;  %v146_v54 = vld [vmem:[%s6261_s13] sm:$0xff]  ;;  %4273 = vmatprep.subr.mxu0 %v147_v6 }
 0x2b3   :  { %v1065_v55 = vadd.f32 %v1064_v35, %v1063_v59  ;;  %v1078_v38 = vrot.slane %v1077_v1, 2  ;;  %v1052_v28 = vrot.slane %v1051_v61, 1  ;;  %4274 = vmatpush3.msra.mxu0 %v147_v6 }
 0x2b4   :  { %v1059_v5 = vrot.slane %v1058_v41, 1  ;;  %v1072_v19 = vadd.f32 %v1071_v23, %v1070_v62  ;;  %v1085_v4 = vrot.slane %v1084_v3, 2  ;;  %4275 = vmatprep.subr.mxu0 %v146_v54  ;;  %v145_v23 = vld [vmem:[%s6260_s12] sm:$0x7] }
 0x2b5   :  { %v1066_v45 = vrot.slane %v1065_v55, 1  ;;  %v1079_v14 = vadd.f32 %v1078_v38, %v1077_v1  ;;  %v1053_v37 = vadd.f32 %v1052_v28, %v1051_v61  ;;  %4276 = vmatpush3.msra.mxu0 %v146_v54  ;;  %v144_v1 = vld [vmem:[#allocation8] sm:$0x7]  ;;  %v1246_v28 = vrot.slane %v145_v23, %v4928_v25 }
 0x2b6   :  { %v1060_v40 = vadd.f32 %v1059_v5, %v1058_v41  ;;  %v1073_v22 = vrot.slane %v1072_v19, 1  ;;  %v1086_v17 = vadd.f32 %v1085_v4, %v1084_v3  ;;  %v1240_v41 = vrot.slane %v144_v1, %v4928_v25 }
 0x2b7   :  { %v1080_v51 = vrot.slane %v1079_v14, 1  ;;  %v1067_v31 = vadd.f32 %v1066_v45, %v1065_v55  ;;  %v1124_v42 = vsel %vm1111_vm2, %v1053_v37, %v1123_v16  ;;  %v160_v45 = vld [vmem:[%s6263_s15 + $0x38] sm:$0xff]  ;;  %v158_v16 = vld [vmem:[%s6263_s15 + $0x28] sm:$0xff]  ;;  %v157_v37 = vld [vmem:[%s6263_s15 + $0x20] sm:$0xff] }
 0x2b8   :  { %v1087_v36 = vrot.slane %v1086_v17, 1  ;;  %v1074_v58 = vadd.f32 %v1073_v22, %v1072_v19  ;;  %v1125_v43 = vsel %vm1113_vm3, %v1060_v40, %v1124_v42  ;;  %4280 = vmatprep.subr.mxu1 %v160_v45  ;;  %v156_v40 = vld [vmem:[%s6263_s15 + $0x18] sm:$0xff]  ;;  %v155_v22 = vld [vmem:[%s6263_s15 + $0x10] sm:$0xff] }
 0x2b9   :  { %v1081_v8 = vadd.f32 %v1080_v51, %v1079_v14  ;;  %v1126_v7 = vsel %vm1115_vm4, %v1067_v31, %v1125_v43  ;;  %v159_v14 = vld [vmem:[%s6263_s15 + $0x30] sm:$0xff]  ;;  %v153_v51 = vld [vmem:[%s6263_s15] sm:$0xff] }
 0x2ba   :  { %v1088_v29 = vadd.f32 %v1087_v36, %v1086_v17  ;;  %v1127_v9 = vsel %vm1117_vm5, %v1074_v58, %v1126_v7  ;;  %v154_v17 = vld [vmem:[%s6263_s15 + $0x8] sm:$0xff]  ;;  %v152_v31 = vld [vmem:[%s6262_s14] sm:$0x7] }
 0x2bb   :  { %v1128_v44 = vsel %vm1119_vm6, %v1081_v8, %v1127_v9  ;;  %v1252_v36 = vrot.slane %v152_v31, %v4928_v25 }
 0x2bc   :  { %v1129_v49 = vsel %vm1121_vm7, %v1088_v29, %v1128_v44 }
 0x2bd   :  { %4271 = vmatmul.mubr.msk.f32.vlgmr.msra.gmra.mxu1 %vm178_vm0, %v1129_v49 }
 0x2be   :  { %4281 = vmatpush3.msra.mxu1 %v160_v45 }
 0x2bf   :  { %4282 = vmatprep.subr.mxu1 %v159_v14 }
 0x2c0   :  { %4283 = vmatpush3.msra.mxu1 %v159_v14 }
 0x2c1   :  { %4284 = vmatprep.subr.mxu1 %v158_v16 }
 0x2c2   :  { %4285 = vmatpush3.msra.mxu1 %v158_v16 }
 0x2c3   :  { %4286 = vmatprep.subr.mxu1 %v157_v37 }
 0x2c4   :  { %4287 = vmatpush3.msra.mxu1 %v157_v37 }
 0x2c5   :  { %4288 = vmatprep.subr.mxu1 %v156_v40 }
 0x2c6   :  { %4289 = vmatpush3.msra.mxu1 %v156_v40 }
 0x2c7   :  { %4290 = vmatprep.subr.mxu1 %v155_v22 }
 0x2c8   :  { %4291 = vmatpush3.msra.mxu1 %v155_v22  ;;  %v177_v22 = vld [vmem:[%s6264_s16] sm:$0x7] }
 0x2c9   :  { %4292 = vmatprep.subr.mxu1 %v154_v17 }
 0x2ca   :  { %4293 = vmatpush3.msra.mxu1 %v154_v17  ;;  %v1391_v17 = vrot.slane %v177_v22, %v4928_v25 }
 0x2cb   :  { %4294 = vmatprep.subr.mxu1 %v153_v51 }
 0x2cc   :  { %4295 = vmatpush3.msra.mxu1 %v153_v51 }
 0x37d   :  { %v4272_v34 = vpop.f32.mrf.mxu1 }
 0x37e   :  { %v1206_v13 = vadd.f32 %v4272_v34, %v1092_v21 }
 0x37f   :  { %v1200_v20 = vpop.f32.mrf.mxu1 }
 0x380   :  { %v5289_v30 = vadd.f32 %v4659_v46, %v1206_v13  ;;  %v1201_v63 = vadd.f32 %v1200_v20, %v1092_v21 }
 0x382   :  { %v5291_v53 = vadd.f32 %v4660_v52, %v1201_v63  ;;  %v1214_v27 = vsel %vm178_vm0, %v5289_v30, 0.0 }
 0x383   :  { %1215 = vadd.xlane.f32.xlu1 %v1214_v27 }
 0x384   :  { %v1211_v56 = vsel %vm178_vm0, %v5291_v53, 0.0 }
 0x385   :  { %1212 = vadd.xlane.f32.xlu0 %v1211_v56 }
 0x40c   :  { %v1216_v47 = vpop.xlane.xlu1 %1215 }
 0x40d   :  { %v1218_v33 = vmul.f32 0.0625, %v1216_v47 }
 0x40e   :  { %v1213_v2 = vpop.xlane.xlu0 %1212 }
 0x40f   :  { %v1220_v32 = vsub.f32 %v5289_v30, %v1218_v33  ;;  %v1217_v0 = vmul.f32 0.0625, %v1213_v2 }
 0x411   :  { %v1219_v57 = vsub.f32 %v5291_v53, %v1217_v0  ;;  %v1222_v26 = vmul.f32 %v1220_v32, %v1220_v32 }
 0x413   :  { %v1226_v12 = vsel %vm178_vm0, %v1222_v26, 0.0  ;;  %v1221_v39 = vmul.f32 %v1219_v57, %v1219_v57 }
 0x414   :  { %1227 = vadd.xlane.f32.xlu1 %v1226_v12 }
 0x415   :  { %v1223_v59 = vsel %vm178_vm0, %v1221_v39, 0.0 }
 0x416   :  { %1224 = vadd.xlane.f32.xlu0 %v1223_v59 }
 0x49d   :  { %v1228_v10 = vpop.xlane.xlu1 %1227 }
 0x49e   :  { %v1230_v60 = vmul.f32 0.0625, %v1228_v10 }
 0x49f   :  { %v1225_v62 = vpop.xlane.xlu0 %1224 }
 0x4a0   :  { %v1232_v15 = vadd.f32 1e-05, %v1230_v60  ;;  %v1229_v18 = vmul.f32 0.0625, %v1225_v62 }
 0x4a2   :  { %4483 = vrsqrt.f32 %v1232_v15  ;;  %v1231_v35 = vadd.f32 1e-05, %v1229_v18 }
 0x4a4   :  { %4485 = vrsqrt.f32 %v1231_v35 }
 0x4af   :  { %v4484_v61 = vpop.eup %4483 }
 0x4b0   :  { %v1236_v3 = vmul.f32 %v4484_v61, %v1220_v32 }
 0x4b1   :  { %v4486_v11 = vpop.eup %4485 }
 0x4b2   :  { %v1235_v55 = vmul.f32 %v4486_v11, %v1219_v57  ;;  %v1242_v38 = vmul.f32 %v1240_v41, %v1236_v3 }
 0x4b4   :  { %v1241_v5 = vmul.f32 %v1240_v41, %v1235_v55  ;;  %v1248_v4 = vadd.f32 %v1246_v28, %v1242_v38 }
 0x4b6   :  { %v1247_v19 = vadd.f32 %v1246_v28, %v1241_v5 }
 0x4b8   :  { %4277 = vmatprep.mubr.msk.f32.mxu0 %vm178_vm0, %v1247_v19 }
 0x4b9   :  { %4278 = vmatmul.mubr.msk.f32.vlgmr.msra.gmra.mxu0 %vm178_vm0, %v1248_v4 }
 0x579   :  { %v4279_v42 = vpop.f32.mrf.mxu0 }
 0x57a   :  { %v1331_v58 = vadd.f32 %v4279_v42, %v1252_v36 }
 0x57b   :  { %v1325_v43 = vpop.f32.mrf.mxu0 }
 0x57c   :  { %v1337_v8 = vmul.f32 0.70710677, %v1331_v58  ;;  %v1326_v7 = vadd.f32 %v1325_v43, %v1252_v36  ;;  %v1335_v16 = vmul.f32 0.5, %v1331_v58 }
 0x57e   :  { %v1339_v29 = vand.u32 2147483647, %v1337_v8  ;;  %v1336_v9 = vmul.f32 0.70710677, %v1326_v7  ;;  %vm1379_vm8 = vcmp.ge.f32.partialorder %v1337_v8, 0.0  ;;  %v1334_v45 = vmul.f32 0.5, %v1326_v7 }
 0x580   :  { %v1341_v44 = vmul.f32 0.3275911, %v1339_v29  ;;  %v1338_v49 = vand.u32 2147483647, %v1336_v9  ;;  %v1367_v13 = vsub.f32 0.0, %v1339_v29  ;;  %vm1378_vm9 = vcmp.ge.f32.partialorder %v1336_v9, 0.0 }
 0x582   :  { %v1343_v50 = vadd.f32 1.0, %v1341_v44  ;;  %v1340_v21 = vmul.f32 0.3275911, %v1338_v49  ;;  %v1366_v20 = vsub.f32 0.0, %v1338_v49  ;;  %v1369_v46 = vmul.f32 %v1367_v13, %v1339_v29 }
 0x584   :  { %4487 = vrcp.f32 %v1343_v50  ;;  %v1342_v34 = vadd.f32 1.0, %v1340_v21  ;;  %v1368_v52 = vmul.f32 %v1366_v20, %v1338_v49  ;;  %v1372_v56 = vmul.f32 1.442695, %v1369_v46  ;;  %v119_v20 = vld [vmem:[%s6276_s28 + $0x18] sm:$0xff]  ;;  %v118_v46 = vld [vmem:[%s6276_s28 + $0x10] sm:$0xff] }
 0x585   :  { %4299 = vmatprep.subr.mxu0 %v119_v20 }
 0x586   :  { %4489 = vrcp.f32 %v1342_v34  ;;  %v1370_v32 = vmul.f32 1.442695, %v1368_v52  ;;  %4300 = vmatpush3.msra.mxu0 %v119_v20 }
 0x587   :  { %4491 = vpow2.f32 %v1372_v56  ;;  %4301 = vmatprep.subr.mxu0 %v118_v46 }
 0x588   :  { %4493 = vpow2.f32 %v1370_v32  ;;  %4302 = vmatpush3.msra.mxu0 %v118_v46  ;;  %v5372_v32 = vsub.s32 1, %v4925_v24 }
 0x591   :  { %v4488_v63 = vpop.eup %4487 }
 0x592   :  { %v1349_v27 = vmul.f32 1.0614054, %v4488_v63 }
 0x593   :  { %v4490_v47 = vpop.eup %4489 }
 0x594   :  { %v1351_v33 = vadd.f32 -1.4531521, %v1349_v27  ;;  %v1348_v2 = vmul.f32 1.0614054, %v4490_v47  ;;  %v4492_v35 = vpop.eup %4491 }
 0x595   :  { %v4494_v23 = vpop.eup %4493 }
 0x596   :  { %v1353_v0 = vmul.f32 %v4488_v63, %v1351_v33  ;;  %v1350_v57 = vadd.f32 -1.4531521, %v1348_v2 }
 0x598   :  { %v1355_v26 = vadd.f32 1.4214138, %v1353_v0  ;;  %v1352_v12 = vmul.f32 %v4490_v47, %v1350_v57  ;;  %v4661_v57 = vld [vmem:[#allocation5] sm:$0x7] }
 0x59a   :  { %v1357_v39 = vmul.f32 %v4488_v63, %v1355_v26  ;;  %v1354_v59 = vadd.f32 1.4214138, %v1352_v12  ;;  %v1505_v26 = vrot.slane %v4661_v57, %v5372_v32 }
 0x59c   :  { %v1359_v6 = vadd.f32 -0.28449672, %v1357_v39  ;;  %v1356_v54 = vmul.f32 %v4490_v47, %v1354_v59 }
 0x59e   :  { %v1361_v10 = vmul.f32 %v4488_v63, %v1359_v6  ;;  %v1358_v60 = vadd.f32 -0.28449672, %v1356_v54  ;;  %v4662_v54 = vld [vmem:[#allocation7] sm:$0x7] }
 0x5a0   :  { %v1363_v62 = vadd.f32 0.2548296, %v1361_v10  ;;  %v1360_v15 = vmul.f32 %v4490_v47, %v1358_v60  ;;  %v1511_v10 = vrot.slane %v4662_v54, %v5372_v32 }
 0x5a2   :  { %v1365_v18 = vmul.f32 %v4488_v63, %v1363_v62  ;;  %v1362_v1 = vadd.f32 0.2548296, %v1360_v15  ;;  %v126_v63 = vld [vmem:[%s6253_s5 + $0x18] sm:$0xff] }
 0x5a3   :  { %4306 = vmatprep.subr.mxu0 %v126_v63 }
 0x5a4   :  { %v1375_v61 = vmul.f32 %v4492_v35, %v1365_v18  ;;  %v1364_v41 = vmul.f32 %v4490_v47, %v1362_v1  ;;  %v125_v18 = vld [vmem:[%s6253_s5 + $0x10] sm:$0xff]  ;;  %v133_v35 = vld [vmem:[%s6255_s7 + $0x18] sm:$0xff] }
 0x5a5   :  { %v132_v1 = vld [vmem:[%s6255_s7 + $0x10] sm:$0xff] }
 0x5a6   :  { %v1377_v3 = vsub.f32 1.0, %v1375_v61  ;;  %v1374_v11 = vmul.f32 %v4494_v23, %v1364_v41  ;;  %v140_v61 = vld [vmem:[%s6257_s9 + $0x18] sm:$0xff]  ;;  %v139_v41 = vld [vmem:[%s6257_s9 + $0x10] sm:$0xff]  ;;  %v4663_v23 = vld [vmem:[%s6252_s4] sm:$0x7] }
 0x5a8   :  { %v1381_v55 = vsub.f32 0.0, %v1377_v3  ;;  %v1376_v38 = vsub.f32 1.0, %v1374_v11 }
 0x5aa   :  { %v1383_v28 = vsel %vm1379_vm8, %v1377_v3, %v1381_v55  ;;  %v1380_v5 = vsub.f32 0.0, %v1376_v38  ;;  %v1517_v3 = vrot.slane %v4663_v23, %v5372_v32 }
 0x5ab   :  { %v1385_v19 = vadd.f32 1.0, %v1383_v28 }
 0x5ac   :  { %v1382_v4 = vsel %vm1378_vm9, %v1376_v38, %v1380_v5 }
 0x5ad   :  { %v1384_v14 = vadd.f32 1.0, %v1382_v4  ;;  %v1387_v40 = vmul.f32 %v1385_v19, %v1335_v16 }
 0x5af   :  { %v1386_v37 = vmul.f32 %v1384_v14, %v1334_v45 }
 0x5b1   :  { %4296 = vmatprep.mubr.msk.f32.mxu1 %vm1392_vm10, %v1386_v37 }
 0x5b2   :  { %4297 = vmatmul.mubr.msk.f32.vlgmr.msra.gmra.mxu1 %vm1392_vm10, %v1387_v40  ;;  %v4664_v40 = vld [vmem:[%s6254_s6] sm:$0x7] }
 0x5b3   :  { %v5409_v22 = vrot.slane %v4664_v40, %v5372_v32 }
 0x672   :  { %v4298_v51 = vpop.f32.mrf.mxu1 }
 0x673   :  { %v1471_v31 = vadd.f32 %v4298_v51, %v1391_v17 }
 0x674   :  { %v1465_v36 = vpop.f32.mrf.mxu1 }
 0x675   :  { %v5349_v42 = vadd.f32 %v1471_v31, %v5289_v30  ;;  %v1466_v58 = vadd.f32 %v1465_v36, %v1391_v17 }
 0x677   :  { %v5352_v43 = vadd.f32 %v1466_v58, %v5291_v53  ;;  %v1479_v8 = vsel %vm178_vm0, %v5349_v42, 0.0 }
 0x678   :  { %1480 = vadd.xlane.f32.xlu1 %v1479_v8 }
 0x679   :  { %v1476_v7 = vsel %vm178_vm0, %v5352_v43, 0.0 }
 0x67a   :  { %1477 = vadd.xlane.f32.xlu0 %v1476_v7 }
 0x701   :  { %v1481_v29 = vpop.xlane.xlu1 %1480 }
 0x702   :  { %v1483_v9 = vmul.f32 0.0625, %v1481_v29 }
 0x703   :  { %v1478_v44 = vpop.xlane.xlu0 %1477 }
 0x704   :  { %v1485_v49 = vsub.f32 %v5349_v42, %v1483_v9  ;;  %v1482_v50 = vmul.f32 0.0625, %v1478_v44 }
 0x706   :  { %v1484_v30 = vsub.f32 %v5352_v43, %v1482_v50  ;;  %v1487_v21 = vmul.f32 %v1485_v49, %v1485_v49 }
 0x708   :  { %v1491_v53 = vsel %vm178_vm0, %v1487_v21, 0.0  ;;  %v1486_v34 = vmul.f32 %v1484_v30, %v1484_v30 }
 0x709   :  { %1492 = vadd.xlane.f32.xlu1 %v1491_v53 }
 0x70a   :  { %v1488_v13 = vsel %vm178_vm0, %v1486_v34, 0.0 }
 0x70b   :  { %1489 = vadd.xlane.f32.xlu0 %v1488_v13 }
 0x792   :  { %v1493_v52 = vpop.xlane.xlu1 %1492 }
 0x793   :  { %v1495_v27 = vmul.f32 0.0625, %v1493_v52 }
 0x794   :  { %v1490_v56 = vpop.xlane.xlu0 %1489 }
 0x795   :  { %v1497_v47 = vadd.f32 1e-05, %v1495_v27  ;;  %v1494_v33 = vmul.f32 0.0625, %v1490_v56 }
 0x797   :  { %4495 = vrsqrt.f32 %v1497_v47  ;;  %v1496_v2 = vadd.f32 1e-05, %v1494_v33 }
 0x799   :  { %4497 = vrsqrt.f32 %v1496_v2 }
 0x7a4   :  { %v4496_v0 = vpop.eup %4495 }
 0x7a5   :  { %v1501_v12 = vmul.f32 %v4496_v0, %v1485_v49 }
 0x7a6   :  { %v4498_v39 = vpop.eup %4497 }
 0x7a7   :  { %v1500_v59 = vmul.f32 %v4498_v39, %v1484_v30  ;;  %v1507_v6 = vmul.f32 %v1505_v26, %v1501_v12 }
 0x7a9   :  { %v1506_v60 = vmul.f32 %v1505_v26, %v1500_v59  ;;  %v1513_v15 = vadd.f32 %v1511_v10, %v1507_v6 }
 0x7ab   :  { %v1512_v62 = vadd.f32 %v1511_v10, %v1506_v60 }
 0x7ad   :  { %4303 = vmatprep.mubr.msk.f32.mxu0 %vm178_vm0, %v1512_v62 }
 0x7ae   :  { %4304 = vmatmul.mubr.msk.f32.vlgmr.msra.gmra.mxu0 %vm178_vm0, %v1513_v15 }
 0x7af   :  { %4307 = vmatpush3.msra.mxu0 %v126_v63  ;;  %4310 = vmatprep.mubr.msk.f32.mxu0 %vm178_vm0, %v1512_v62 }
 0x7b0   :  { %4308 = vmatprep.subr.mxu0 %v125_v18 }
 0x7b1   :  { %4309 = vmatpush3.msra.mxu0 %v125_v18 }
 0x7b2   :  { %4311 = vmatmul.mubr.msk.f32.vlgmr.msra.gmra.mxu0 %vm178_vm0, %v1513_v15  ;;  %4313 = vmatprep.subr.mxu0 %v133_v35 }
 0x7b3   :  { %4314 = vmatpush3.msra.mxu0 %v133_v35  ;;  %4317 = vmatprep.mubr.msk.f32.mxu0 %vm178_vm0, %v1512_v62 }
 0x7b4   :  { %4315 = vmatprep.subr.mxu0 %v132_v1 }
 0x7b5   :  { %4316 = vmatpush3.msra.mxu0 %v132_v1 }
 0x7b6   :  { %4318 = vmatmul.mubr.msk.f32.vlgmr.msra.gmra.mxu0 %vm178_vm0, %v1513_v15  ;;  %4320 = vmatprep.subr.mxu0 %v140_v61 }
 0x7b7   :  { %4321 = vmatpush3.msra.mxu0 %v140_v61 }
 0x7b8   :  { %4322 = vmatprep.subr.mxu0 %v139_v41 }
 0x7b9   :  { %4323 = vmatpush3.msra.mxu0 %v139_v41 }
 0x86e   :  { %v4305_v11 = vpop.f32.mrf.mxu0 }
 0x86f   :  { %v1596_v55 = vadd.f32 %v4305_v11, %v1517_v3 }
 0x870   :  { %v1590_v38 = vpop.f32.mrf.mxu0 }
 0x871   :  { %v1808_v28 = vcombine.high %v1596_v55, %v1596_v55  ;;  %v1815_v5 = vrot.slane %v1596_v55, %v4958_v48  ;;  %v1591_v19 = vadd.f32 %v1590_v38, %v1517_v3 }
 0x872   :  { %v4312_v58 = vpop.f32.mrf.mxu0 }
 0x873   :  { %v1822_v4 = vrot.slane %v1808_v28, %v4958_v48  ;;  %v1823_v45 = vcombine.high %v1815_v5, %v1815_v5  ;;  %v1831_v14 = vrot.slane %v1815_v5, %v4958_v48  ;;  %v1759_v16 = vcombine.high %v1591_v19, %v1591_v19 }
 0x874   :  { %v1766_v37 = vrot.slane %v1591_v19, %v4958_v48  ;;  %v1675_v53 = vadd.f32 %v4312_v58, %v5409_v22 }
 0x875   :  { %v1824_v17 = vcombine.high %v1822_v4, %v1822_v4  ;;  %v1838_v51 = vrot.slane %v1822_v4, %v4958_v48  ;;  %v1845_v31 = vrot.slane %v1823_v45, %v4958_v48  ;;  %v1853_v36 = vcombine.high %v1831_v14, %v1831_v14 }
 0x876   :  { %v1773_v8 = vrot.slane %v1759_v16, %v4958_v48  ;;  %v1774_v7 = vcombine.high %v1766_v37, %v1766_v37  ;;  %v5415_v29 = vrot.slane %v1766_v37, %v4958_v48  ;;  %v1892_v50 = vrot.slane %v1831_v14, %v4928_v25 }
 0x877   :  { %v1852_v9 = vrot.slane %v1824_v17, %v4958_v48  ;;  %v1854_v44 = vcombine.high %v1838_v51, %v1838_v51  ;;  %v1855_v49 = vcombine.high %v1845_v31, %v1845_v31  ;;  %v1896_v13 = vrot.slane %v1845_v31, %v4928_v25 }
 0x878   :  { %v1775_v30 = vcombine.high %v1773_v8, %v1773_v8  ;;  %v5420_v21 = vrot.slane %v1773_v8, %v4958_v48  ;;  %v1900_v20 = vrot.slane %v1853_v36, %v4928_v25  ;;  %v1908_v46 = vrot.slane %v1838_v51, %v4928_v25 }
 0x879   :  { %v1856_v34 = vcombine.high %v1852_v9, %v1852_v9  ;;  %v1904_v63 = vrot.slane %v1855_v49, %v4928_v25  ;;  %v5428_v52 = vrot.slane %v1774_v7, %v4958_v48  ;;  %v1804_v56 = vcombine.high %v5415_v29, %v5415_v29 }
 0x87a   :  { %v5431_v27 = vrot.slane %v1775_v30, %v4958_v48  ;;  %v1912_v47 = vrot.slane %v1852_v9, %v4928_v25  ;;  %v1916_v33 = vrot.slane %v1854_v44, %v4928_v25  ;;  %v5438_v0 = vmul.f32 %v1892_v50, %v1675_v53 }
 0x87b   :  { %v1920_v2 = vrot.slane %v1856_v34, %v4928_v25  ;;  %v1805_v57 = vcombine.high %v5420_v21, %v5420_v21  ;;  %v1806_v26 = vcombine.high %v5428_v52, %v5428_v52  ;;  %v1860_v12 = vrot.slane %v5415_v29, %v4928_v25 }
 0x87c   :  { %v1876_v39 = vrot.slane %v5420_v21, %v4928_v25  ;;  %v1807_v59 = vcombine.high %v5431_v27, %v5431_v27  ;;  %v1864_v6 = vrot.slane %v5428_v52, %v4928_v25  ;;  %v5452_v54 = vmul.f32 %v1896_v13, %v1675_v53 }
 0x87d   :  { %v5454_v10 = vmul.f32 %v1900_v20, %v1675_v53  ;;  %v5457_v60 = vrot.slane %v1804_v56, %v4928_v25  ;;  %v1880_v62 = vrot.slane %v5431_v27, %v4928_v25  ;;  %v5461_v15 = vmul.f32 %v1904_v63, %v1675_v53 }
 0x87e   :  { %v5463_v18 = vmul.f32 %v1908_v46, %v1675_v53  ;;  %v5465_v35 = vmul.f32 %v1912_v47, %v1675_v53  ;;  %v5467_v1 = vmul.f32 %v1916_v33, %v1675_v53  ;;  %v5469_v61 = vmul.f32 %v1920_v2, %v1675_v53 }
 0x87f   :  { %v2009_v41 = vsel %vm178_vm0, %v5438_v0, -inf  ;;  %v2016_v3 = vsel %vm178_vm0, %v5452_v54, -inf  ;;  %v2023_v11 = vsel %vm178_vm0, %v5454_v10, -inf  ;;  %v2030_v55 = vsel %vm178_vm0, %v5461_v15, -inf }
 0x880   :  { %v2010_v23 = vrot.slane %v2009_v41, 4  ;;  %v2017_v38 = vrot.slane %v2016_v3, 4  ;;  %v2024_v28 = vrot.slane %v2023_v11, 4  ;;  %v2031_v5 = vrot.slane %v2030_v55, 4 }
 0x881   :  { %v2037_v19 = vsel %vm178_vm0, %v5463_v18, -inf  ;;  %v2044_v14 = vsel %vm178_vm0, %v5465_v35, -inf  ;;  %v2051_v16 = vsel %vm178_vm0, %v5467_v1, -inf  ;;  %v2058_v8 = vsel %vm178_vm0, %v5469_v61, -inf }
 0x882   :  { %v2011_v4 = vmax.f32 %v2009_v41, %v2010_v23  ;;  %v2038_v45 = vrot.slane %v2037_v19, 4  ;;  %v2018_v37 = vmax.f32 %v2016_v3, %v2017_v38  ;;  %v2025_v40 = vmax.f32 %v2023_v11, %v2024_v28 }
 0x883   :  { %v2032_v17 = vmax.f32 %v2030_v55, %v2031_v5  ;;  %v2045_v51 = vrot.slane %v2044_v14, 4  ;;  %v2052_v58 = vrot.slane %v2051_v16, 4  ;;  %v2059_v34 = vrot.slane %v2058_v8, 4 }
 0x884   :  { %v2012_v31 = vrot.slane %v2011_v4, 2  ;;  %v2039_v36 = vmax.f32 %v2037_v19, %v2038_v45  ;;  %v2019_v7 = vrot.slane %v2018_v37, 2  ;;  %v2026_v9 = vrot.slane %v2025_v40, 2 }
 0x885   :  { %v2033_v44 = vrot.slane %v2032_v17, 2  ;;  %v2046_v49 = vmax.f32 %v2044_v14, %v2045_v51  ;;  %v2053_v53 = vmax.f32 %v2051_v16, %v2052_v58  ;;  %v2060_v2 = vmax.f32 %v2058_v8, %v2059_v34  ;;  %v1669_v16 = vpop.f32.mrf.mxu0 }
 0x886   :  { %v2013_v50 = vmax.f32 %v2011_v4, %v2012_v31  ;;  %v2040_v30 = vrot.slane %v2039_v36, 2  ;;  %v2020_v13 = vmax.f32 %v2018_v37, %v2019_v7  ;;  %v2027_v20 = vmax.f32 %v2025_v40, %v2026_v9 }
 0x887   :  { %v2034_v46 = vmax.f32 %v2032_v17, %v2033_v44  ;;  %v2047_v63 = vrot.slane %v2046_v49, 2  ;;  %v2054_v33 = vrot.slane %v2053_v53, 2  ;;  %v1884_v55 = vrot.slane %v1805_v57, %v4928_v25 }
 0x888   :  { %v2014_v56 = vrot.slane %v2013_v50, 1  ;;  %v2041_v47 = vmax.f32 %v2039_v36, %v2040_v30  ;;  %v2021_v41 = vrot.slane %v2020_v13, 1  ;;  %v2028_v23 = vrot.slane %v2027_v20, 1 }
 0x889   :  { %v2035_v3 = vrot.slane %v2034_v46, 1  ;;  %v2048_v11 = vmax.f32 %v2046_v49, %v2047_v63  ;;  %v2055_v5 = vmax.f32 %v2053_v53, %v2054_v33  ;;  %v2061_v17 = vrot.slane %v2060_v2, 2 }
 0x88a   :  { %v2015_v38 = vmax.f32 %v2013_v50, %v2014_v56  ;;  %v2042_v28 = vrot.slane %v2041_v47, 1  ;;  %v2022_v19 = vmax.f32 %v2020_v13, %v2021_v41  ;;  %v2029_v4 = vmax.f32 %v2027_v20, %v2028_v23 }
 0x88b   :  { %v2036_v45 = vmax.f32 %v2034_v46, %v2035_v3  ;;  %v2049_v14 = vrot.slane %v2048_v11, 1  ;;  %v2056_v40 = vrot.slane %v2055_v5, 1  ;;  %v1872_v8 = vrot.slane %v1806_v26, %v4928_v25 }
 0x88c   :  { %v2043_v37 = vmax.f32 %v2041_v47, %v2042_v28  ;;  %v2073_v51 = vsub.f32 %v5438_v0, %v2015_v38  ;;  %v2074_v36 = vsub.f32 %v5452_v54, %v2022_v19  ;;  %v2075_v58 = vsub.f32 %v5454_v10, %v2029_v4 }
 0x88d   :  { %v2050_v31 = vmax.f32 %v2048_v11, %v2049_v14  ;;  %v2076_v57 = vsub.f32 %v5461_v15, %v2036_v45  ;;  %v5496_v7 = vmax.f32 %v2055_v5, %v2056_v40  ;;  %v1670_v44 = vadd.f32 %v1669_v16, %v5409_v22 }
 0x88e   :  { %v2097_v9 = vmul.f32 1.442695, %v2073_v51  ;;  %v2077_v49 = vsub.f32 %v5463_v18, %v2043_v37  ;;  %v2099_v50 = vmul.f32 1.442695, %v2074_v36  ;;  %v2101_v54 = vmul.f32 1.442695, %v2075_v58 }
 0x88f   :  { %v2078_v0 = vsub.f32 %v5465_v35, %v2050_v31  ;;  %v1888_v10 = vrot.slane %v1807_v59, %v4928_v25  ;;  %v5505_v15 = vmax.f32 %v2060_v2, %v2061_v17  ;;  %v5510_v26 = vmul.f32 %v1860_v12, %v1670_v44 }
 0x890   :  { %4499 = vpow2.f32 %v2097_v9  ;;  %v2103_v22 = vmul.f32 1.442695, %v2076_v57  ;;  %v5515_v18 = vmul.f32 %v1864_v6, %v1670_v44  ;;  %v5518_v35 = vmul.f32 %v5457_v60, %v1670_v44 }
 0x891   :  { %4501 = vpow2.f32 %v2099_v50  ;;  %v2079_v59 = vsub.f32 %v5467_v1, %v5496_v7  ;;  %v5522_v30 = vmul.f32 %v1872_v8, %v1670_v44  ;;  %v5527_v29 = vmul.f32 %v1876_v39, %v1670_v44  ;;  %v4665_v1 = vld [vmem:[%s6256_s8] sm:$0x7] }
 0x892   :  { %4503 = vpow2.f32 %v2101_v54  ;;  %v2105_v12 = vmul.f32 1.442695, %v2077_v49  ;;  %v2107_v53 = vmul.f32 1.442695, %v2078_v0  ;;  %v5532_v52 = vmul.f32 %v1880_v62, %v1670_v44 }
 0x893   :  { %v5534_v6 = vmul.f32 %v1884_v55, %v1670_v44  ;;  %v5536_v60 = vmul.f32 %v1888_v10, %v1670_v44  ;;  %v1953_v34 = vsel %vm178_vm0, %v5510_v26, -inf  ;;  %v1960_v13 = vsel %vm178_vm0, %v5515_v18, -inf }
 0x894   :  { %v1967_v21 = vsel %vm178_vm0, %v5518_v35, -inf  ;;  %4505 = vpow2.f32 %v2103_v22  ;;  %v1954_v39 = vrot.slane %v1953_v34, 4  ;;  %v1961_v20 = vrot.slane %v1960_v13, 4 }
 0x895   :  { %v1968_v46 = vrot.slane %v1967_v21, 4  ;;  %v1974_v27 = vsel %vm178_vm0, %v5522_v30, -inf  ;;  %v1981_v62 = vsel %vm178_vm0, %v5527_v29, -inf  ;;  %v1988_v63 = vsel %vm178_vm0, %v5532_v52, -inf }
 0x896   :  { %v1995_v56 = vsel %vm178_vm0, %v5534_v6, -inf  ;;  %v1955_v47 = vmax.f32 %v1953_v34, %v1954_v39  ;;  %v1962_v33 = vmax.f32 %v1960_v13, %v1961_v20  ;;  %v1975_v41 = vrot.slane %v1974_v27, 4 }
 0x897   :  { %v1969_v2 = vmax.f32 %v1967_v21, %v1968_v46  ;;  %v1982_v23 = vrot.slane %v1981_v62, 4  ;;  %v1989_v3 = vrot.slane %v1988_v63, 4  ;;  %v1996_v11 = vrot.slane %v1995_v56, 4 }
 0x898   :  { %v2002_v55 = vsel %vm178_vm0, %v5536_v60, -inf  ;;  %v1956_v38 = vrot.slane %v1955_v47, 2  ;;  %v1963_v28 = vrot.slane %v1962_v33, 2  ;;  %v1976_v19 = vmax.f32 %v1974_v27, %v1975_v41 }
 0x899   :  { %v1970_v5 = vrot.slane %v1969_v2, 2  ;;  %v1983_v4 = vmax.f32 %v1981_v62, %v1982_v23  ;;  %v1990_v45 = vmax.f32 %v1988_v63, %v1989_v3  ;;  %v1997_v14 = vmax.f32 %v1995_v56, %v1996_v11 }
 0x89a   :  { %v2003_v16 = vrot.slane %v2002_v55, 4  ;;  %v1957_v37 = vmax.f32 %v1955_v47, %v1956_v38  ;;  %v1964_v40 = vmax.f32 %v1962_v33, %v1963_v28  ;;  %v1977_v51 = vrot.slane %v1976_v19, 2 }
 0x89b   :  { %v1971_v17 = vmax.f32 %v1969_v2, %v1970_v5  ;;  %4507 = vpow2.f32 %v2105_v12  ;;  %v1984_v31 = vrot.slane %v1983_v4, 2  ;;  %v1991_v36 = vrot.slane %v1990_v45, 2 }
 0x89c   :  { %v1998_v58 = vrot.slane %v1997_v14, 2  ;;  %v1958_v8 = vrot.slane %v1957_v37, 1  ;;  %v1965_v9 = vrot.slane %v1964_v40, 1  ;;  %v1978_v49 = vmax.f32 %v1976_v19, %v1977_v51 }
 0x89d   :  { %v5554_v57 = vpop.eup %4499  ;;  %v1972_v44 = vrot.slane %v1971_v17, 1  ;;  %v1985_v54 = vmax.f32 %v1983_v4, %v1984_v31  ;;  %v1992_v10 = vmax.f32 %v1990_v45, %v1991_v36  ;;  %v2004_v22 = vmax.f32 %v2002_v55, %v2003_v16 }
 0x89e   :  { %v5556_v0 = vpop.eup %4501  ;;  %v2169_v50 = vsel %vm178_vm0, %v5554_v57, 0.0  ;;  %v1959_v21 = vmax.f32 %v1957_v37, %v1958_v8  ;;  %v1966_v39 = vmax.f32 %v1964_v40, %v1965_v9  ;;  %4509 = vpow2.f32 %v2107_v53 }
 0x89f   :  { %v5560_v34 = vpop.eup %4503  ;;  %v2170_v12 = vrot.slane %v2169_v50, 4  ;;  %v2176_v13 = vsel %vm178_vm0, %v5556_v0, 0.0  ;;  %v1973_v46 = vmax.f32 %v1971_v17, %v1972_v44  ;;  %v1979_v27 = vrot.slane %v1978_v49, 1 }
 0x8a0   :  { %v2177_v20 = vrot.slane %v2176_v13, 4  ;;  %v2183_v62 = vsel %vm178_vm0, %v5560_v34, 0.0  ;;  %v1986_v63 = vrot.slane %v1985_v54, 1  ;;  %v1993_v56 = vrot.slane %v1992_v10, 1 }
 0x8a1   :  { %v1999_v47 = vmax.f32 %v1997_v14, %v1998_v58  ;;  %v5566_v33 = vpop.eup %4505  ;;  %v2171_v2 = vadd.f32 %v2170_v12, %v2169_v50  ;;  %v1980_v41 = vmax.f32 %v1978_v49, %v1979_v27  ;;  %v2005_v23 = vrot.slane %v2004_v22, 2 }
 0x8a2   :  { %v2065_v3 = vsub.f32 %v5510_v26, %v1959_v21  ;;  %v1987_v11 = vmax.f32 %v1985_v54, %v1986_v63  ;;  %v1994_v55 = vmax.f32 %v1992_v10, %v1993_v56  ;;  %v2066_v53 = vsub.f32 %v5515_v18, %v1966_v39 }
 0x8a3   :  { %v2067_v38 = vsub.f32 %v5518_v35, %v1973_v46  ;;  %v2178_v28 = vadd.f32 %v2177_v20, %v2176_v13  ;;  %v2184_v5 = vrot.slane %v2183_v62, 4  ;;  %v2068_v19 = vsub.f32 %v5522_v30, %v1980_v41 }
 0x8a4   :  { %v2081_v4 = vmul.f32 1.442695, %v2065_v3  ;;  %v2069_v45 = vsub.f32 %v5527_v29, %v1987_v11  ;;  %v2070_v14 = vsub.f32 %v5532_v52, %v1994_v55  ;;  %v2083_v16 = vmul.f32 1.442695, %v2066_v53 }
 0x8a5   :  { %v2085_v37 = vmul.f32 1.442695, %v2067_v38  ;;  %v2087_v40 = vmul.f32 1.442695, %v2068_v19  ;;  %v2000_v26 = vrot.slane %v1999_v47, 1  ;;  %v2006_v17 = vmax.f32 %v2004_v22, %v2005_v23  ;;  %v4319_v23 = vpop.f32.mrf.mxu0 }
 0x8a6   :  { %4511 = vpow2.f32 %v2081_v4  ;;  %v2089_v51 = vmul.f32 1.442695, %v2069_v45  ;;  %v2091_v18 = vmul.f32 1.442695, %v2070_v14  ;;  %v2063_v35 = vrot.slane %v5505_v15, 1 }
 0x8a7   :  { %4513 = vpow2.f32 %v2083_v16  ;;  %v2001_v31 = vmax.f32 %v1999_v47, %v2000_v26  ;;  %v2007_v36 = vrot.slane %v2006_v17, 1  ;;  %v2172_v30 = vrot.slane %v2171_v2, 2 }
 0x8a8   :  { %4515 = vpow2.f32 %v2085_v37  ;;  %v5575_v58 = vpop.eup %4507  ;;  %v2064_v29 = vmax.f32 %v5505_v15, %v2063_v35  ;;  %v2179_v52 = vrot.slane %v2178_v28, 2  ;;  %v2185_v8 = vadd.f32 %v2184_v5, %v2183_v62 }
 0x8a9   :  { %4517 = vpow2.f32 %v2087_v40  ;;  %v2008_v9 = vmax.f32 %v2006_v17, %v2007_v36  ;;  %v2071_v44 = vsub.f32 %v5534_v6, %v2001_v31  ;;  %v2173_v49 = vadd.f32 %v2172_v30, %v2171_v2 }
 0x8aa   :  { %4519 = vpow2.f32 %v2089_v51  ;;  %v2080_v50 = vsub.f32 %v5469_v61, %v2064_v29  ;;  %v2180_v54 = vadd.f32 %v2179_v52, %v2178_v28  ;;  %v2186_v10 = vrot.slane %v2185_v8, 2 }
 0x8ab   :  { %4521 = vpow2.f32 %v2091_v18  ;;  %v2072_v22 = vsub.f32 %v5536_v60, %v2008_v9  ;;  %v2093_v12 = vmul.f32 1.442695, %v2071_v44  ;;  %v2174_v13 = vrot.slane %v2173_v49, 1  ;;  %v5581_v21 = vpop.eup %4509 }
 0x8ac   :  { %v2181_v39 = vrot.slane %v2180_v54, 1  ;;  %v2187_v15 = vadd.f32 %v2186_v10, %v2185_v8  ;;  %v2190_v20 = vsel %vm178_vm0, %v5566_v33, 0.0  ;;  %v2109_v6 = vmul.f32 1.442695, %v2079_v59 }
 0x8ad   :  { %4523 = vpow2.f32 %v2093_v12  ;;  %v2095_v46 = vmul.f32 1.442695, %v2072_v22  ;;  %v2191_v61 = vrot.slane %v2190_v20, 4  ;;  %v2111_v27 = vmul.f32 1.442695, %v2080_v50 }
 0x8ae   :  { %v2175_v62 = vadd.f32 %v2174_v13, %v2173_v49  ;;  %v2188_v63 = vrot.slane %v2187_v15, 1  ;;  %v2197_v60 = vsel %vm178_vm0, %v5575_v58, 0.0  ;;  %v2204_v2 = vsel %vm178_vm0, %v5581_v21, 0.0 }
 0x8af   :  { %4525 = vpow2.f32 %v2095_v46  ;;  %v2192_v56 = vadd.f32 %v2191_v61, %v2190_v20  ;;  %v2198_v47 = vrot.slane %v2197_v60, 4  ;;  %v5596_v7 = vrot.slane %v4665_v1, %v5372_v32 }
 0x8b0   :  { %v2182_v59 = vadd.f32 %v2181_v39, %v2180_v54  ;;  %v2205_v41 = vrot.slane %v2204_v2, 4  ;;  %4527 = vpow2.f32 %v2109_v6  ;;  %v2189_v3 = vadd.f32 %v2188_v63, %v2187_v15 }
 0x8b1   :  { %v2193_v11 = vrot.slane %v2192_v56, 2  ;;  %v2199_v55 = vadd.f32 %v2198_v47, %v2197_v60  ;;  %4529 = vpow2.f32 %v2111_v27  ;;  %v5609_v37 = vadd.f32 %v4319_v23, %v5596_v7 }
 0x8b2   :  { %v2206_v38 = vadd.f32 %v2205_v41, %v2204_v2  ;;  %4531 = vrcp.f32 %v2175_v62 }
 0x8b3   :  { %v5598_v53 = vpop.eup %4511  ;;  %v2194_v19 = vadd.f32 %v2193_v11, %v2192_v56  ;;  %v2200_v4 = vrot.slane %v2199_v55, 2  ;;  %4533 = vrcp.f32 %v2182_v59 }
 0x8b4   :  { %v5600_v28 = vpop.eup %4513  ;;  %v2113_v5 = vsel %vm178_vm0, %v5598_v53, 0.0  ;;  %v2207_v51 = vrot.slane %v2206_v38, 2  ;;  %4535 = vrcp.f32 %v2189_v3 }
 0x8b5   :  { %v5604_v45 = vpop.eup %4515  ;;  %v2114_v14 = vrot.slane %v2113_v5, 4  ;;  %v2120_v16 = vsel %vm178_vm0, %v5600_v28, 0.0  ;;  %v2195_v30 = vrot.slane %v2194_v19, 1  ;;  %v5623_v44 = vadd.f32 %v2200_v4, %v2199_v55 }
 0x8b6   :  { %v5611_v40 = vpop.eup %4517  ;;  %v2121_v26 = vrot.slane %v2120_v16, 4  ;;  %v2127_v17 = vsel %vm178_vm0, %v5604_v45, 0.0  ;;  %v5627_v39 = vadd.f32 %v2207_v51, %v2206_v38 }
 0x8b7   :  { %v5615_v18 = vpop.eup %4519  ;;  %v2115_v35 = vadd.f32 %v2114_v14, %v2113_v5  ;;  %v2128_v31 = vrot.slane %v2127_v17, 4  ;;  %v2134_v36 = vsel %vm178_vm0, %v5611_v40, 0.0  ;;  %v2196_v61 = vadd.f32 %v2195_v30, %v2194_v19 }
 0x8b8   :  { %v5619_v29 = vpop.eup %4521  ;;  %v2122_v52 = vadd.f32 %v2121_v26, %v2120_v16  ;;  %v2135_v8 = vrot.slane %v2134_v36, 4  ;;  %v2141_v9 = vsel %vm178_vm0, %v5615_v18, 0.0 }
 0x8b9   :  { %v2116_v49 = vrot.slane %v2115_v35, 2  ;;  %v2129_v50 = vadd.f32 %v2128_v31, %v2127_v17  ;;  %v2142_v54 = vrot.slane %v2141_v9, 4  ;;  %v2148_v10 = vsel %vm178_vm0, %v5619_v29, 0.0 }
 0x8ba   :  { %v2123_v22 = vrot.slane %v2122_v52, 2  ;;  %v2136_v12 = vadd.f32 %v2135_v8, %v2134_v36  ;;  %v2149_v13 = vrot.slane %v2148_v10, 4  ;;  %v5629_v15 = vpop.eup %4523 }
 0x8bb   :  { %v2117_v20 = vadd.f32 %v2116_v49, %v2115_v35  ;;  %v2130_v6 = vrot.slane %v2129_v50, 2  ;;  %v2143_v46 = vadd.f32 %v2142_v54, %v2141_v9  ;;  %v2155_v60 = vsel %vm178_vm0, %v5629_v15, 0.0 }
 0x8bc   :  { %v2124_v27 = vadd.f32 %v2123_v22, %v2122_v52  ;;  %v2137_v62 = vrot.slane %v2136_v12, 2  ;;  %v2150_v63 = vadd.f32 %v2149_v13, %v2148_v10  ;;  %v5633_v56 = vpop.eup %4525  ;;  %v2156_v59 = vrot.slane %v2155_v60, 4 }
 0x8bd   :  { %v2118_v47 = vrot.slane %v2117_v20, 1  ;;  %v2131_v2 = vadd.f32 %v2130_v6, %v2129_v50  ;;  %v2144_v1 = vrot.slane %v2143_v46, 2  ;;  %v2162_v11 = vsel %vm178_vm0, %v5633_v56, 0.0  ;;  %v5637_v55 = vpop.eup %4527 }
 0x8be   :  { %v2125_v41 = vrot.slane %v2124_v27, 1  ;;  %v2138_v23 = vadd.f32 %v2137_v62, %v2136_v12  ;;  %v2151_v3 = vrot.slane %v2150_v63, 2  ;;  %v2157_v4 = vadd.f32 %v2156_v59, %v2155_v60  ;;  %v5639_v14 = vpop.eup %4529 }
 0x8bf   :  { %v2119_v38 = vadd.f32 %v2118_v47, %v2117_v20  ;;  %v2132_v5 = vrot.slane %v2131_v2, 1  ;;  %v2145_v19 = vadd.f32 %v2144_v1, %v2143_v46  ;;  %v2163_v51 = vrot.slane %v2162_v11, 4  ;;  %v4532_v35 = vpop.eup %4531 }
 0x8c0   :  { %v2126_v16 = vadd.f32 %v2125_v41, %v2124_v27  ;;  %v2139_v26 = vrot.slane %v2138_v23, 1  ;;  %v2152_v17 = vadd.f32 %v2151_v3, %v2150_v63  ;;  %v2158_v30 = vrot.slane %v2157_v4, 2  ;;  %v4534_v52 = vpop.eup %4533 }
 0x8c1   :  { %v2133_v31 = vadd.f32 %v2132_v5, %v2131_v2  ;;  %v2146_v36 = vrot.slane %v2145_v19, 1  ;;  %4537 = vrcp.f32 %v2119_v38  ;;  %v2164_v49 = vadd.f32 %v2163_v51, %v2162_v11  ;;  %v4536_v50 = vpop.eup %4535 }
 0x8c2   :  { %v2140_v8 = vadd.f32 %v2139_v26, %v2138_v23  ;;  %v2153_v9 = vrot.slane %v2152_v17, 1  ;;  %4539 = vrcp.f32 %v2126_v16  ;;  %v2159_v10 = vadd.f32 %v2158_v30, %v2157_v4  ;;  %v1748_v26 = vpop.f32.mrf.mxu0 }
 0x8c3   :  { %v2147_v54 = vadd.f32 %v2146_v36, %v2145_v19  ;;  %4541 = vrcp.f32 %v2133_v31  ;;  %v2202_v22 = vrot.slane %v5623_v44, 1  ;;  %v2165_v13 = vrot.slane %v2164_v49, 2 }
 0x8c4   :  { %v2154_v12 = vadd.f32 %v2153_v9, %v2152_v17  ;;  %4543 = vrcp.f32 %v2140_v8  ;;  %v2209_v20 = vrot.slane %v5627_v39, 1  ;;  %v2160_v6 = vrot.slane %v2159_v10, 1 }
 0x8c5   :  { %4545 = vrcp.f32 %v2147_v54  ;;  %v2211_v46 = vsel %vm178_vm0, %v5637_v55, 0.0  ;;  %v2218_v27 = vsel %vm178_vm0, %v5639_v14, 0.0  ;;  %v2166_v62 = vadd.f32 %v2165_v13, %v2164_v49 }
 0x8c6   :  { %4547 = vrcp.f32 %v2154_v12  ;;  %v2212_v63 = vrot.slane %v2211_v46, 4  ;;  %v2219_v60 = vrot.slane %v2218_v27, 4  ;;  %v2161_v47 = vadd.f32 %v2160_v6, %v2159_v10 }
 0x8c7   :  { %4549 = vrcp.f32 %v2196_v61  ;;  %v2249_v2 = vmul.f32 %v4532_v35, %v5554_v57  ;;  %v2250_v1 = vmul.f32 %v4534_v52, %v5556_v0  ;;  %v2167_v59 = vrot.slane %v2166_v62, 1 }
 0x8c8   :  { %v2203_v41 = vadd.f32 %v2202_v22, %v5623_v44  ;;  %v2213_v23 = vadd.f32 %v2212_v63, %v2211_v46  ;;  %v2220_v3 = vadd.f32 %v2219_v60, %v2218_v27  ;;  %4551 = vrcp.f32 %v2161_v47 }
 0x8c9   :  { %v2251_v11 = vmul.f32 %v4536_v50, %v5560_v34  ;;  %v2265_v38 = vmul.f32 %v2249_v2, %v5609_v37  ;;  %v2266_v5 = vmul.f32 %v2250_v1, %v5609_v37  ;;  %v2168_v19 = vadd.f32 %v2167_v59, %v2166_v62 }
 0x8ca   :  { %v2214_v4 = vrot.slane %v2213_v23, 2  ;;  %v2221_v16 = vrot.slane %v2220_v3, 2  ;;  %v2210_v61 = vadd.f32 %v2209_v20, %v5627_v39  ;;  %v1749_v49 = vadd.f32 %v1748_v26, %v5596_v7 }
 0x8cb   :  { %v2267_v57 = vmul.f32 %v2251_v11, %v5609_v37  ;;  %v2329_v0 = vsel %vm178_vm0, %v2265_v38, 0.0  ;;  %v2336_v44 = vsel %vm178_vm0, %v2266_v5, 0.0  ;;  %4553 = vrcp.f32 %v2168_v19 }
 0x8cc   :  { %v2215_v17 = vadd.f32 %v2214_v4, %v2213_v23  ;;  %v2222_v51 = vadd.f32 %v2221_v16, %v2220_v3  ;;  %v2330_v34 = vrot.slane %v2329_v0, 4  ;;  %4555 = vrcp.f32 %v2203_v41 }
 0x8cd   :  { %v2337_v35 = vrot.slane %v2336_v44, 4  ;;  %v2343_v31 = vsel %vm178_vm0, %v2267_v57, 0.0  ;;  %4557 = vrcp.f32 %v2210_v61 }
 0x8ce   :  { %v4538_v36 = vpop.eup %4537  ;;  %v2216_v30 = vrot.slane %v2215_v17, 1  ;;  %v2223_v52 = vrot.slane %v2222_v51, 1  ;;  %v2331_v8 = vadd.f32 %v2330_v34, %v2329_v0  ;;  %v2344_v39 = vrot.slane %v2343_v31, 4 }
 0x8cf   :  { %v4540_v9 = vpop.eup %4539  ;;  %v2241_v50 = vmul.f32 %v4538_v36, %v5598_v53  ;;  %v5660_v54 = vadd.f32 %v2337_v35, %v2336_v44 }
 0x8d0   :  { %v4542_v10 = vpop.eup %4541  ;;  %v2242_v22 = vmul.f32 %v4540_v9, %v5600_v28  ;;  %v2217_v12 = vadd.f32 %v2216_v30, %v2215_v17  ;;  %v2224_v13 = vadd.f32 %v2223_v52, %v2222_v51  ;;  %v2332_v20 = vrot.slane %v2331_v8, 2 }
 0x8d1   :  { %v4544_v6 = vpop.eup %4543  ;;  %v2243_v46 = vmul.f32 %v4542_v10, %v5604_v45  ;;  %v2257_v27 = vmul.f32 %v2241_v50, %v1749_v49  ;;  %v2339_v62 = vrot.slane %v5660_v54, 2  ;;  %v5665_v63 = vadd.f32 %v2344_v39, %v2343_v31 }
 0x8d2   :  { %v4546_v7 = vpop.eup %4545  ;;  %v2244_v53 = vmul.f32 %v4544_v6, %v5611_v40  ;;  %v2258_v60 = vmul.f32 %v2242_v22, %v1749_v49  ;;  %4559 = vrcp.f32 %v2217_v12  ;;  %v5668_v47 = vadd.f32 %v2332_v20, %v2331_v8 }
 0x8d3   :  { %v4548_v2 = vpop.eup %4547  ;;  %v2245_v28 = vmul.f32 %v4546_v7, %v5615_v18  ;;  %v2259_v1 = vmul.f32 %v2243_v46, %v1749_v49  ;;  %v2273_v59 = vsel %vm178_vm0, %v2257_v27, 0.0  ;;  %4561 = vrcp.f32 %v2224_v13 }
 0x8d4   :  { %v4550_v45 = vpop.eup %4549  ;;  %v2246_v41 = vmul.f32 %v4548_v2, %v5619_v29  ;;  %v2260_v23 = vmul.f32 %v2244_v53, %v1749_v49  ;;  %v2274_v3 = vrot.slane %v2273_v59, 4  ;;  %v2280_v11 = vsel %vm178_vm0, %v2258_v60, 0.0 }
 0x8d5   :  { %v2261_v38 = vmul.f32 %v2245_v28, %v1749_v49  ;;  %v2281_v40 = vrot.slane %v2280_v11, 4  ;;  %v2287_v5 = vsel %vm178_vm0, %v2259_v1, 0.0  ;;  %v5676_v19 = vmul.f32 %v4550_v45, %v5566_v33  ;;  %v4552_v4 = vpop.eup %4551 }
 0x8d6   :  { %v2262_v18 = vmul.f32 %v2246_v41, %v1749_v49  ;;  %v2275_v16 = vadd.f32 %v2274_v3, %v2273_v59  ;;  %v2288_v61 = vrot.slane %v2287_v5, 4  ;;  %v2294_v57 = vsel %vm178_vm0, %v2260_v23, 0.0 }
 0x8d7   :  { %v2247_v0 = vmul.f32 %v4552_v4, %v5629_v15  ;;  %v2282_v29 = vadd.f32 %v2281_v40, %v2280_v11  ;;  %v2295_v44 = vrot.slane %v2294_v57, 4  ;;  %v2301_v26 = vsel %vm178_vm0, %v2261_v38, 0.0 }
 0x8d8   :  { %v2276_v17 = vrot.slane %v2275_v16, 2  ;;  %v2289_v51 = vadd.f32 %v2288_v61, %v2287_v5  ;;  %v2302_v34 = vrot.slane %v2301_v26, 4  ;;  %v2308_v35 = vsel %vm178_vm0, %v2262_v18, 0.0  ;;  %v4554_v31 = vpop.eup %4553 }
 0x8d9   :  { %v2263_v33 = vmul.f32 %v2247_v0, %v1749_v49  ;;  %v2283_v36 = vrot.slane %v2282_v29, 2  ;;  %v2296_v30 = vadd.f32 %v2295_v44, %v2294_v57  ;;  %v2309_v52 = vrot.slane %v2308_v35, 4  ;;  %v4556_v8 = vpop.eup %4555 }
 0x8da   :  { %v2248_v39 = vmul.f32 %v4554_v31, %v5633_v56  ;;  %v2277_v9 = vadd.f32 %v2276_v17, %v2275_v16  ;;  %v2290_v50 = vrot.slane %v2289_v51, 2  ;;  %v2303_v15 = vadd.f32 %v2302_v34, %v2301_v26  ;;  %v4558_v20 = vpop.eup %4557 }
 0x8db   :  { %v2284_v10 = vadd.f32 %v2283_v36, %v2282_v29  ;;  %v2297_v22 = vrot.slane %v2296_v30, 2  ;;  %v2310_v12 = vadd.f32 %v2309_v52, %v2308_v35  ;;  %v2315_v13 = vsel %vm178_vm0, %v2263_v33, 0.0 }
 0x8dc   :  { %v2264_v6 = vmul.f32 %v2248_v39, %v1749_v49  ;;  %v2278_v46 = vrot.slane %v2277_v9, 1  ;;  %v2291_v27 = vadd.f32 %v2290_v50, %v2289_v51  ;;  %v2304_v7 = vrot.slane %v2303_v15, 2 }
 0x8dd   :  { %v2285_v53 = vrot.slane %v2284_v10, 1  ;;  %v2298_v60 = vadd.f32 %v2297_v22, %v2296_v30  ;;  %v2311_v2 = vrot.slane %v2310_v12, 2  ;;  %v2316_v28 = vrot.slane %v2315_v13, 4 }
 0x8de   :  { %v2279_v1 = vadd.f32 %v2278_v46, %v2277_v9  ;;  %v2292_v59 = vrot.slane %v2291_v27, 1  ;;  %v2305_v56 = vadd.f32 %v2304_v7, %v2303_v15  ;;  %v2322_v45 = vsel %vm178_vm0, %v2264_v6, 0.0 }
 0x8df   :  { %v4560_v41 = vpop.eup %4559  ;;  %v2286_v23 = vadd.f32 %v2285_v53, %v2284_v10  ;;  %v2299_v3 = vrot.slane %v2298_v60, 1  ;;  %v2312_v11 = vadd.f32 %v2311_v2, %v2310_v12  ;;  %v2317_v38 = vadd.f32 %v2316_v28, %v2315_v13 }
 0x8e0   :  { %v4562_v40 = vpop.eup %4561  ;;  %v2293_v5 = vadd.f32 %v2292_v59, %v2291_v27  ;;  %v2306_v49 = vrot.slane %v2305_v56, 1  ;;  %v2323_v4 = vrot.slane %v2322_v45, 4  ;;  %v2253_v18 = vmul.f32 %v4556_v8, %v5575_v58 }
 0x8e1   :  { %v2300_v16 = vadd.f32 %v2299_v3, %v2298_v60  ;;  %v2313_v61 = vrot.slane %v2312_v11, 1  ;;  %v2318_v57 = vrot.slane %v2317_v38, 2  ;;  %v2405_v0 = vsel %vm1109_vm1, %v2286_v23, %v2279_v1 }
 0x8e2   :  { %v2307_v29 = vadd.f32 %v2306_v49, %v2305_v56  ;;  %v2324_v44 = vadd.f32 %v2323_v4, %v2322_v45  ;;  %v2406_v26 = vsel %vm1111_vm2, %v2293_v5, %v2405_v0  ;;  %v2254_v17 = vmul.f32 %v4558_v20, %v5581_v21 }
 0x8e3   :  { %v2314_v51 = vadd.f32 %v2313_v61, %v2312_v11  ;;  %v2319_v34 = vadd.f32 %v2318_v57, %v2317_v38  ;;  %v2407_v35 = vsel %vm1113_vm3, %v2300_v16, %v2406_v26  ;;  %v2255_v31 = vmul.f32 %v4560_v41, %v5637_v55 }
 0x8e4   :  { %v2325_v33 = vrot.slane %v2324_v44, 2  ;;  %v2408_v58 = vsel %vm1115_vm4, %v2307_v29, %v2407_v35  ;;  %v2256_v36 = vmul.f32 %v4562_v40, %v5639_v14  ;;  %v2268_v30 = vmul.f32 %v5676_v19, %v5609_v37 }
 0x8e5   :  { %v2320_v52 = vrot.slane %v2319_v34, 1  ;;  %v2409_v8 = vsel %vm1117_vm5, %v2314_v51, %v2408_v58  ;;  %v2269_v39 = vmul.f32 %v2253_v18, %v5609_v37  ;;  %v2270_v21 = vmul.f32 %v2254_v17, %v5609_v37 }
 0x8e6   :  { %v2326_v9 = vadd.f32 %v2325_v33, %v2324_v44  ;;  %v2271_v50 = vmul.f32 %v2255_v31, %v5609_v37  ;;  %v2272_v55 = vmul.f32 %v2256_v36, %v5609_v37  ;;  %v2334_v15 = vrot.slane %v5668_v47, 1 }
 0x8e7   :  { %v2321_v10 = vadd.f32 %v2320_v52, %v2319_v34  ;;  %v2340_v14 = vadd.f32 %v2339_v62, %v5660_v54  ;;  %v2346_v19 = vrot.slane %v5665_v63, 2  ;;  %v2350_v22 = vsel %vm178_vm0, %v2268_v30, 0.0 }
 0x8e8   :  { %v2327_v12 = vrot.slane %v2326_v9, 1  ;;  %v2335_v13 = vadd.f32 %v2334_v15, %v5668_v47  ;;  %v2351_v20 = vrot.slane %v2350_v22, 4  ;;  %v2357_v6 = vsel %vm178_vm0, %v2269_v39, 0.0 }
 0x8e9   :  { %v2410_v46 = vsel %vm1119_vm6, %v2321_v10, %v2409_v8  ;;  %v2341_v37 = vrot.slane %v2340_v14, 1  ;;  %v2347_v27 = vadd.f32 %v2346_v19, %v5665_v63  ;;  %v2358_v7 = vrot.slane %v2357_v6, 4 }
 0x8ea   :  { %v2328_v53 = vadd.f32 %v2327_v12, %v2326_v9  ;;  %v2352_v60 = vadd.f32 %v2351_v20, %v2350_v22  ;;  %v2364_v54 = vsel %vm178_vm0, %v2270_v21, 0.0  ;;  %v2371_v62 = vsel %vm178_vm0, %v2271_v50, 0.0  ;;  %v4666_v50 = vld [vmem:[%s6258_s10] sm:$0x7] }
 0x8eb   :  { %v2342_v2 = vadd.f32 %v2341_v37, %v2340_v14  ;;  %v2348_v28 = vrot.slane %v2347_v27, 1  ;;  %v2359_v1 = vadd.f32 %v2358_v7, %v2357_v6  ;;  %v2365_v59 = vrot.slane %v2364_v54, 4 }
 0x8ec   :  { %v2411_v47 = vsel %vm1121_vm7, %v2328_v53, %v2410_v46  ;;  %v2353_v56 = vrot.slane %v2352_v60, 2  ;;  %v2372_v45 = vrot.slane %v2371_v62, 4  ;;  %v2378_v41 = vsel %vm178_vm0, %v2272_v55, 0.0 }
 0x8ed   :  { %4324 = vmatprep.mubr.msk.f32.mxu0 %vm178_vm0, %v2411_v47  ;;  %v2349_v63 = vadd.f32 %v2348_v28, %v2347_v27  ;;  %v2360_v23 = vrot.slane %v2359_v1, 2  ;;  %v2366_v3 = vadd.f32 %v2365_v59, %v2364_v54  ;;  %v2379_v11 = vrot.slane %v2378_v41, 4 }
 0x8ee   :  { %v2354_v38 = vadd.f32 %v2353_v56, %v2352_v60  ;;  %v2373_v40 = vadd.f32 %v2372_v45, %v2371_v62  ;;  %v2412_v5 = vsel %vm1109_vm1, %v2342_v2, %v2335_v13  ;;  %v2388_v55 = vrot.slane %v4666_v50, %v5372_v32  ;;  %v149_v62 = vld [vmem:[%s6261_s13 + $0x18] sm:$0xff]  ;;  %v148_v2 = vld [vmem:[%s6261_s13 + $0x10] sm:$0xff] }
 0x8ef   :  { %v2361_v49 = vadd.f32 %v2360_v23, %v2359_v1  ;;  %v2367_v4 = vrot.slane %v2366_v3, 2  ;;  %v2380_v18 = vadd.f32 %v2379_v11, %v2378_v41  ;;  %v2413_v44 = vsel %vm1111_vm2, %v2349_v63, %v2412_v5  ;;  %4327 = vmatprep.subr.mxu1 %v149_v62  ;;  %v4667_v63 = vld [vmem:[#allocation8] sm:$0x7]  ;;  %v4668_v5 = vld [vmem:[%s6260_s12] sm:$0x7] }
 0x8f0   :  { %v2355_v16 = vrot.slane %v2354_v38, 1  ;;  %v2374_v61 = vrot.slane %v2373_v40, 2  ;;  %4328 = vmatpush3.msra.mxu1 %v149_v62  ;;  %v2529_v23 = vrot.slane %v4667_v63, %v5372_v32 }
 0x8f1   :  { %v2362_v57 = vrot.slane %v2361_v49, 1  ;;  %v2368_v0 = vadd.f32 %v2367_v4, %v2366_v3  ;;  %v2381_v29 = vrot.slane %v2380_v18, 2  ;;  %4329 = vmatprep.subr.mxu1 %v148_v2 }
 0x8f2   :  { %v2356_v26 = vadd.f32 %v2355_v16, %v2354_v38  ;;  %v2375_v17 = vadd.f32 %v2374_v61, %v2373_v40  ;;  %4330 = vmatpush3.msra.mxu1 %v148_v2  ;;  %v168_v61 = vld [vmem:[%s6263_s15 + $0x78] sm:$0xff] }
 0x8f3   :  { %v2363_v51 = vadd.f32 %v2362_v57, %v2361_v49  ;;  %v2369_v34 = vrot.slane %v2368_v0, 1  ;;  %v2382_v35 = vadd.f32 %v2381_v29, %v2380_v18  ;;  %v2535_v49 = vrot.slane %v4668_v5, %v5372_v32  ;;  %4334 = vmatprep.subr.mxu0 %v168_v61  ;;  %v167_v57 = vld [vmem:[%s6263_s15 + $0x70] sm:$0xff]  ;;  %v165_v29 = vld [vmem:[%s6263_s15 + $0x60] sm:$0xff] }
 0x8f4   :  { %v2376_v31 = vrot.slane %v2375_v17, 1  ;;  %v2414_v33 = vsel %vm1113_vm3, %v2356_v26, %v2413_v44  ;;  %v164_v44 = vld [vmem:[%s6263_s15 + $0x58] sm:$0xff]  ;;  %v163_v26 = vld [vmem:[%s6263_s15 + $0x50] sm:$0xff] }
 0x8f5   :  { %v2370_v58 = vadd.f32 %v2369_v34, %v2368_v0  ;;  %v2383_v36 = vrot.slane %v2382_v35, 1  ;;  %v2415_v30 = vsel %vm1115_vm4, %v2363_v51, %v2414_v33  ;;  %v166_v0 = vld [vmem:[%s6263_s15 + $0x68] sm:$0xff]  ;;  %v161_v51 = vld [vmem:[%s6263_s15 + $0x40] sm:$0xff] }
 0x8f6   :  { %v2377_v52 = vadd.f32 %v2376_v31, %v2375_v17  ;;  %v162_v17 = vld [vmem:[%s6263_s15 + $0x48] sm:$0xff]  ;;  %v4669_v34 = vld [vmem:[%s6262_s14] sm:$0x7] }
 0x8f7   :  { %v2384_v8 = vadd.f32 %v2383_v36, %v2382_v35  ;;  %v2416_v39 = vsel %vm1117_vm5, %v2370_v58, %v2415_v30  ;;  %v2541_v35 = vrot.slane %v4669_v34, %v5372_v32 }
 0x8f8   :  { %v2417_v21 = vsel %vm1119_vm6, %v2377_v52, %v2416_v39 }
 0x8f9   :  { %v2418_v9 = vsel %vm1121_vm7, %v2384_v8, %v2417_v21 }
 0x8fa   :  { %4325 = vmatmul.mubr.msk.f32.vlgmr.msra.gmra.mxu0 %vm178_vm0, %v2418_v9 }
 0x8fb   :  { %4335 = vmatpush3.msra.mxu0 %v168_v61 }
 0x8fc   :  { %4336 = vmatprep.subr.mxu0 %v167_v57 }
 0x8fd   :  { %4337 = vmatpush3.msra.mxu0 %v167_v57 }
 0x8fe   :  { %4338 = vmatprep.subr.mxu0 %v166_v0 }
 0x8ff   :  { %4339 = vmatpush3.msra.mxu0 %v166_v0 }
 0x900   :  { %4340 = vmatprep.subr.mxu0 %v165_v29 }
 0x901   :  { %4341 = vmatpush3.msra.mxu0 %v165_v29 }
 0x902   :  { %4342 = vmatprep.subr.mxu0 %v164_v44 }
 0x903   :  { %4343 = vmatpush3.msra.mxu0 %v164_v44 }
 0x904   :  { %4344 = vmatprep.subr.mxu0 %v163_v26 }
 0x905   :  { %4345 = vmatpush3.msra.mxu0 %v163_v26 }
 0x906   :  { %4346 = vmatprep.subr.mxu0 %v162_v17 }
 0x907   :  { %4347 = vmatpush3.msra.mxu0 %v162_v17  ;;  %v4670_v17 = vld [vmem:[%s6264_s16] sm:$0x7] }
 0x908   :  { %4348 = vmatprep.subr.mxu0 %v161_v51 }
 0x909   :  { %4349 = vmatpush3.msra.mxu0 %v161_v51  ;;  %v2680_v51 = vrot.slane %v4670_v17, %v5372_v32 }
 0x9ba   :  { %v4326_v15 = vpop.f32.mrf.mxu0 }
 0x9bb   :  { %v2495_v10 = vadd.f32 %v4326_v15, %v2388_v55 }
 0x9bc   :  { %v2489_v14 = vpop.f32.mrf.mxu0 }
 0x9bd   :  { %v5728_v19 = vadd.f32 %v2495_v10, %v5349_v42  ;;  %v2490_v22 = vadd.f32 %v2489_v14, %v2388_v55 }
 0x9bf   :  { %v5731_v12 = vadd.f32 %v2490_v22, %v5352_v43  ;;  %v2503_v13 = vsel %vm178_vm0, %v5728_v19, 0.0 }
 0x9c0   :  { %2504 = vadd.xlane.f32.xlu1 %v2503_v13 }
 0x9c1   :  { %v2500_v20 = vsel %vm178_vm0, %v5731_v12, 0.0 }
 0x9c2   :  { %2501 = vadd.xlane.f32.xlu0 %v2500_v20 }
 0xa49   :  { %v2505_v6 = vpop.xlane.xlu1 %2504 }
 0xa4a   :  { %v2507_v46 = vmul.f32 0.0625, %v2505_v6 }
 0xa4b   :  { %v2502_v37 = vpop.xlane.xlu0 %2501 }
 0xa4c   :  { %v2509_v27 = vsub.f32 %v5728_v19, %v2507_v46  ;;  %v2506_v7 = vmul.f32 0.0625, %v2502_v37 }
 0xa4e   :  { %v2508_v42 = vsub.f32 %v5731_v12, %v2506_v7  ;;  %v2511_v53 = vmul.f32 %v2509_v27, %v2509_v27 }
 0xa50   :  { %v2515_v43 = vsel %vm178_vm0, %v2511_v53, 0.0  ;;  %v2510_v60 = vmul.f32 %v2508_v42, %v2508_v42 }
 0xa51   :  { %2516 = vadd.xlane.f32.xlu1 %v2515_v43 }
 0xa52   :  { %v2512_v54 = vsel %vm178_vm0, %v2510_v60, 0.0 }
 0xa53   :  { %2513 = vadd.xlane.f32.xlu0 %v2512_v54 }
 0xada   :  { %v2517_v28 = vpop.xlane.xlu1 %2516 }
 0xadb   :  { %v2519_v1 = vmul.f32 0.0625, %v2517_v28 }
 0xadc   :  { %v2514_v59 = vpop.xlane.xlu0 %2513 }
 0xadd   :  { %v2521_v47 = vadd.f32 1e-05, %v2519_v1  ;;  %v2518_v56 = vmul.f32 0.0625, %v2514_v59 }
 0xadf   :  { %4563 = vrsqrt.f32 %v2521_v47  ;;  %v2520_v45 = vadd.f32 1e-05, %v2518_v56 }
 0xae1   :  { %4565 = vrsqrt.f32 %v2520_v45 }
 0xaec   :  { %v4564_v41 = vpop.eup %4563 }
 0xaed   :  { %v2525_v3 = vmul.f32 %v4564_v41, %v2509_v27 }
 0xaee   :  { %v4566_v11 = vpop.eup %4565 }
 0xaef   :  { %v2524_v38 = vmul.f32 %v4566_v11, %v2508_v42  ;;  %v2531_v40 = vmul.f32 %v2529_v23, %v2525_v3 }
 0xaf1   :  { %v2530_v4 = vmul.f32 %v2529_v23, %v2524_v38  ;;  %v2537_v16 = vadd.f32 %v2535_v49, %v2531_v40 }
 0xaf3   :  { %v2536_v18 = vadd.f32 %v2535_v49, %v2530_v4 }
 0xaf5   :  { %4331 = vmatprep.mubr.msk.f32.mxu1 %vm178_vm0, %v2536_v18 }
 0xaf6   :  { %4332 = vmatmul.mubr.msk.f32.vlgmr.msra.gmra.mxu1 %vm178_vm0, %v2537_v16 }
 0xbb6   :  { %v4333_v31 = vpop.f32.mrf.mxu1 }
 0xbb7   :  { %v2620_v33 = vadd.f32 %v4333_v31, %v2541_v35 }
 0xbb8   :  { %v2614_v58 = vpop.f32.mrf.mxu1 }
 0xbb9   :  { %v2626_v36 = vmul.f32 0.70710677, %v2620_v33  ;;  %v2615_v30 = vadd.f32 %v2614_v58, %v2541_v35  ;;  %v2624_v29 = vmul.f32 0.5, %v2620_v33 }
 0xbbb   :  { %v2628_v52 = vand.u32 2147483647, %v2626_v36  ;;  %v2625_v8 = vmul.f32 0.70710677, %v2615_v30  ;;  %vm2668_vm11 = vcmp.ge.f32.partialorder %v2626_v36, 0.0  ;;  %v2623_v57 = vmul.f32 0.5, %v2615_v30 }
 0xbbd   :  { %v2630_v39 = vmul.f32 0.3275911, %v2628_v52  ;;  %v2627_v21 = vand.u32 2147483647, %v2625_v8  ;;  %v2656_v15 = vsub.f32 0.0, %v2628_v52  ;;  %vm2667_vm12 = vcmp.ge.f32.partialorder %v2625_v8, 0.0 }
 0xbbf   :  { %v2632_v9 = vadd.f32 1.0, %v2630_v39  ;;  %v2629_v50 = vmul.f32 0.3275911, %v2627_v21  ;;  %v2655_v10 = vsub.f32 0.0, %v2627_v21  ;;  %v2658_v14 = vmul.f32 %v2656_v15, %v2628_v52 }
 0xbc1   :  { %4567 = vrcp.f32 %v2632_v9  ;;  %v2631_v55 = vadd.f32 1.0, %v2629_v50  ;;  %v2657_v13 = vmul.f32 %v2655_v10, %v2627_v21  ;;  %v2661_v6 = vmul.f32 1.442695, %v2658_v14  ;;  %v121_v10 = vld [vmem:[%s6276_s28 + $0x28] sm:$0xff]  ;;  %v120_v14 = vld [vmem:[%s6276_s28 + $0x20] sm:$0xff] }
 0xbc2   :  { %4353 = vmatprep.subr.mxu1 %v121_v10 }
 0xbc3   :  { %4569 = vrcp.f32 %v2631_v55  ;;  %v2659_v7 = vmul.f32 1.442695, %v2657_v13  ;;  %4354 = vmatpush3.msra.mxu1 %v121_v10 }
 0xbc4   :  { %4571 = vpow2.f32 %v2661_v6  ;;  %4355 = vmatprep.subr.mxu1 %v120_v14 }
 0xbc5   :  { %4573 = vpow2.f32 %v2659_v7  ;;  %4356 = vmatpush3.msra.mxu1 %v120_v14  ;;  %v5812_v7 = vsub.s32 2, %v4925_v24  ;;  %v127_v24 = vld [vmem:[%s6253_s5 + $0x20] sm:$0xff] }
 0xbce   :  { %v4568_v22 = vpop.eup %4567 }
 0xbcf   :  { %v2638_v20 = vmul.f32 1.0614054, %v4568_v22 }
 0xbd0   :  { %v4570_v46 = vpop.eup %4569 }
 0xbd1   :  { %v2640_v37 = vadd.f32 -1.4531521, %v2638_v20  ;;  %v2637_v27 = vmul.f32 1.0614054, %v4570_v46  ;;  %v4572_v41 = vpop.eup %4571 }
 0xbd2   :  { %v4574_v11 = vpop.eup %4573 }
 0xbd3   :  { %v2642_v42 = vmul.f32 %v4568_v22, %v2640_v37  ;;  %v2639_v53 = vadd.f32 -1.4531521, %v2637_v27 }
 0xbd5   :  { %v2644_v43 = vadd.f32 1.4214138, %v2642_v42  ;;  %v2641_v60 = vmul.f32 %v4570_v46, %v2639_v53  ;;  %v4671_v53 = vld [vmem:[#allocation5] sm:$0x7] }
 0xbd7   :  { %v2646_v54 = vmul.f32 %v4568_v22, %v2644_v43  ;;  %v2643_v62 = vadd.f32 1.4214138, %v2641_v60  ;;  %v2793_v43 = vrot.slane %v4671_v53, %v5812_v7 }
 0xbd9   :  { %v2648_v2 = vadd.f32 -0.28449672, %v2646_v54  ;;  %v2645_v28 = vmul.f32 %v4570_v46, %v2643_v62 }
 0xbdb   :  { %v2650_v1 = vmul.f32 %v4568_v22, %v2648_v2  ;;  %v2647_v59 = vadd.f32 -0.28449672, %v2645_v28  ;;  %v4672_v28 = vld [vmem:[#allocation7] sm:$0x7] }
 0xbdd   :  { %v2652_v47 = vadd.f32 0.2548296, %v2650_v1  ;;  %v2649_v56 = vmul.f32 %v4570_v46, %v2647_v59  ;;  %v2799_v1 = vrot.slane %v4672_v28, %v5812_v7 }
 0xbdf   :  { %v2654_v45 = vmul.f32 %v4568_v22, %v2652_v47  ;;  %v2651_v63 = vadd.f32 0.2548296, %v2649_v56  ;;  %v128_v22 = vld [vmem:[%s6253_s5 + $0x28] sm:$0xff] }
 0xbe0   :  { %4360 = vmatprep.subr.mxu1 %v128_v22 }
 0xbe1   :  { %v2664_v23 = vmul.f32 %v4572_v41, %v2654_v45  ;;  %v2653_v3 = vmul.f32 %v4570_v46, %v2651_v63  ;;  %v135_v45 = vld [vmem:[%s6255_s7 + $0x28] sm:$0xff]  ;;  %v134_v41 = vld [vmem:[%s6255_s7 + $0x20] sm:$0xff] }
 0xbe2   :  { %v142_v63 = vld [vmem:[%s6257_s9 + $0x28] sm:$0xff] }
 0xbe3   :  { %v2666_v38 = vsub.f32 1.0, %v2664_v23  ;;  %v2663_v40 = vmul.f32 %v4574_v11, %v2653_v3  ;;  %v141_v23 = vld [vmem:[%s6257_s9 + $0x20] sm:$0xff] }
 0xbe4   :  { %v4673_v3 = vld [vmem:[%s6252_s4] sm:$0x7] }
 0xbe5   :  { %v2670_v5 = vsub.f32 0.0, %v2666_v38  ;;  %v2665_v49 = vsub.f32 1.0, %v2663_v40  ;;  %v2805_v11 = vrot.slane %v4673_v3, %v5812_v7 }
 0xbe7   :  { %v2672_v4 = vsel %vm2668_vm11, %v2666_v38, %v2670_v5  ;;  %v2669_v18 = vsub.f32 0.0, %v2665_v49 }
 0xbe8   :  { %v2674_v16 = vadd.f32 1.0, %v2672_v4 }
 0xbe9   :  { %v2671_v61 = vsel %vm2667_vm12, %v2665_v49, %v2669_v18 }
 0xbea   :  { %v2673_v0 = vadd.f32 1.0, %v2671_v61  ;;  %v2676_v26 = vmul.f32 %v2674_v16, %v2624_v29 }
 0xbec   :  { %v2675_v44 = vmul.f32 %v2673_v0, %v2623_v57 }
 0xbee   :  { %4350 = vmatprep.mubr.msk.f32.mxu0 %vm1392_vm10, %v2675_v44  ;;  %v4674_v44 = vld [vmem:[%s6254_s6] sm:$0x7] }
 0xbef   :  { %4351 = vmatmul.mubr.msk.f32.vlgmr.msra.gmra.mxu0 %vm1392_vm10, %v2676_v26  ;;  %v5849_v26 = vrot.slane %v4674_v44, %v5812_v7 }
 0xcaf   :  { %v4352_v34 = vpop.f32.mrf.mxu0 }
 0xcb0   :  { %v2759_v35 = vadd.f32 %v4352_v34, %v2680_v51 }
 0xcb1   :  { %v2753_v31 = vpop.f32.mrf.mxu0 }
 0xcb2   :  { %v5789_v58 = vadd.f32 %v2759_v35, %v5728_v19  ;;  %v2754_v36 = vadd.f32 %v2753_v31, %v2680_v51 }
 0xcb4   :  { %v5792_v33 = vadd.f32 %v2754_v36, %v5731_v12  ;;  %v2767_v30 = vsel %vm178_vm0, %v5789_v58, 0.0 }
 0xcb5   :  { %2768 = vadd.xlane.f32.xlu1 %v2767_v30 }
 0xcb6   :  { %v2764_v52 = vsel %vm178_vm0, %v5792_v33, 0.0 }
 0xcb7   :  { %2765 = vadd.xlane.f32.xlu0 %v2764_v52 }
 0xd3e   :  { %v2769_v8 = vpop.xlane.xlu1 %2768 }
 0xd3f   :  { %v2771_v32 = vmul.f32 0.0625, %v2769_v8 }
 0xd40   :  { %v2766_v39 = vpop.xlane.xlu0 %2765 }
 0xd41   :  { %v2773_v21 = vsub.f32 %v5789_v58, %v2771_v32  ;;  %v2770_v9 = vmul.f32 0.0625, %v2766_v39 }
 0xd43   :  { %v2772_v19 = vsub.f32 %v5792_v33, %v2770_v9  ;;  %v2775_v50 = vmul.f32 %v2773_v21, %v2773_v21 }
 0xd45   :  { %v2779_v12 = vsel %vm178_vm0, %v2775_v50, 0.0  ;;  %v2774_v55 = vmul.f32 %v2772_v19, %v2772_v19 }
 0xd46   :  { %2780 = vadd.xlane.f32.xlu1 %v2779_v12 }
 0xd47   :  { %v2776_v15 = vsel %vm178_vm0, %v2774_v55, 0.0 }
 0xd48   :  { %2777 = vadd.xlane.f32.xlu0 %v2776_v15 }
 0xdcf   :  { %v2781_v13 = vpop.xlane.xlu1 %2780 }
 0xdd0   :  { %v2783_v20 = vmul.f32 0.0625, %v2781_v13 }
 0xdd1   :  { %v2778_v6 = vpop.xlane.xlu0 %2777 }
 0xdd2   :  { %v2785_v46 = vadd.f32 1e-05, %v2783_v20  ;;  %v2782_v37 = vmul.f32 0.0625, %v2778_v6 }
 0xdd4   :  { %4575 = vrsqrt.f32 %v2785_v46  ;;  %v2784_v27 = vadd.f32 1e-05, %v2782_v37 }
 0xdd6   :  { %4577 = vrsqrt.f32 %v2784_v27 }
 0xde1   :  { %v4576_v42 = vpop.eup %4575 }
 0xde2   :  { %v2789_v60 = vmul.f32 %v4576_v42, %v2773_v21 }
 0xde3   :  { %v4578_v54 = vpop.eup %4577 }
 0xde4   :  { %v2788_v62 = vmul.f32 %v4578_v54, %v2772_v19  ;;  %v2795_v2 = vmul.f32 %v2793_v43, %v2789_v60 }
 0xde6   :  { %v2794_v59 = vmul.f32 %v2793_v43, %v2788_v62  ;;  %v2801_v56 = vadd.f32 %v2799_v1, %v2795_v2 }
 0xde8   :  { %v2800_v47 = vadd.f32 %v2799_v1, %v2794_v59 }
 0xdea   :  { %4357 = vmatprep.mubr.msk.f32.mxu1 %vm178_vm0, %v2800_v47 }
 0xdeb   :  { %4358 = vmatmul.mubr.msk.f32.vlgmr.msra.gmra.mxu1 %vm178_vm0, %v2801_v56 }
 0xdec   :  { %4361 = vmatpush3.msra.mxu1 %v128_v22  ;;  %4364 = vmatprep.mubr.msk.f32.mxu1 %vm178_vm0, %v2800_v47 }
 0xded   :  { %4362 = vmatprep.subr.mxu1 %v127_v24 }
 0xdee   :  { %4363 = vmatpush3.msra.mxu1 %v127_v24 }
 0xdef   :  { %4365 = vmatmul.mubr.msk.f32.vlgmr.msra.gmra.mxu1 %vm178_vm0, %v2801_v56  ;;  %4367 = vmatprep.subr.mxu1 %v135_v45 }
 0xdf0   :  { %4368 = vmatpush3.msra.mxu1 %v135_v45  ;;  %4371 = vmatprep.mubr.msk.f32.mxu1 %vm178_vm0, %v2800_v47 }
 0xdf1   :  { %4369 = vmatprep.subr.mxu1 %v134_v41 }
 0xdf2   :  { %4370 = vmatpush3.msra.mxu1 %v134_v41 }
 0xdf3   :  { %4372 = vmatmul.mubr.msk.f32.vlgmr.msra.gmra.mxu1 %vm178_vm0, %v2801_v56  ;;  %4374 = vmatprep.subr.mxu1 %v142_v63 }
 0xdf4   :  { %4375 = vmatpush3.msra.mxu1 %v142_v63 }
 0xdf5   :  { %4376 = vmatprep.subr.mxu1 %v141_v23 }
 0xdf6   :  { %4377 = vmatpush3.msra.mxu1 %v141_v23 }
 0xeab   :  { %v4359_v38 = vpop.f32.mrf.mxu1 }
 0xeac   :  { %v2884_v40 = vadd.f32 %v4359_v38, %v2805_v11 }
 0xead   :  { %v2878_v5 = vpop.f32.mrf.mxu1 }
 0xeae   :  { %v3096_v49 = vcombine.high %v2884_v40, %v2884_v40  ;;  %v3103_v4 = vrot.slane %v2884_v40, %v4958_v48  ;;  %v2879_v18 = vadd.f32 %v2878_v5, %v2805_v11 }
 0xeaf   :  { %v4366_v31 = vpop.f32.mrf.mxu1 }
 0xeb0   :  { %v3110_v16 = vrot.slane %v3096_v49, %v4958_v48  ;;  %v3111_v61 = vcombine.high %v3103_v4, %v3103_v4  ;;  %v3119_v57 = vrot.slane %v3103_v4, %v4958_v48  ;;  %v3047_v0 = vcombine.high %v2879_v18, %v2879_v18 }
 0xeb1   :  { %v3054_v29 = vrot.slane %v2879_v18, %v4958_v48  ;;  %v2963_v50 = vadd.f32 %v4366_v31, %v5849_v26 }
 0xeb2   :  { %v3112_v17 = vcombine.high %v3110_v16, %v3110_v16  ;;  %v3126_v51 = vrot.slane %v3110_v16, %v4958_v48  ;;  %v3133_v34 = vrot.slane %v3111_v61, %v4958_v48  ;;  %v3141_v35 = vcombine.high %v3119_v57, %v3119_v57 }
 0xeb3   :  { %v3061_v36 = vrot.slane %v3047_v0, %v4958_v48  ;;  %v3062_v30 = vcombine.high %v3054_v29, %v3054_v29  ;;  %v5855_v52 = vrot.slane %v3054_v29, %v4958_v48  ;;  %v3180_v21 = vrot.slane %v3119_v57, %v4928_v25 }
 0xeb4   :  { %v3140_v8 = vrot.slane %v3112_v17, %v4958_v48  ;;  %v3142_v32 = vcombine.high %v3126_v51, %v3126_v51  ;;  %v3143_v39 = vcombine.high %v3133_v34, %v3133_v34  ;;  %v3184_v55 = vrot.slane %v3133_v34, %v4928_v25 }
 0xeb5   :  { %v3063_v9 = vcombine.high %v3061_v36, %v3061_v36  ;;  %v5860_v19 = vrot.slane %v3061_v36, %v4958_v48  ;;  %v3188_v15 = vrot.slane %v3141_v35, %v4928_v25  ;;  %v3196_v10 = vrot.slane %v3126_v51, %v4928_v25 }
 0xeb6   :  { %v3144_v12 = vcombine.high %v3140_v8, %v3140_v8  ;;  %v3192_v14 = vrot.slane %v3143_v39, %v4928_v25  ;;  %v5868_v22 = vrot.slane %v3062_v30, %v4958_v48  ;;  %v3092_v20 = vcombine.high %v5855_v52, %v5855_v52 }
 0xeb7   :  { %v5871_v13 = vrot.slane %v3063_v9, %v4958_v48  ;;  %v3200_v6 = vrot.slane %v3140_v8, %v4928_v25  ;;  %v3204_v46 = vrot.slane %v3142_v32, %v4928_v25  ;;  %v5878_v27 = vmul.f32 %v3180_v21, %v2963_v50 }
 0xeb8   :  { %v3208_v37 = vrot.slane %v3144_v12, %v4928_v25  ;;  %v3093_v42 = vcombine.high %v5860_v19, %v5860_v19  ;;  %v3094_v53 = vcombine.high %v5868_v22, %v5868_v22  ;;  %v3148_v48 = vrot.slane %v5855_v52, %v4928_v25 }
 0xeb9   :  { %v3164_v43 = vrot.slane %v5860_v19, %v4928_v25  ;;  %v3095_v60 = vcombine.high %v5871_v13, %v5871_v13  ;;  %v3152_v54 = vrot.slane %v5868_v22, %v4928_v25  ;;  %v5892_v62 = vmul.f32 %v3184_v55, %v2963_v50 }
 0xeba   :  { %v5894_v2 = vmul.f32 %v3188_v15, %v2963_v50  ;;  %v5897_v28 = vrot.slane %v3092_v20, %v4928_v25  ;;  %v3168_v1 = vrot.slane %v5871_v13, %v4928_v25  ;;  %v5901_v59 = vmul.f32 %v3192_v14, %v2963_v50 }
 0xebb   :  { %v5903_v47 = vmul.f32 %v3196_v10, %v2963_v50  ;;  %v5905_v56 = vmul.f32 %v3200_v6, %v2963_v50  ;;  %v5907_v24 = vmul.f32 %v3204_v46, %v2963_v50  ;;  %v5909_v45 = vmul.f32 %v3208_v37, %v2963_v50 }
 0xebc   :  { %v3297_v41 = vsel %vm178_vm0, %v5878_v27, -inf  ;;  %v3304_v23 = vsel %vm178_vm0, %v5892_v62, -inf  ;;  %v3311_v3 = vsel %vm178_vm0, %v5894_v2, -inf  ;;  %v3318_v11 = vsel %vm178_vm0, %v5901_v59, -inf }
 0xebd   :  { %v3298_v63 = vrot.slane %v3297_v41, 4  ;;  %v3305_v38 = vrot.slane %v3304_v23, 4  ;;  %v3312_v40 = vrot.slane %v3311_v3, 4  ;;  %v3319_v5 = vrot.slane %v3318_v11, 4 }
 0xebe   :  { %v3325_v49 = vsel %vm178_vm0, %v5903_v47, -inf  ;;  %v3332_v16 = vsel %vm178_vm0, %v5905_v56, -inf  ;;  %v3339_v61 = vsel %vm178_vm0, %v5907_v24, -inf  ;;  %v3346_v35 = vsel %vm178_vm0, %v5909_v45, -inf }
 0xebf   :  { %v3299_v4 = vmax.f32 %v3297_v41, %v3298_v63  ;;  %v3326_v18 = vrot.slane %v3325_v49, 4  ;;  %v3306_v57 = vmax.f32 %v3304_v23, %v3305_v38  ;;  %v3313_v0 = vmax.f32 %v3311_v3, %v3312_v40 }
 0xec0   :  { %v3320_v29 = vmax.f32 %v3318_v11, %v3319_v5  ;;  %v3333_v44 = vrot.slane %v3332_v16, 4  ;;  %v3340_v34 = vrot.slane %v3339_v61, 4  ;;  %v3347_v9 = vrot.slane %v3346_v35, 4 }
 0xec1   :  { %v3300_v17 = vrot.slane %v3299_v4, 2  ;;  %v3327_v51 = vmax.f32 %v3325_v49, %v3326_v18  ;;  %v3307_v31 = vrot.slane %v3306_v57, 2  ;;  %v3314_v36 = vrot.slane %v3313_v0, 2  ;;  %v2957_v18 = vpop.f32.mrf.mxu1 }
 0xec2   :  { %v3321_v30 = vrot.slane %v3320_v29, 2  ;;  %v3334_v8 = vmax.f32 %v3332_v16, %v3333_v44  ;;  %v3341_v21 = vmax.f32 %v3339_v61, %v3340_v34  ;;  %v3348_v6 = vmax.f32 %v3346_v35, %v3347_v9 }
 0xec3   :  { %v3301_v32 = vmax.f32 %v3299_v4, %v3300_v17  ;;  %v3328_v39 = vrot.slane %v3327_v51, 2  ;;  %v3308_v50 = vmax.f32 %v3306_v57, %v3307_v31  ;;  %v3315_v12 = vmax.f32 %v3313_v0, %v3314_v36 }
 0xec4   :  { %v3322_v55 = vmax.f32 %v3320_v29, %v3321_v30  ;;  %v3335_v15 = vrot.slane %v3334_v8, 2  ;;  %v3342_v20 = vrot.slane %v3341_v21, 2  ;;  %v3172_v23 = vrot.slane %v3093_v42, %v4928_v25 }
 0xec5   :  { %v3302_v10 = vrot.slane %v3301_v32, 1  ;;  %v3329_v14 = vmax.f32 %v3327_v51, %v3328_v39  ;;  %v3309_v46 = vrot.slane %v3308_v50, 1  ;;  %v3316_v37 = vrot.slane %v3315_v12, 1 }
 0xec6   :  { %v3323_v41 = vrot.slane %v3322_v55, 1  ;;  %v3336_v63 = vmax.f32 %v3334_v8, %v3335_v15  ;;  %v3343_v38 = vmax.f32 %v3341_v21, %v3342_v20  ;;  %v3349_v57 = vrot.slane %v3348_v6, 2 }
 0xec7   :  { %v3303_v3 = vmax.f32 %v3301_v32, %v3302_v10  ;;  %v3330_v11 = vrot.slane %v3329_v14, 1  ;;  %v3310_v40 = vmax.f32 %v3308_v50, %v3309_v46  ;;  %v3317_v5 = vmax.f32 %v3315_v12, %v3316_v37 }
 0xec8   :  { %v3324_v49 = vmax.f32 %v3322_v55, %v3323_v41  ;;  %v3337_v4 = vrot.slane %v3336_v63, 1  ;;  %v3344_v61 = vrot.slane %v3343_v38, 1  ;;  %v3160_v51 = vrot.slane %v3094_v53, %v4928_v25 }
 0xec9   :  { %v3331_v16 = vmax.f32 %v3329_v14, %v3330_v11  ;;  %v3361_v0 = vsub.f32 %v5878_v27, %v3303_v3  ;;  %v3362_v44 = vsub.f32 %v5892_v62, %v3310_v40  ;;  %v3363_v17 = vsub.f32 %v5894_v2, %v3317_v5 }
 0xeca   :  { %v3338_v29 = vmax.f32 %v3336_v63, %v3337_v4  ;;  %v3364_v42 = vsub.f32 %v5901_v59, %v3324_v49  ;;  %v5936_v34 = vmax.f32 %v3343_v38, %v3344_v61  ;;  %v2958_v31 = vadd.f32 %v2957_v18, %v5849_v26 }
 0xecb   :  { %v3385_v35 = vmul.f32 1.442695, %v3361_v0  ;;  %v3365_v36 = vsub.f32 %v5903_v47, %v3331_v16  ;;  %v3387_v30 = vmul.f32 1.442695, %v3362_v44  ;;  %v3389_v62 = vmul.f32 1.442695, %v3363_v17 }
 0xecc   :  { %v3366_v27 = vsub.f32 %v5905_v56, %v3338_v29  ;;  %v3176_v2 = vrot.slane %v3095_v60, %v4928_v25  ;;  %v5945_v59 = vmax.f32 %v3348_v6, %v3349_v57  ;;  %v5950_v53 = vmul.f32 %v3148_v48, %v2958_v31 }
 0xecd   :  { %4579 = vpow2.f32 %v3385_v35  ;;  %v3391_v26 = vmul.f32 1.442695, %v3364_v42  ;;  %v5955_v47 = vmul.f32 %v3152_v54, %v2958_v31  ;;  %v5958_v56 = vmul.f32 %v5897_v28, %v2958_v31 }
 0xece   :  { %4581 = vpow2.f32 %v3387_v30  ;;  %v3367_v60 = vsub.f32 %v5907_v24, %v5936_v34  ;;  %v5962_v8 = vmul.f32 %v3160_v51, %v2958_v31  ;;  %v5967_v52 = vmul.f32 %v3164_v43, %v2958_v31  ;;  %v4675_v24 = vld [vmem:[%s6256_s8] sm:$0x7] }
 0xecf   :  { %4583 = vpow2.f32 %v3389_v62  ;;  %v3393_v48 = vmul.f32 1.442695, %v3365_v36  ;;  %v3395_v32 = vmul.f32 1.442695, %v3366_v27  ;;  %v5972_v22 = vmul.f32 %v3168_v1, %v2958_v31 }
 0xed0   :  { %v5974_v54 = vmul.f32 %v3172_v23, %v2958_v31  ;;  %v5976_v28 = vmul.f32 %v3176_v2, %v2958_v31  ;;  %v3241_v39 = vsel %vm178_vm0, %v5950_v53, -inf  ;;  %v3248_v21 = vsel %vm178_vm0, %v5955_v47, -inf }
 0xed1   :  { %v3255_v19 = vsel %vm178_vm0, %v5958_v56, -inf  ;;  %4585 = vpow2.f32 %v3391_v26  ;;  %v3242_v43 = vrot.slane %v3241_v39, 4  ;;  %v3249_v9 = vrot.slane %v3248_v21, 4 }
 0xed2   :  { %v3256_v50 = vrot.slane %v3255_v19, 4  ;;  %v3262_v25 = vsel %vm178_vm0, %v5962_v8, -inf  ;;  %v3269_v13 = vsel %vm178_vm0, %v5967_v52, -inf  ;;  %v3276_v1 = vsel %vm178_vm0, %v5972_v22, -inf }
 0xed3   :  { %v3283_v12 = vsel %vm178_vm0, %v5974_v54, -inf  ;;  %v3243_v55 = vmax.f32 %v3241_v39, %v3242_v43  ;;  %v3250_v15 = vmax.f32 %v3248_v21, %v3249_v9  ;;  %v3263_v14 = vrot.slane %v3262_v25, 4 }
 0xed4   :  { %v3257_v10 = vmax.f32 %v3255_v19, %v3256_v50  ;;  %v3270_v20 = vrot.slane %v3269_v13, 4  ;;  %v3277_v6 = vrot.slane %v3276_v1, 4  ;;  %v3284_v46 = vrot.slane %v3283_v12, 4 }
 0xed5   :  { %v3290_v37 = vsel %vm178_vm0, %v5976_v28, -inf  ;;  %v3244_v41 = vrot.slane %v3243_v55, 2  ;;  %v3251_v63 = vrot.slane %v3250_v15, 2  ;;  %v3264_v3 = vmax.f32 %v3262_v25, %v3263_v14 }
 0xed6   :  { %v3258_v23 = vrot.slane %v3257_v10, 2  ;;  %v3271_v11 = vmax.f32 %v3269_v13, %v3270_v20  ;;  %v3278_v38 = vmax.f32 %v3276_v1, %v3277_v6  ;;  %v3285_v40 = vmax.f32 %v3283_v12, %v3284_v46 }
 0xed7   :  { %v3291_v5 = vrot.slane %v3290_v37, 4  ;;  %v3245_v49 = vmax.f32 %v3243_v55, %v3244_v41  ;;  %v3252_v4 = vmax.f32 %v3250_v15, %v3251_v63  ;;  %v3265_v16 = vrot.slane %v3264_v3, 2 }
 0xed8   :  { %v3259_v18 = vmax.f32 %v3257_v10, %v3258_v23  ;;  %4587 = vpow2.f32 %v3393_v48  ;;  %v3272_v61 = vrot.slane %v3271_v11, 2  ;;  %v3279_v57 = vrot.slane %v3278_v38, 2 }
 0xed9   :  { %v3286_v0 = vrot.slane %v3285_v40, 2  ;;  %v3246_v44 = vrot.slane %v3245_v49, 1  ;;  %v3253_v17 = vrot.slane %v3252_v4, 1  ;;  %v3266_v51 = vmax.f32 %v3264_v3, %v3265_v16 }
 0xeda   :  { %v5994_v29 = vpop.eup %4579  ;;  %v3260_v42 = vrot.slane %v3259_v18, 1  ;;  %v3273_v36 = vmax.f32 %v3271_v11, %v3272_v61  ;;  %v3280_v27 = vmax.f32 %v3278_v38, %v3279_v57  ;;  %v3292_v30 = vmax.f32 %v3290_v37, %v3291_v5 }
 0xedb   :  { %v5996_v35 = vpop.eup %4581  ;;  %v3457_v31 = vsel %vm178_vm0, %v5994_v29, 0.0  ;;  %v3247_v48 = vmax.f32 %v3245_v49, %v3246_v44  ;;  %v3254_v39 = vmax.f32 %v3252_v4, %v3253_v17  ;;  %4589 = vpow2.f32 %v3395_v32 }
 0xedc   :  { %v6000_v62 = vpop.eup %4583  ;;  %v3458_v2 = vrot.slane %v3457_v31, 4  ;;  %v3464_v26 = vsel %vm178_vm0, %v5996_v35, 0.0  ;;  %v3261_v19 = vmax.f32 %v3259_v18, %v3260_v42  ;;  %v3267_v43 = vrot.slane %v3266_v51, 1 }
 0xedd   :  { %v3465_v21 = vrot.slane %v3464_v26, 4  ;;  %v3471_v9 = vsel %vm178_vm0, %v6000_v62, 0.0  ;;  %v3274_v50 = vrot.slane %v3273_v36, 1  ;;  %v3281_v25 = vrot.slane %v3280_v27, 1 }
 0xede   :  { %v3287_v13 = vmax.f32 %v3285_v40, %v3286_v0  ;;  %v6006_v1 = vpop.eup %4585  ;;  %v3459_v12 = vadd.f32 %v3458_v2, %v3457_v31  ;;  %v3268_v55 = vmax.f32 %v3266_v51, %v3267_v43  ;;  %v3293_v15 = vrot.slane %v3292_v30, 2 }
 0xedf   :  { %v3353_v10 = vsub.f32 %v5950_v53, %v3247_v48  ;;  %v3275_v14 = vmax.f32 %v3273_v36, %v3274_v50  ;;  %v3282_v20 = vmax.f32 %v3280_v27, %v3281_v25  ;;  %v3354_v32 = vsub.f32 %v5955_v47, %v3254_v39 }
 0xee0   :  { %v3355_v6 = vsub.f32 %v5958_v56, %v3261_v19  ;;  %v3466_v46 = vadd.f32 %v3465_v21, %v3464_v26  ;;  %v3472_v37 = vrot.slane %v3471_v9, 4  ;;  %v3356_v41 = vsub.f32 %v5962_v8, %v3268_v55 }
 0xee1   :  { %v3369_v63 = vmul.f32 1.442695, %v3353_v10  ;;  %v3357_v23 = vsub.f32 %v5967_v52, %v3275_v14  ;;  %v3358_v3 = vsub.f32 %v5972_v22, %v3282_v20  ;;  %v3371_v11 = vmul.f32 1.442695, %v3354_v32 }
 0xee2   :  { %v3373_v38 = vmul.f32 1.442695, %v3355_v6  ;;  %v3375_v40 = vmul.f32 1.442695, %v3356_v41  ;;  %v3288_v53 = vrot.slane %v3287_v13, 1  ;;  %v3294_v5 = vmax.f32 %v3292_v30, %v3293_v15 }
 0xee3   :  { %4591 = vpow2.f32 %v3369_v63  ;;  %v3377_v49 = vmul.f32 1.442695, %v3357_v23  ;;  %v3379_v47 = vmul.f32 1.442695, %v3358_v3  ;;  %v3351_v56 = vrot.slane %v5945_v59, 1 }
 0xee4   :  { %4593 = vpow2.f32 %v3371_v11  ;;  %v3289_v4 = vmax.f32 %v3287_v13, %v3288_v53  ;;  %v3295_v18 = vrot.slane %v3294_v5, 1  ;;  %v3460_v8 = vrot.slane %v3459_v12, 2  ;;  %v4373_v13 = vpop.f32.mrf.mxu1 }
 0xee5   :  { %4595 = vpow2.f32 %v3373_v38  ;;  %v6015_v16 = vpop.eup %4587  ;;  %v3352_v52 = vmax.f32 %v5945_v59, %v3351_v56  ;;  %v3467_v22 = vrot.slane %v3466_v46, 2  ;;  %v3473_v61 = vadd.f32 %v3472_v37, %v3471_v9 }
 0xee6   :  { %4597 = vpow2.f32 %v3375_v40  ;;  %v3296_v57 = vmax.f32 %v3294_v5, %v3295_v18  ;;  %v3359_v0 = vsub.f32 %v5974_v54, %v3289_v4  ;;  %v3461_v44 = vadd.f32 %v3460_v8, %v3459_v12 }
 0xee7   :  { %4599 = vpow2.f32 %v3377_v49  ;;  %v3368_v17 = vsub.f32 %v5909_v45, %v3352_v52  ;;  %v3468_v42 = vadd.f32 %v3467_v22, %v3466_v46  ;;  %v3474_v51 = vrot.slane %v3473_v61, 2 }
 0xee8   :  { %4601 = vpow2.f32 %v3379_v47  ;;  %v3360_v31 = vsub.f32 %v5976_v28, %v3296_v57  ;;  %v3381_v36 = vmul.f32 1.442695, %v3359_v0  ;;  %v3462_v27 = vrot.slane %v3461_v44, 1  ;;  %v6021_v30 = vpop.eup %4589 }
 0xee9   :  { %v3469_v2 = vrot.slane %v3468_v42, 1  ;;  %v3475_v59 = vadd.f32 %v3474_v51, %v3473_v61  ;;  %v3478_v26 = vsel %vm178_vm0, %v6006_v1, 0.0  ;;  %v3397_v54 = vmul.f32 1.442695, %v3367_v60 }
 0xeea   :  { %4603 = vpow2.f32 %v3381_v36  ;;  %v3383_v48 = vmul.f32 1.442695, %v3360_v31  ;;  %v3479_v45 = vrot.slane %v3478_v26, 4  ;;  %v3399_v39 = vmul.f32 1.442695, %v3368_v17 }
 0xeeb   :  { %v3463_v21 = vadd.f32 %v3462_v27, %v3461_v44  ;;  %v3476_v19 = vrot.slane %v3475_v59, 1  ;;  %v3485_v28 = vsel %vm178_vm0, %v6015_v16, 0.0  ;;  %v3492_v50 = vsel %vm178_vm0, %v6021_v30, 0.0 }
 0xeec   :  { %4605 = vpow2.f32 %v3383_v48  ;;  %v3480_v43 = vadd.f32 %v3479_v45, %v3478_v26  ;;  %v3486_v9 = vrot.slane %v3485_v28, 4  ;;  %v6036_v34 = vrot.slane %v4675_v24, %v5812_v7 }
 0xeed   :  { %v3470_v60 = vadd.f32 %v3469_v2, %v3468_v42  ;;  %v3493_v25 = vrot.slane %v3492_v50, 4  ;;  %4607 = vpow2.f32 %v3397_v54  ;;  %v3477_v12 = vadd.f32 %v3476_v19, %v3475_v59 }
 0xeee   :  { %v3481_v55 = vrot.slane %v3480_v43, 2  ;;  %v3487_v15 = vadd.f32 %v3486_v9, %v3485_v28  ;;  %4609 = vpow2.f32 %v3399_v39  ;;  %v6049_v23 = vadd.f32 %v4373_v13, %v6036_v34 }
 0xeef   :  { %v3494_v14 = vadd.f32 %v3493_v25, %v3492_v50  ;;  %4611 = vrcp.f32 %v3463_v21 }
 0xef0   :  { %v6038_v10 = vpop.eup %4591  ;;  %v3482_v6 = vadd.f32 %v3481_v55, %v3480_v43  ;;  %v3488_v46 = vrot.slane %v3487_v15, 2  ;;  %4613 = vrcp.f32 %v3470_v60 }
 0xef1   :  { %v6040_v20 = vpop.eup %4593  ;;  %v3401_v32 = vsel %vm178_vm0, %v6038_v10, 0.0  ;;  %v3495_v40 = vrot.slane %v3494_v14, 2  ;;  %4615 = vrcp.f32 %v3477_v12 }
 0xef2   :  { %v6044_v37 = vpop.eup %4595  ;;  %v3402_v41 = vrot.slane %v3401_v32, 4  ;;  %v3408_v63 = vsel %vm178_vm0, %v6040_v20, 0.0  ;;  %v3483_v56 = vrot.slane %v3482_v6, 1  ;;  %v6063_v22 = vadd.f32 %v3488_v46, %v3487_v15 }
 0xef3   :  { %v6051_v3 = vpop.eup %4597  ;;  %v3409_v11 = vrot.slane %v3408_v63, 4  ;;  %v3415_v38 = vsel %vm178_vm0, %v6044_v37, 0.0  ;;  %v6067_v31 = vadd.f32 %v3495_v40, %v3494_v14 }
 0xef4   :  { %v6055_v53 = vpop.eup %4599  ;;  %v3403_v5 = vadd.f32 %v3402_v41, %v3401_v32  ;;  %v3416_v49 = vrot.slane %v3415_v38, 4  ;;  %v3422_v47 = vsel %vm178_vm0, %v6051_v3, 0.0  ;;  %v3484_v26 = vadd.f32 %v3483_v56, %v3482_v6 }
 0xef5   :  { %v6059_v4 = vpop.eup %4601  ;;  %v3410_v18 = vadd.f32 %v3409_v11, %v3408_v63  ;;  %v3423_v8 = vrot.slane %v3422_v47, 4  ;;  %v3429_v52 = vsel %vm178_vm0, %v6055_v53, 0.0 }
 0xef6   :  { %v3404_v61 = vrot.slane %v3403_v5, 2  ;;  %v3417_v57 = vadd.f32 %v3416_v49, %v3415_v38  ;;  %v3430_v0 = vrot.slane %v3429_v52, 4  ;;  %v3436_v44 = vsel %vm178_vm0, %v6059_v4, 0.0 }
 0xef7   :  { %v3411_v17 = vrot.slane %v3410_v18, 2  ;;  %v3424_v42 = vadd.f32 %v3423_v8, %v3422_v47  ;;  %v3437_v51 = vrot.slane %v3436_v44, 4  ;;  %v6069_v36 = vpop.eup %4603 }
 0xef8   :  { %v3405_v27 = vadd.f32 %v3404_v61, %v3403_v5  ;;  %v3418_v2 = vrot.slane %v3417_v57, 2  ;;  %v3431_v59 = vadd.f32 %v3430_v0, %v3429_v52  ;;  %v3443_v39 = vsel %vm178_vm0, %v6069_v36, 0.0 }
 0xef9   :  { %v3412_v54 = vadd.f32 %v3411_v17, %v3410_v18  ;;  %v3425_v48 = vrot.slane %v3424_v42, 2  ;;  %v3438_v45 = vadd.f32 %v3437_v51, %v3436_v44  ;;  %v6073_v21 = vpop.eup %4605  ;;  %v3444_v9 = vrot.slane %v3443_v39, 4 }
 0xefa   :  { %v3406_v19 = vrot.slane %v3405_v27, 1  ;;  %v3419_v28 = vadd.f32 %v3418_v2, %v3417_v57  ;;  %v3432_v43 = vrot.slane %v3431_v59, 2  ;;  %v3450_v25 = vsel %vm178_vm0, %v6073_v21, 0.0  ;;  %v6077_v13 = vpop.eup %4607 }
 0xefb   :  { %v3413_v50 = vrot.slane %v3412_v54, 1  ;;  %v3426_v24 = vadd.f32 %v3425_v48, %v3424_v42  ;;  %v3439_v60 = vrot.slane %v3438_v45, 2  ;;  %v3445_v14 = vadd.f32 %v3444_v9, %v3443_v39  ;;  %v6079_v32 = vpop.eup %4609 }
 0xefc   :  { %v3407_v12 = vadd.f32 %v3406_v19, %v3405_v27  ;;  %v3420_v55 = vrot.slane %v3419_v28, 1  ;;  %v3433_v15 = vadd.f32 %v3432_v43, %v3431_v59  ;;  %v3451_v63 = vrot.slane %v3450_v25, 4  ;;  %v4612_v11 = vpop.eup %4611 }
 0xefd   :  { %v3414_v6 = vadd.f32 %v3413_v50, %v3412_v54  ;;  %v3427_v46 = vrot.slane %v3426_v24, 1  ;;  %v3440_v41 = vadd.f32 %v3439_v60, %v3438_v45  ;;  %v3446_v5 = vrot.slane %v3445_v14, 2  ;;  %v4614_v49 = vpop.eup %4613 }
 0xefe   :  { %v3421_v38 = vadd.f32 %v3420_v55, %v3419_v28  ;;  %v3434_v40 = vrot.slane %v3433_v15, 1  ;;  %4617 = vrcp.f32 %v3407_v12  ;;  %v3452_v18 = vadd.f32 %v3451_v63, %v3450_v25  ;;  %v4616_v8 = vpop.eup %4615 }
 0xeff   :  { %v3428_v47 = vadd.f32 %v3427_v46, %v3426_v24  ;;  %v3441_v56 = vrot.slane %v3440_v41, 1  ;;  %4619 = vrcp.f32 %v3414_v6  ;;  %v3447_v61 = vadd.f32 %v3446_v5, %v3445_v14 }
 0xf00   :  { %v3435_v52 = vadd.f32 %v3434_v40, %v3433_v15  ;;  %4621 = vrcp.f32 %v3421_v38  ;;  %v3490_v57 = vrot.slane %v6063_v22, 1  ;;  %v3453_v44 = vrot.slane %v3452_v18, 2  ;;  %v3036_v15 = vpop.f32.mrf.mxu1 }
 0xf01   :  { %v3442_v0 = vadd.f32 %v3441_v56, %v3440_v41  ;;  %4623 = vrcp.f32 %v3428_v47  ;;  %v3497_v17 = vrot.slane %v6067_v31, 1  ;;  %v3448_v42 = vrot.slane %v3447_v61, 1 }
 0xf02   :  { %4625 = vrcp.f32 %v3435_v52  ;;  %v3499_v51 = vsel %vm178_vm0, %v6077_v13, 0.0  ;;  %v3506_v27 = vsel %vm178_vm0, %v6079_v32, 0.0  ;;  %v3454_v2 = vadd.f32 %v3453_v44, %v3452_v18 }
 0xf03   :  { %4627 = vrcp.f32 %v3442_v0  ;;  %v3500_v59 = vrot.slane %v3499_v51, 4  ;;  %v3507_v54 = vrot.slane %v3506_v27, 4  ;;  %v3449_v48 = vadd.f32 %v3448_v42, %v3447_v61 }
 0xf04   :  { %4629 = vrcp.f32 %v3484_v26  ;;  %v3537_v45 = vmul.f32 %v4612_v11, %v5994_v29  ;;  %v3538_v39 = vmul.f32 %v4614_v49, %v5996_v35  ;;  %v3455_v19 = vrot.slane %v3454_v2, 1 }
 0xf05   :  { %v3491_v28 = vadd.f32 %v3490_v57, %v6063_v22  ;;  %v3501_v43 = vadd.f32 %v3500_v59, %v3499_v51  ;;  %v3508_v9 = vadd.f32 %v3507_v54, %v3506_v27  ;;  %4631 = vrcp.f32 %v3449_v48 }
 0xf06   :  { %v3539_v50 = vmul.f32 %v4616_v8, %v6000_v62  ;;  %v3553_v24 = vmul.f32 %v3537_v45, %v6049_v23  ;;  %v3554_v60 = vmul.f32 %v3538_v39, %v6049_v23  ;;  %v3456_v25 = vadd.f32 %v3455_v19, %v3454_v2 }
 0xf07   :  { %v3502_v12 = vrot.slane %v3501_v43, 2  ;;  %v3509_v55 = vrot.slane %v3508_v9, 2  ;;  %v3498_v26 = vadd.f32 %v3497_v17, %v6067_v31  ;;  %v3037_v49 = vadd.f32 %v3036_v15, %v6036_v34 }
 0xf08   :  { %v3555_v29 = vmul.f32 %v3539_v50, %v6049_v23  ;;  %v3617_v35 = vsel %vm178_vm0, %v3553_v24, 0.0  ;;  %v3624_v22 = vsel %vm178_vm0, %v3554_v60, 0.0  ;;  %4633 = vrcp.f32 %v3456_v25 }
 0xf09   :  { %v3503_v14 = vadd.f32 %v3502_v12, %v3501_v43  ;;  %v3510_v6 = vadd.f32 %v3509_v55, %v3508_v9  ;;  %v3618_v62 = vrot.slane %v3617_v35, 4  ;;  %4635 = vrcp.f32 %v3491_v28 }
 0xf0a   :  { %v3625_v46 = vrot.slane %v3624_v22, 4  ;;  %v3631_v41 = vsel %vm178_vm0, %v3555_v29, 0.0  ;;  %4637 = vrcp.f32 %v3498_v26 }
 0xf0b   :  { %v4618_v63 = vpop.eup %4617  ;;  %v3504_v11 = vrot.slane %v3503_v14, 1  ;;  %v3511_v38 = vrot.slane %v3510_v6, 1  ;;  %v3619_v40 = vadd.f32 %v3618_v62, %v3617_v35  ;;  %v3632_v31 = vrot.slane %v3631_v41, 4 }
 0xf0c   :  { %v4620_v5 = vpop.eup %4619  ;;  %v3529_v47 = vmul.f32 %v4618_v63, %v6038_v10  ;;  %v6100_v56 = vadd.f32 %v3625_v46, %v3624_v22 }
 0xf0d   :  { %v4622_v18 = vpop.eup %4621  ;;  %v3530_v8 = vmul.f32 %v4620_v5, %v6040_v20  ;;  %v3505_v52 = vadd.f32 %v3504_v11, %v3503_v14  ;;  %v3512_v61 = vadd.f32 %v3511_v38, %v3510_v6  ;;  %v3620_v57 = vrot.slane %v3619_v40, 2 }
 0xf0e   :  { %v4624_v0 = vpop.eup %4623  ;;  %v3531_v44 = vmul.f32 %v4622_v18, %v6044_v37  ;;  %v3545_v17 = vmul.f32 %v3529_v47, %v3037_v49  ;;  %v3627_v42 = vrot.slane %v6100_v56, 2  ;;  %v6105_v51 = vadd.f32 %v3632_v31, %v3631_v41 }
 0xf0f   :  { %v4626_v34 = vpop.eup %4625  ;;  %v3532_v10 = vmul.f32 %v4624_v0, %v6051_v3  ;;  %v3546_v27 = vmul.f32 %v3530_v8, %v3037_v49  ;;  %4639 = vrcp.f32 %v3505_v52  ;;  %v6108_v2 = vadd.f32 %v3620_v57, %v3619_v40 }
 0xf10   :  { %v4628_v59 = vpop.eup %4627  ;;  %v3533_v20 = vmul.f32 %v4626_v34, %v6055_v53  ;;  %v3547_v54 = vmul.f32 %v3531_v44, %v3037_v49  ;;  %v3561_v48 = vsel %vm178_vm0, %v3545_v17, 0.0  ;;  %4641 = vrcp.f32 %v3512_v61 }
 0xf11   :  { %v4630_v37 = vpop.eup %4629  ;;  %v3534_v45 = vmul.f32 %v4628_v59, %v6059_v4  ;;  %v3548_v39 = vmul.f32 %v3532_v10, %v3037_v49  ;;  %v3562_v19 = vrot.slane %v3561_v48, 4  ;;  %v3568_v28 = vsel %vm178_vm0, %v3546_v27, 0.0 }
 0xf12   :  { %v3549_v43 = vmul.f32 %v3533_v20, %v3037_v49  ;;  %v3569_v3 = vrot.slane %v3568_v28, 4  ;;  %v3575_v9 = vsel %vm178_vm0, %v3547_v54, 0.0  ;;  %v6116_v50 = vmul.f32 %v4630_v37, %v6006_v1  ;;  %v4632_v24 = vpop.eup %4631 }
 0xf13   :  { %v3550_v53 = vmul.f32 %v3534_v45, %v3037_v49  ;;  %v3563_v60 = vadd.f32 %v3562_v19, %v3561_v48  ;;  %v3576_v25 = vrot.slane %v3575_v9, 4  ;;  %v3582_v12 = vsel %vm178_vm0, %v3548_v39, 0.0 }
 0xf14   :  { %v3535_v55 = vmul.f32 %v4632_v24, %v6069_v36  ;;  %v3570_v4 = vadd.f32 %v3569_v3, %v3568_v28  ;;  %v3583_v26 = vrot.slane %v3582_v12, 4  ;;  %v3589_v29 = vsel %vm178_vm0, %v3549_v43, 0.0 }
 0xf15   :  { %v3564_v35 = vrot.slane %v3563_v60, 2  ;;  %v3577_v22 = vadd.f32 %v3576_v25, %v3575_v9  ;;  %v3590_v15 = vrot.slane %v3589_v29, 4  ;;  %v3596_v14 = vsel %vm178_vm0, %v3550_v53, 0.0  ;;  %v4634_v6 = vpop.eup %4633 }
 0xf16   :  { %v3551_v1 = vmul.f32 %v3535_v55, %v3037_v49  ;;  %v3571_v62 = vrot.slane %v3570_v4, 2  ;;  %v3584_v46 = vadd.f32 %v3583_v26, %v3582_v12  ;;  %v3597_v41 = vrot.slane %v3596_v14, 4  ;;  %v4636_v63 = vpop.eup %4635 }
 0xf17   :  { %v3536_v11 = vmul.f32 %v4634_v6, %v6073_v21  ;;  %v3565_v38 = vadd.f32 %v3564_v35, %v3563_v60  ;;  %v3578_v40 = vrot.slane %v3577_v22, 2  ;;  %v3591_v36 = vadd.f32 %v3590_v15, %v3589_v29  ;;  %v4638_v8 = vpop.eup %4637 }
 0xf18   :  { %v3572_v31 = vadd.f32 %v3571_v62, %v3570_v4  ;;  %v3585_v5 = vrot.slane %v3584_v46, 2  ;;  %v3598_v47 = vadd.f32 %v3597_v41, %v3596_v14  ;;  %v3603_v18 = vsel %vm178_vm0, %v3551_v1, 0.0 }
 0xf19   :  { %v3552_v52 = vmul.f32 %v3536_v11, %v3037_v49  ;;  %v3566_v61 = vrot.slane %v3565_v38, 1  ;;  %v3579_v57 = vadd.f32 %v3578_v40, %v3577_v22  ;;  %v3592_v0 = vrot.slane %v3591_v36, 2 }
 0xf1a   :  { %v3573_v44 = vrot.slane %v3572_v31, 1  ;;  %v3586_v17 = vadd.f32 %v3585_v5, %v3584_v46  ;;  %v3599_v34 = vrot.slane %v3598_v47, 2  ;;  %v3604_v10 = vrot.slane %v3603_v18, 4 }
 0xf1b   :  { %v3567_v27 = vadd.f32 %v3566_v61, %v3565_v38  ;;  %v3580_v59 = vrot.slane %v3579_v57, 1  ;;  %v3593_v21 = vadd.f32 %v3592_v0, %v3591_v36  ;;  %v3610_v20 = vsel %vm178_vm0, %v3552_v52, 0.0 }
 0xf1c   :  { %v4640_v54 = vpop.eup %4639  ;;  %v3574_v48 = vadd.f32 %v3573_v44, %v3572_v31  ;;  %v3587_v37 = vrot.slane %v3586_v17, 1  ;;  %v3600_v45 = vadd.f32 %v3599_v34, %v3598_v47  ;;  %v3605_v39 = vadd.f32 %v3604_v10, %v3603_v18 }
 0xf1d   :  { %v4642_v19 = vpop.eup %4641  ;;  %v3581_v28 = vadd.f32 %v3580_v59, %v3579_v57  ;;  %v3594_v49 = vrot.slane %v3593_v21, 1  ;;  %v3611_v43 = vrot.slane %v3610_v20, 4  ;;  %v3541_v3 = vmul.f32 %v4636_v63, %v6015_v16 }
 0xf1e   :  { %v3588_v9 = vadd.f32 %v3587_v37, %v3586_v17  ;;  %v3601_v24 = vrot.slane %v3600_v45, 1  ;;  %v3606_v53 = vrot.slane %v3605_v39, 2  ;;  %v3693_v60 = vsel %vm1109_vm1, %v3574_v48, %v3567_v27 }
 0xf1f   :  { %v3595_v25 = vadd.f32 %v3594_v49, %v3593_v21  ;;  %v3612_v12 = vadd.f32 %v3611_v43, %v3610_v20  ;;  %v3694_v55 = vsel %vm1111_vm2, %v3581_v28, %v3693_v60  ;;  %v3542_v4 = vmul.f32 %v4638_v8, %v6021_v30 }
 0xf20   :  { %v3602_v26 = vadd.f32 %v3601_v24, %v3600_v45  ;;  %v3607_v29 = vadd.f32 %v3606_v53, %v3605_v39  ;;  %v3695_v35 = vsel %vm1113_vm3, %v3588_v9, %v3694_v55  ;;  %v3543_v22 = vmul.f32 %v4640_v54, %v6077_v13 }
 0xf21   :  { %v3613_v15 = vrot.slane %v3612_v12, 2  ;;  %v3696_v16 = vsel %vm1115_vm4, %v3595_v25, %v3695_v35  ;;  %v3544_v14 = vmul.f32 %v4642_v19, %v6079_v32  ;;  %v3556_v6 = vmul.f32 %v6116_v50, %v6049_v23 }
 0xf22   :  { %v3608_v1 = vrot.slane %v3607_v29, 1  ;;  %v3697_v62 = vsel %vm1117_vm5, %v3602_v26, %v3696_v16  ;;  %v3557_v46 = vmul.f32 %v3541_v3, %v6049_v23  ;;  %v3558_v30 = vmul.f32 %v3542_v4, %v6049_v23 }
 0xf23   :  { %v3614_v41 = vadd.f32 %v3613_v15, %v3612_v12  ;;  %v3559_v63 = vmul.f32 %v3543_v22, %v6049_v23  ;;  %v3560_v13 = vmul.f32 %v3544_v14, %v6049_v23  ;;  %v3622_v11 = vrot.slane %v6108_v2, 1 }
 0xf24   :  { %v3609_v38 = vadd.f32 %v3608_v1, %v3607_v29  ;;  %v3628_v32 = vadd.f32 %v3627_v42, %v6100_v56  ;;  %v3634_v50 = vrot.slane %v6105_v51, 2  ;;  %v3638_v40 = vsel %vm178_vm0, %v3556_v6, 0.0 }
 0xf25   :  { %v3615_v36 = vrot.slane %v3614_v41, 1  ;;  %v3623_v31 = vadd.f32 %v3622_v11, %v6108_v2  ;;  %v3639_v5 = vrot.slane %v3638_v40, 4  ;;  %v3645_v47 = vsel %vm178_vm0, %v3557_v46, 0.0  ;;  %v4676_v46 = vld [vmem:[%s6258_s10] sm:$0x7] }
 0xf26   :  { %v3698_v18 = vsel %vm1119_vm6, %v3609_v38, %v3697_v62  ;;  %v3629_v23 = vrot.slane %v3628_v32, 1  ;;  %v3635_v8 = vadd.f32 %v3634_v50, %v6105_v51  ;;  %v3646_v52 = vrot.slane %v3645_v47, 4 }
 0xf27   :  { %v3616_v61 = vadd.f32 %v3615_v36, %v3614_v41  ;;  %v3640_v57 = vadd.f32 %v3639_v5, %v3638_v40  ;;  %v3652_v56 = vsel %vm178_vm0, %v3558_v30, 0.0  ;;  %v3659_v42 = vsel %vm178_vm0, %v3559_v63, 0.0 }
 0xf28   :  { %v3630_v0 = vadd.f32 %v3629_v23, %v3628_v32  ;;  %v3636_v44 = vrot.slane %v3635_v8, 1  ;;  %v3647_v17 = vadd.f32 %v3646_v52, %v3645_v47  ;;  %v3653_v34 = vrot.slane %v3652_v56, 4 }
 0xf29   :  { %v3699_v2 = vsel %vm1121_vm7, %v3616_v61, %v3698_v18  ;;  %v3641_v10 = vrot.slane %v3640_v57, 2  ;;  %v3660_v27 = vrot.slane %v3659_v42, 4  ;;  %v3666_v59 = vsel %vm178_vm0, %v3560_v13, 0.0  ;;  %v151_v61 = vld [vmem:[%s6261_s13 + $0x28] sm:$0xff] }
 0xf2a   :  { %4378 = vmatprep.mubr.msk.f32.mxu1 %vm178_vm0, %v3699_v2  ;;  %v3637_v51 = vadd.f32 %v3636_v44, %v3635_v8  ;;  %v3648_v21 = vrot.slane %v3647_v17, 2  ;;  %v3654_v20 = vadd.f32 %v3653_v34, %v3652_v56  ;;  %v3667_v54 = vrot.slane %v3666_v59, 4  ;;  %4381 = vmatprep.subr.mxu0 %v151_v61 }
 0xf2b   :  { %v3642_v48 = vadd.f32 %v3641_v10, %v3640_v57  ;;  %v3661_v37 = vadd.f32 %v3660_v27, %v3659_v42  ;;  %v3700_v45 = vsel %vm1109_vm1, %v3630_v0, %v3623_v31  ;;  %v3676_v30 = vrot.slane %v4676_v46, %v5812_v7  ;;  %v150_v57 = vld [vmem:[%s6261_s13 + $0x20] sm:$0xff]  ;;  %4382 = vmatpush3.msra.mxu0 %v151_v61  ;;  %v4677_v10 = vld [vmem:[#allocation8] sm:$0x7]  ;;  %s4796_s13 = smov [#allocation10]  }
 0xf2c   :  { %v3649_v39 = vadd.f32 %v3648_v21, %v3647_v17  ;;  %v3655_v19 = vrot.slane %v3654_v20, 2  ;;  %v3668_v28 = vadd.f32 %v3667_v54, %v3666_v59  ;;  %v3701_v53 = vsel %vm1111_vm2, %v3637_v51, %v3700_v45  ;;  %4383 = vmatprep.subr.mxu0 %v150_v57  ;;  %v4678_v54 = vld [vmem:[%s6260_s12] sm:$0x7]  ;;  %s4103_s29 = sshll.u32 %s4796_s13, 4  ;;  %s4104_s29 = int_to_ptr.vmem [resolvable:$true] %s4103_s29 }
 0xf2d   :  { %v3643_v49 = vrot.slane %v3642_v48, 1  ;;  %v3662_v43 = vrot.slane %v3661_v37, 2  ;;  %4384 = vmatpush3.msra.mxu0 %v150_v57  ;;  %v3817_v27 = vrot.slane %v4677_v10, %v5812_v7  ;;  %s4761_s0 = scalar_lea.vmem %s4104_s29, 256  ;;  %p4766_p7 = scmp.lt.s32.totalorder %s4104_s29, %s4104_s29 }
 0xf2e   :  { %v3650_v3 = vrot.slane %v3649_v39, 1  ;;  %v3656_v9 = vadd.f32 %v3655_v19, %v3654_v20  ;;  %v3669_v24 = vrot.slane %v3668_v28, 2  ;;  %v176_v19 = vld [vmem:[%s6263_s15 + $0xb8] sm:$0xff]  ;;  %p4762_p6 = scmp.ne.s32.totalorder %s4104_s29, %s4761_s0  ;;  %p4767_p8 = scmp.lt.s32.totalorder %s4761_s0, %s4761_s0 }
 0xf2f   :  { %v3644_v60 = vadd.f32 %v3643_v49, %v3642_v48  ;;  %v3663_v25 = vadd.f32 %v3662_v43, %v3661_v37  ;;  %v3823_v48 = vrot.slane %v4678_v54, %v5812_v7  ;;  %4388 = vmatprep.subr.mxu1 %v176_v19  ;;  %v174_v49 = vld [vmem:[%s6263_s15 + $0xa8] sm:$0xff]  ;;  %v173_v43 = vld [vmem:[%s6263_s15 + $0xa0] sm:$0xff] }
 0xf30   :  { %v3651_v12 = vadd.f32 %v3650_v3, %v3649_v39  ;;  %v3657_v55 = vrot.slane %v3656_v9, 1  ;;  %v3670_v4 = vadd.f32 %v3669_v24, %v3668_v28  ;;  %v175_v28 = vld [vmem:[%s6263_s15 + $0xb0] sm:$0xff]  ;;  %v172_v3 = vld [vmem:[%s6263_s15 + $0x98] sm:$0xff]  ;;  %v170_v24 = vld [vmem:[%s6263_s15 + $0x88] sm:$0xff]  ;;  %p4768_p9 = por %p4767_p8, %p4766_p7 }
 0xf31   :  { %v3664_v26 = vrot.slane %v3663_v25, 1  ;;  %v3702_v29 = vsel %vm1113_vm3, %v3644_v60, %v3701_v53  ;;  %v169_v53 = vld [vmem:[%s6263_s15 + $0x80] sm:$0xff] }
 0xf32   :  { %v3658_v35 = vadd.f32 %v3657_v55, %v3656_v9  ;;  %v3671_v22 = vrot.slane %v3670_v4, 1  ;;  %v3703_v15 = vsel %vm1115_vm4, %v3651_v12, %v3702_v29  ;;  %v171_v9 = vld [vmem:[%s6263_s15 + $0x90] sm:$0xff]  ;;  %v4679_v60 = vld [vmem:[%s6262_s14] sm:$0x7]  ;;  %p4769_p10 = pnand %p4768_p9, %p4762_p6 }
 0xf33   :  { %v3665_v16 = vadd.f32 %v3664_v26, %v3663_v25  ;;  %v3829_v25 = vrot.slane %v4679_v60, %v5812_v7 }
 0xf34   :  { %v3672_v14 = vadd.f32 %v3671_v22, %v3670_v4  ;;  %v3704_v6 = vsel %vm1117_vm5, %v3658_v35, %v3703_v15 }
 0xf35   :  { %v3705_v1 = vsel %vm1119_vm6, %v3665_v16, %v3704_v6 }
 0xf36   :  { %v3706_v62 = vsel %vm1121_vm7, %v3672_v14, %v3705_v1 }
 0xf37   :  { %4379 = vmatmul.mubr.msk.f32.vlgmr.msra.gmra.mxu1 %vm178_vm0, %v3706_v62 }
 0xf38   :  { %4389 = vmatpush3.msra.mxu1 %v176_v19 }
 0xf39   :  { %4390 = vmatprep.subr.mxu1 %v175_v28 }
 0xf3a   :  { %4391 = vmatpush3.msra.mxu1 %v175_v28 }
 0xf3b   :  { %4392 = vmatprep.subr.mxu1 %v174_v49 }
 0xf3c   :  { %4393 = vmatpush3.msra.mxu1 %v174_v49 }
 0xf3d   :  { %4394 = vmatprep.subr.mxu1 %v173_v43 }
 0xf3e   :  { %4395 = vmatpush3.msra.mxu1 %v173_v43  ;;  %v4680_v43 = vld [vmem:[%s6264_s16] sm:$0x7] }
 0xf3f   :  { %4396 = vmatprep.subr.mxu1 %v172_v3 }
 0xf40   :  { %4397 = vmatpush3.msra.mxu1 %v172_v3  ;;  %v3968_v3 = vrot.slane %v4680_v43, %v5812_v7 }
 0xf41   :  { %4398 = vmatprep.subr.mxu1 %v171_v9 }
 0xf42   :  { %4399 = vmatpush3.msra.mxu1 %v171_v9 }
 0xf43   :  { %4400 = vmatprep.subr.mxu1 %v170_v24 }
 0xf44   :  { %4401 = vmatpush3.msra.mxu1 %v170_v24 }
 0xf45   :  { %4402 = vmatprep.subr.mxu1 %v169_v53 }
 0xf46   :  { %4403 = vmatpush3.msra.mxu1 %v169_v53 }
 0xff7   :  { %v4380_v41 = vpop.f32.mrf.mxu1 }
 0xff8   :  { %v3783_v63 = vadd.f32 %v4380_v41, %v3676_v30 }
 0xff9   :  { %v3777_v13 = vpop.f32.mrf.mxu1 }
 0xffa   :  { %v6168_v11 = vadd.f32 %v3783_v63, %v5789_v58  ;;  %v3778_v38 = vadd.f32 %v3777_v13, %v3676_v30 }
 0xffc   :  { %v6171_v32 = vadd.f32 %v3778_v38, %v5792_v33  ;;  %v3791_v50 = vsel %vm178_vm0, %v6168_v11, 0.0 }
 0xffd   :  { %3792 = vadd.xlane.f32.xlu1 %v3791_v50 }
 0xffe   :  { %v3788_v40 = vsel %vm178_vm0, %v6171_v32, 0.0 }
 0xfff   :  { %3789 = vadd.xlane.f32.xlu0 %v3788_v40 }
0x1086   :  { %v3793_v36 = vpop.xlane.xlu1 %3792 }
0x1087   :  { %v3795_v31 = vmul.f32 0.0625, %v3793_v36 }
0x1088   :  { %v3790_v5 = vpop.xlane.xlu0 %3789 }
0x1089   :  { %v3797_v47 = vsub.f32 %v6168_v11, %v3795_v31  ;;  %v3794_v18 = vmul.f32 0.0625, %v3790_v5 }
0x108b   :  { %v3796_v58 = vsub.f32 %v6171_v32, %v3794_v18  ;;  %v3799_v23 = vmul.f32 %v3797_v47, %v3797_v47 }
0x108d   :  { %v3803_v33 = vsel %vm178_vm0, %v3799_v23, 0.0  ;;  %v3798_v8 = vmul.f32 %v3796_v58, %v3796_v58 }
0x108e   :  { %3804 = vadd.xlane.f32.xlu1 %v3803_v33 }
0x108f   :  { %v3800_v52 = vsel %vm178_vm0, %v3798_v8, 0.0 }
0x1090   :  { %3801 = vadd.xlane.f32.xlu0 %v3800_v52 }
0x1117   :  { %v3805_v56 = vpop.xlane.xlu1 %3804 }
0x1118   :  { %v3807_v42 = vmul.f32 0.0625, %v3805_v56 }
0x1119   :  { %v3802_v0 = vpop.xlane.xlu0 %3801 }
0x111a   :  { %v3809_v44 = vadd.f32 1e-05, %v3807_v42  ;;  %v3806_v17 = vmul.f32 0.0625, %v3802_v0 }
0x111c   :  { %4643 = vrsqrt.f32 %v3809_v44  ;;  %v3808_v34 = vadd.f32 1e-05, %v3806_v17 }
0x111e   :  { %4645 = vrsqrt.f32 %v3808_v34 }
0x1129   :  { %v4644_v2 = vpop.eup %4643 }
0x112a   :  { %v3813_v59 = vmul.f32 %v4644_v2, %v3797_v47 }
0x112b   :  { %v4646_v51 = vpop.eup %4645 }
0x112c   :  { %v3812_v21 = vmul.f32 %v4646_v51, %v3796_v58  ;;  %v3819_v20 = vmul.f32 %v3817_v27, %v3813_v59 }
0x112e   :  { %v3818_v37 = vmul.f32 %v3817_v27, %v3812_v21  ;;  %v3825_v39 = vadd.f32 %v3823_v48, %v3819_v20 }
0x1130   :  { %v3824_v45 = vadd.f32 %v3823_v48, %v3818_v37 }
0x1132   :  { %4385 = vmatprep.mubr.msk.f32.mxu0 %vm178_vm0, %v3824_v45 }
0x1133   :  { %4386 = vmatmul.mubr.msk.f32.vlgmr.msra.gmra.mxu0 %vm178_vm0, %v3825_v39 }
0x11f3   :  { %v4387_v12 = vpop.f32.mrf.mxu0 }
0x11f4   :  { %v3908_v55 = vadd.f32 %v4387_v12, %v3829_v25 }
0x11f5   :  { %v3902_v4 = vpop.f32.mrf.mxu0 }
0x11f6   :  { %v3914_v26 = vmul.f32 0.70710677, %v3908_v55  ;;  %v3903_v29 = vadd.f32 %v3902_v4, %v3829_v25  ;;  %v3912_v19 = vmul.f32 0.5, %v3908_v55 }
0x11f8   :  { %v3916_v35 = vand.u32 2147483647, %v3914_v26  ;;  %v3913_v22 = vmul.f32 0.70710677, %v3903_v29  ;;  %vm3956_vm13 = vcmp.ge.f32.partialorder %v3914_v26, 0.0  ;;  %v3911_v45 = vmul.f32 0.5, %v3903_v29 }
0x11fa   :  { %v3918_v15 = vmul.f32 0.3275911, %v3916_v35  ;;  %v3915_v16 = vand.u32 2147483647, %v3913_v22  ;;  %v3944_v62 = vsub.f32 0.0, %v3916_v35  ;;  %vm3955_vm14 = vcmp.ge.f32.partialorder %v3913_v22, 0.0 }
0x11fc   :  { %v3920_v14 = vadd.f32 1.0, %v3918_v15  ;;  %v3917_v6 = vmul.f32 0.3275911, %v3915_v16  ;;  %v3943_v46 = vsub.f32 0.0, %v3915_v16  ;;  %v3946_v30 = vmul.f32 %v3944_v62, %v3916_v35 }
0x11fe   :  { %4647 = vrcp.f32 %v3920_v14  ;;  %v3919_v1 = vadd.f32 1.0, %v3917_v6  ;;  %v3945_v63 = vmul.f32 %v3943_v46, %v3915_v16  ;;  %v3949_v38 = vmul.f32 1.442695, %v3946_v30 }
0x1200   :  { %4649 = vrcp.f32 %v3919_v1  ;;  %v3947_v31 = vmul.f32 1.442695, %v3945_v63 }
0x1201   :  { %4651 = vpow2.f32 %v3949_v38 }
0x1202   :  { %4653 = vpow2.f32 %v3947_v31 }
0x120b   :  { %v4648_v41 = vpop.eup %4647 }
0x120c   :  { %v3926_v13 = vmul.f32 1.0614054, %v4648_v41 }
0x120d   :  { %v4650_v50 = vpop.eup %4649 }
0x120e   :  { %v3928_v40 = vadd.f32 -1.4531521, %v3926_v13  ;;  %v3925_v36 = vmul.f32 1.0614054, %v4650_v50  ;;  %v4652_v44 = vpop.eup %4651  ;;  %v4153_v13 = vld [vmem:[%s6265_s17] ss:$0 sm:$0xff] }
0x120f   :  { %v4654_v10 = vpop.eup %4653 }
0x1210   :  { %v3930_v5 = vmul.f32 %v4648_v41, %v3928_v40  ;;  %v3927_v47 = vadd.f32 -1.4531521, %v3925_v36  ;;  %v4154_v40 = vld [vmem:[%s6266_s18] ss:$0 sm:$0xff] }
0x1212   :  { %v3932_v18 = vadd.f32 1.4214138, %v3930_v5  ;;  %v3929_v58 = vmul.f32 %v4650_v50, %v3927_v47 }
0x1214   :  { %v3934_v23 = vmul.f32 %v4648_v41, %v3932_v18  ;;  %v3931_v33 = vadd.f32 1.4214138, %v3929_v58 }
0x1216   :  { %v3936_v8 = vadd.f32 -0.28449672, %v3934_v23  ;;  %v3933_v52 = vmul.f32 %v4650_v50, %v3931_v33 }
0x1218   :  { %v3938_v61 = vmul.f32 %v4648_v41, %v3936_v8  ;;  %v3935_v57 = vadd.f32 -0.28449672, %v3933_v52 }
0x121a   :  { %v3940_v56 = vadd.f32 0.2548296, %v3938_v61  ;;  %v3937_v42 = vmul.f32 %v4650_v50, %v3935_v57 }
0x121c   :  { %v3942_v0 = vmul.f32 %v4648_v41, %v3940_v56  ;;  %v3939_v17 = vadd.f32 0.2548296, %v3937_v42 }
0x121e   :  { %v3952_v34 = vmul.f32 %v4652_v44, %v3942_v0  ;;  %v3941_v2 = vmul.f32 %v4650_v50, %v3939_v17 }
0x1220   :  { %v3954_v27 = vsub.f32 1.0, %v3952_v34  ;;  %v3951_v59 = vmul.f32 %v4654_v10, %v3941_v2 }
0x1222   :  { %v3958_v51 = vsub.f32 0.0, %v3954_v27  ;;  %v3953_v21 = vsub.f32 1.0, %v3951_v59 }
0x1224   :  { %v3960_v20 = vsel %vm3956_vm13, %v3954_v27, %v3958_v51  ;;  %v3957_v54 = vsub.f32 0.0, %v3953_v21 }
0x1225   :  { %v3962_v48 = vadd.f32 1.0, %v3960_v20 }
0x1226   :  { %v3959_v37 = vsel %vm3955_vm14, %v3953_v21, %v3957_v54 }
0x1227   :  { %v3961_v39 = vadd.f32 1.0, %v3959_v37  ;;  %v3964_v49 = vmul.f32 %v3962_v48, %v3912_v19 }
0x1229   :  { %v3963_v28 = vmul.f32 %v3961_v39, %v3911_v45 }
0x122b   :  { %4404 = vmatprep.mubr.msk.f32.mxu1 %vm1392_vm10, %v3963_v28 }
0x122c   :  { %4405 = vmatmul.mubr.msk.f32.vlgmr.msra.gmra.mxu1 %vm1392_vm10, %v3964_v49 }
0x12ec   :  { %v4406_v9 = vpop.f32.mrf.mxu1 }
0x12ed   :  { %v4047_v24 = vadd.f32 %v4406_v9, %v3968_v3 }
0x12ee   :  { %v4041_v53 = vpop.f32.mrf.mxu1 }
0x12ef   :  { %v4042_v60 = vadd.f32 %v4041_v53, %v3968_v3  ;;  %v4051_v25 = vadd.f32 %v4047_v24, %v6168_v11 }
0x12f1   :  { %v4057_v12 = vsel %vm178_vm0, %v4051_v25, 0.0  ;;  %v4050_v55 = vadd.f32 %v4042_v60, %v6171_v32 }
0x12f2   :  { %4058 = vadd.xlane.f32.xlu1 %v4057_v12 }
0x12f3   :  { %v4054_v4 = vsel %vm178_vm0, %v4050_v55, 0.0 }
0x12f4   :  { %4055 = vadd.xlane.f32.xlu0 %v4054_v4 }
0x137b   :  { %v4059_v26 = vpop.xlane.xlu1 %4058 }
0x137c   :  { %v4061_v29 = vmul.f32 0.0625, %v4059_v26 }
0x137d   :  { %v4056_v35 = vpop.xlane.xlu0 %4055 }
0x137e   :  { %v4063_v22 = vsub.f32 %v4051_v25, %v4061_v29  ;;  %v4060_v15 = vmul.f32 0.0625, %v4056_v35 }
0x1380   :  { %v4062_v7 = vsub.f32 %v4050_v55, %v4060_v15  ;;  %v4065_v16 = vmul.f32 %v4063_v22, %v4063_v22 }
0x1382   :  { %v4069_v14 = vsel %vm178_vm0, %v4065_v16, 0.0  ;;  %v4064_v6 = vmul.f32 %v4062_v7, %v4062_v7 }
0x1383   :  { %4070 = vadd.xlane.f32.xlu1 %v4069_v14 }
0x1384   :  { %v4066_v11 = vsel %vm178_vm0, %v4064_v6, 0.0 }
0x1385   :  { %4067 = vadd.xlane.f32.xlu0 %v4066_v11 }
0x140c   :  { %v4071_v1 = vpop.xlane.xlu1 %4070 }
0x140d   :  { %v4073_v32 = vmul.f32 0.0625, %v4071_v1 }
0x140e   :  { %v4068_v62 = vpop.xlane.xlu0 %4067 }
0x140f   :  { %v4075_v46 = vadd.f32 1e-05, %v4073_v32  ;;  %v4072_v30 = vmul.f32 0.0625, %v4068_v62 }
0x1411   :  { %4655 = vrsqrt.f32 %v4075_v46  ;;  %v4074_v41 = vadd.f32 1e-05, %v4072_v30 }
0x1413   :  { %4657 = vrsqrt.f32 %v4074_v41 }
0x141e   :  { %v4656_v63 = vpop.eup %4655 }
0x141f   :  { %v4079_v38 = vmul.f32 %v4656_v63, %v4063_v22 }
0x1420   :  { %v4658_v50 = vpop.eup %4657 }
0x1421   :  { %v4078_v36 = vmul.f32 %v4658_v50, %v4062_v7  ;;  %v4087_v31 = vmul.f32 %v4153_v13, %v4079_v38 }
0x1423   :  { %v4086_v5 = vmul.f32 %v4153_v13, %v4078_v36  ;;  %v4095_v47 = vadd.f32 %v4154_v40, %v4087_v31 }
0x1425   :  { %v4094_v18 = vadd.f32 %v4154_v40, %v4086_v5  ;;  %4097 = vst.msk [vmem:[#allocation10 + $0x8] sm:$0xff] %vm178_vm0, %v4095_v47 }
0x1427   :  { %4096 = vst.msk [vmem:[#allocation10] sm:$0xff] %vm178_vm0, %v4094_v18 }
0x1428   :  { %4772 = shalt.err (!%p4769_p10)
}
0x1429   :  { %4109 = dma.vmem_to_hbm [thread:$0]  %s4104_s29, 256, %s6267_s19, [#allocation4], %s4791_s25, %s4791_s25, %s4792_s3  }
0x142a   :  { %4787 = dma.done.wait [#allocation4], 256  }
0x142b   :  { %4788 = vsyncadd [#allocation4], 4294967040 }
0x142c   :  { %4113 = vsyncpa [#allocation3], 1 }
0x142d   :  { %4114 = vsyncpa [#allocation6], 1 }
0x142e   :  { %4115 = vsyncpa [#allocation9], 1 }
0x142f   :  { %4116 = vsyncpa [#allocation4], 1 }

</bundles_post_ra>
